<compile_context>
chip_gen: v7x
topology: tpu7x:2x2x1
jax: 0.10.0
libtpu: 0.0.40
codegen_flags: <defaults>
</compile_context>

<pallas_src>
import math
import functools

import jax
import jax.numpy as jnp
from jax.experimental import pallas as pl
from jax.experimental.pallas import tpu as pltpu


VMEM_LIMIT = 32 * 1024 * 1024   # explicit scoped-VMEM budget, safe on v5e/v6e/v7x
LN_EPS = 1e-5                   # torch nn.LayerNorm default


def _round_up(x, m):
    return ((x + m - 1) // m) * m


def _layernorm(x, g, b, eps=LN_EPS):
    mean = jnp.mean(x, axis=-1, keepdims=True)
    var = jnp.mean(jnp.square(x - mean), axis=-1, keepdims=True)
    return (x - mean) * jax.lax.rsqrt(var + eps) * g + b


# ----------------------------------------------------------------------------
# Generic row-tiled launcher for the fused "matmul (+ extras)" kernels
# ----------------------------------------------------------------------------

def _row_tiled(kernel_fn, row_inputs, const_inputs, n_out, out_dtype=jnp.float32):
    """Run kernel_fn over row tiles of the (M, .) row_inputs.

    const_inputs (all 2-D: weights / biases / LN params) are replicated to
    every tile.  Output is (M, n_out).
    """
    M = row_inputs[0].shape[0]
    tm = min(_round_up(M, 8), 256)
    Mp = _round_up(M, tm)
    if Mp != M:
        row_inputs = [jnp.pad(a, ((0, Mp - M), (0, 0))) for a in row_inputs]
    in_specs = [pl.BlockSpec((tm, a.shape[1]), lambda i: (i, 0)) for a in row_inputs]
    in_specs += [pl.BlockSpec(c.shape, lambda i: (0, 0)) for c in const_inputs]
    out = pl.pallas_call(
        kernel_fn,
        out_shape=jax.ShapeDtypeStruct((Mp, n_out), out_dtype),
        grid_spec=pltpu.PrefetchScalarGridSpec(
            num_scalar_prefetch=0,
            grid=(Mp // tm,),
            in_specs=in_specs,
            out_specs=pl.BlockSpec((tm, n_out), lambda i: (i, 0)),
        ),
        compiler_params=pltpu.CompilerParams(
            dimension_semantics=("parallel",),
            vmem_limit_bytes=VMEM_LIMIT),
    )(*row_inputs, *const_inputs)
    return out[:M] if Mp != M else out


# ----------------------------------------------------------------------------
# Kernels
# ----------------------------------------------------------------------------

def _linear_kernel(x_ref, w_ref, b_ref, o_ref):
    y = jnp.dot(x_ref[...].astype(jnp.bfloat16), w_ref[...],
                preferred_element_type=jnp.float32) + b_ref[...]
    o_ref[...] = y.astype(o_ref.dtype)


def linear(x, w_bf16, b, out_dtype=jnp.float32):
    n = w_bf16.shape[1]
    return _row_tiled(_linear_kernel, [x],
                      [w_bf16, b.reshape(1, n).astype(jnp.float32)],
                      n, out_dtype)


def _outproj_res_ln_kernel(x_ref, r_ref, w_ref, b_ref, g_ref, be_ref, o_ref):
    # fused: attention out-projection + residual add + LayerNorm1
    y = jnp.dot(x_ref[...].astype(jnp.bfloat16), w_ref[...],
                preferred_element_type=jnp.float32)
    y = y + b_ref[...] + r_ref[...]
    o_ref[...] = _layernorm(y, g_ref[...], be_ref[...])


def outproj_residual_ln(attn, resid, w_bf16, b, g, beta):
    n = w_bf16.shape[1]
    consts = [w_bf16,
              b.reshape(1, n).astype(jnp.float32),
              g.reshape(1, n).astype(jnp.float32),
              beta.reshape(1, n).astype(jnp.float32)]
    return _row_tiled(_outproj_res_ln_kernel, [attn, resid], consts, n, jnp.float32)


def _memadd_proj_ln_kernel(x_ref, m_ref, w_ref, b_ref, g_ref, be_ref, o_ref):
    # fused: memory-buffer injection + projection + LayerNorm2
    x = x_ref[...] + m_ref[...]
    y = jnp.dot(x.astype(jnp.bfloat16), w_ref[...],
                preferred_element_type=jnp.float32) + b_ref[...]
    o_ref[...] = _layernorm(y, g_ref[...], be_ref[...])


def memadd_proj_ln(x, mem_mean, w_bf16, b, g, beta):
    n = w_bf16.shape[1]
    consts = [mem_mean.astype(jnp.float32), w_bf16,
              b.reshape(1, n).astype(jnp.float32),
              g.reshape(1, n).astype(jnp.float32),
              beta.reshape(1, n).astype(jnp.float32)]
    return _row_tiled(_memadd_proj_ln_kernel, [x], consts, n, jnp.float32)


def _head_kernel(x_ref, w1_ref, b1_ref, g_ref, be_ref, w2_ref, b2_ref,
                 o_ref, h1_ref):
    # fused output head: Linear(H,H) -> LN -> ReLU (once per row tile, kept in
    # a VMEM scratch) -> Linear(H, Vpad) tiled over the lane-dense vocab axis.
    @pl.when(pl.program_id(1) == 0)
    def _():
        y = jnp.dot(x_ref[...].astype(jnp.bfloat16), w1_ref[...],
                    preferred_element_type=jnp.float32) + b1_ref[...]
        y = _layernorm(y, g_ref[...], be_ref[...])
        h1_ref[...] = jnp.maximum(y, 0.0).astype(jnp.bfloat16)
    o_ref[...] = (jnp.dot(h1_ref[...], w2_ref[...],
                          preferred_element_type=jnp.float32) + b2_ref[...])


def output_head(x, w1_bf16, b1, g, beta, w2pad_bf16, b2pad, *, tv=256):
    M, H = x.shape
    Vpad = w2pad_bf16.shape[1]
    tm = min(_round_up(M, 8), 256)
    Mp = _round_up(M, tm)
    xp = jnp.pad(x, ((0, Mp - M), (0, 0))) if Mp != M else x
    out = pl.pallas_call(
        _head_kernel,
        out_shape=jax.ShapeDtypeStruct((Mp, Vpad), jnp.float32),
        grid_spec=pltpu.PrefetchScalarGridSpec(
            num_scalar_prefetch=0,
            grid=(Mp // tm, Vpad // tv),
            in_specs=[
                pl.BlockSpec((tm, H), lambda i, j: (i, 0)),
                pl.BlockSpec((H, H), lambda i, j: (0, 0)),
                pl.BlockSpec((1, H), lambda i, j: (0, 0)),
                pl.BlockSpec((1, H), lambda i, j: (0, 0)),
                pl.BlockSpec((1, H), lambda i, j: (0, 0)),
                pl.BlockSpec((H, tv), lambda i, j: (0, j)),
                pl.BlockSpec((1, tv), lambda i, j: (0, j)),
            ],
            out_specs=pl.BlockSpec((tm, tv), lambda i, j: (i, j)),
            scratch_shapes=[pltpu.VMEM((tm, H), jnp.bfloat16)],
        ),
        compiler_params=pltpu.CompilerParams(
            dimension_semantics=("parallel", "arbitrary"),
            vmem_limit_bytes=VMEM_LIMIT),
    )(xp, w1_bf16,
      b1.reshape(1, H).astype(jnp.float32),
      g.reshape(1, H).astype(jnp.float32),
      beta.reshape(1, H).astype(jnp.float32),
      w2pad_bf16, b2pad.reshape(1, Vpad).astype(jnp.float32))
    return out[:M] if Mp != M else out


def _bigru_kernel(gx_ref, mask_ref, h0_ref, whh_ref, bhh_ref,
                  out_ref, hlast_ref, *, seq_len, hidden):
    # Both GRU directions in one pallas_call: grid axis 0 = direction.
    d = pl.program_id(0)            # 0 = forward, 1 = reverse
    whh = whh_ref[...]              # (H, 3H) bf16 (resident for the whole loop)
    bhh = bhh_ref[...]              # (1, 3H) f32
    H = hidden

    def step(t, h):
        tt = jnp.where(d == 0, t, seq_len - 1 - t)
        gx = gx_ref[tt]             # (B, 3H) f32 = x @ W_ih^T + b_ih (precomputed)
        m = mask_ref[tt]            # (B, 1)  1.0 where t < length
        gh = jnp.dot(h.astype(jnp.bfloat16), whh,
                     preferred_element_type=jnp.float32) + bhh
        r = jax.nn.sigmoid(gx[:, :H] + gh[:, :H])
        z = jax.nn.sigmoid(gx[:, H:2 * H] + gh[:, H:2 * H])
        n = jnp.tanh(gx[:, 2 * H:] + r * gh[:, 2 * H:])
        h_new = n + z * (h - n)          # == (1-z)*n + z*h
        h_upd = h + m * (h_new - h)      # packed-seq: hold state on padding
        out_ref[tt] = m * h_upd          # pad_packed_sequence zero-pads
        return h_upd

    h_final = jax.lax.fori_loop(0, seq_len, step, h0_ref[...],
                                unroll=bool(seq_len <= 32))
    hlast_ref[...] = h_final             # written once, after the loop


def bigru(gx, mask, h0, whh, bhh):
    """gx: (2,T,B,3H) f32, mask: (T,B,1) f32, h0: (2,B,H) f32,
    whh: (2,H,3H) bf16, bhh: (2,1,3H) f32 ->
    out: (2,T,B,H) zero-padded, h_last: (2,B,H)."""
    _, T, B, G = gx.shape
    H = G // 3
    return pl.pallas_call(
        functools.partial(_bigru_kernel, seq_len=T, hidden=H),
        out_shape=(jax.ShapeDtypeStruct((2, T, B, H), jnp.float32),
                   jax.ShapeDtypeStruct((2, B, H), jnp.float32)),
        grid_spec=pltpu.PrefetchScalarGridSpec(
            num_scalar_prefetch=0,
            grid=(2,),
            in_specs=[
                pl.BlockSpec((None, T, B, G), lambda d: (d, 0, 0, 0)),
                pl.BlockSpec((T, B, 1), lambda d: (0, 0, 0)),
                pl.BlockSpec((None, B, H), lambda d: (d, 0, 0)),
                pl.BlockSpec((None, H, G), lambda d: (d, 0, 0)),
                pl.BlockSpec((None, 1, G), lambda d: (d, 0, 0)),
            ],
            out_specs=(
                pl.BlockSpec((None, T, B, H), lambda d: (d, 0, 0, 0)),
                pl.BlockSpec((None, B, H), lambda d: (d, 0, 0)),
            ),
        ),
        compiler_params=pltpu.CompilerParams(
            dimension_semantics=("parallel",),   # v7x: one TC per direction
            vmem_limit_bytes=VMEM_LIMIT),
    )(gx, mask, h0, whh, bhh)


def _attn_kernel(q_ref, k_ref, v_ref, o_ref, *, scale):
    q = q_ref[...]                      # (nh, T, d) bf16 (both heads, one batch)
    k = k_ref[...]
    v = v_ref[...]
    s = jax.lax.dot_general(q, k, (((2,), (2,)), ((0,), (0,))),
                            preferred_element_type=jnp.float32) * scale
    s = s - jnp.max(s, axis=-1, keepdims=True)
    p = jnp.exp(s)
    p = p * pl.reciprocal(jnp.sum(p, axis=-1, keepdims=True), approx=True)
    o = jax.lax.dot_general(p.astype(v.dtype), v, (((2,), (1,)), ((0,), (0,))),
                            preferred_element_type=jnp.float32)
    o_ref[...] = o.astype(o_ref.dtype)


def mha_core(q, k, v, scale):
    """q,k,v: (B, nh, T, d) bf16 -> (B, nh, T, d) bf16. No mask (matches ref)."""
    B, nh, T, d = q.shape
    spec = pl.BlockSpec((None, nh, T, d), lambda b: (b, 0, 0, 0))
    return pl.pallas_call(
        functools.partial(_attn_kernel, scale=scale),
        out_shape=jax.ShapeDtypeStruct((B, nh, T, d), jnp.bfloat16),
        grid_spec=pltpu.PrefetchScalarGridSpec(
            num_scalar_prefetch=0,
            grid=(B,),
            in_specs=[spec, spec, spec],
            out_specs=spec,
        ),
        compiler_params=pltpu.CompilerParams(
            dimension_semantics=("parallel",),
            vmem_limit_bytes=VMEM_LIMIT),
    )(q, k, v)


# ----------------------------------------------------------------------------
# Parameters (deterministic synthetic init; shapes follow the torch module)
# ----------------------------------------------------------------------------

def init_params(key, vocab_size, embedding_dim, hidden_size):
    E, H = embedding_dim, hidden_size
    B2 = 2 * H
    ks = jax.random.split(key, 16)

    def u(k, shape, scale=0.1):
        return jax.random.uniform(k, shape, jnp.float32, -1.0, 1.0) * scale

    p = {}
    emb = u(ks[0], (vocab_size, E))
    p["embedding"] = emb.at[0].set(0.0)          # padding_idx = 0

    # Bidirectional single-layer GRU (torch weight shapes: (3H, in), (3H, H))
    p["gru_w_ih_f"] = u(ks[1], (3 * H, E))
    p["gru_w_hh_f"] = u(ks[2], (3 * H, H))
    p["gru_b_ih_f"] = jnp.zeros((3 * H,), jnp.float32)
    p["gru_b_hh_f"] = jnp.zeros((3 * H,), jnp.float32)
    p["gru_w_ih_r"] = u(ks[3], (3 * H, E))
    p["gru_w_hh_r"] = u(ks[4], (3 * H, H))
    p["gru_b_ih_r"] = jnp.zeros((3 * H,), jnp.float32)
    p["gru_b_hh_r"] = jnp.zeros((3 * H,), jnp.float32)

    # MultiheadAttention(embed=2H)
    p["attn_in_proj_w"] = u(ks[5], (3 * B2, B2))
    p["attn_in_proj_b"] = jnp.zeros((3 * B2,), jnp.float32)
    p["attn_out_proj_w"] = u(ks[6], (B2, B2))
    p["attn_out_proj_b"] = jnp.zeros((B2,), jnp.float32)

    p["memory_buffer"] = u(ks[7], (5, B2))

    p["proj_w"] = u(ks[8], (H, B2))
    p["proj_b"] = jnp.zeros((H,), jnp.float32)

    # output head: Linear(H,H) -> LN(H) -> Dropout -> ReLU -> Linear(H,V)
    p["out_l1_w"] = u(ks[9], (H, H))
    p["out_l1_b"] = jnp.zeros((H,), jnp.float32)
    p["out_ln_g"] = jnp.ones((H,), jnp.float32)
    p["out_ln_b"] = jnp.zeros((H,), jnp.float32)
    p["out_l2_w"] = u(ks[10], (vocab_size, H))
    p["out_l2_b"] = jnp.zeros((vocab_size,), jnp.float32)

    p["ln1_g"] = jnp.ones((B2,), jnp.float32)
    p["ln1_b"] = jnp.zeros((B2,), jnp.float32)
    p["ln2_g"] = jnp.ones((H,), jnp.float32)
    p["ln2_b"] = jnp.zeros((H,), jnp.float32)
    return p


# ----------------------------------------------------------------------------
# Forward pass (inference: dropout layers are identity)
# ----------------------------------------------------------------------------

def resonance_forward(params, x, lengths, hidden=None, num_heads=2):
    """x: (B, T) int32 token ids, lengths: (B,) int32.  T == max(lengths)."""
    B, T = x.shape
    E = params["embedding"].shape[1]
    H = params["proj_w"].shape[0]
    B2 = 2 * H
    V = params["out_l2_w"].shape[0]
    d_head = B2 // num_heads
    M = T * B

    # bf16 weight views for the MXU (accumulation stays f32 inside kernels)
    w_gates = jnp.concatenate([params["gru_w_ih_f"], params["gru_w_ih_r"]],
                              axis=0).T.astype(jnp.bfloat16)          # (E, 6H)
    b_gates = jnp.concatenate([params["gru_b_ih_f"], params["gru_b_ih_r"]], axis=0)
    whh = jnp.stack([params["gru_w_hh_f"].T, params["gru_w_hh_r"].T],
                    axis=0).astype(jnp.bfloat16)                      # (2,H,3H)
    bhh = jnp.stack([params["gru_b_hh_f"], params["gru_b_hh_r"]],
                    axis=0).reshape(2, 1, 3 * H)                      # (2,1,3H)
    w_inp = params["attn_in_proj_w"].T.astype(jnp.bfloat16)           # (B2,3B2)
    w_outp = params["attn_out_proj_w"].T.astype(jnp.bfloat16)         # (B2,B2)
    w_proj = params["proj_w"].T.astype(jnp.bfloat16)                  # (B2,H)
    w_l1 = params["out_l1_w"].T.astype(jnp.bfloat16)                  # (H,H)
    Vpad = _round_up(V, 256)                                          # lane-dense vocab
    w_l2 = jnp.pad(params["out_l2_w"].T, ((0, 0), (0, Vpad - V))).astype(jnp.bfloat16)
    b_l2 = jnp.pad(params["out_l2_b"], (0, Vpad - V))

    # 1) embedding + dropout(identity)
    # TODO(synk): embedding gather stays in JAX (data-dependent gather; a manual
    # DMA-gather Pallas kernel is overkill here).
    emb = jnp.take(params["embedding"], x, axis=0)           # (B, T, E)
    emb_tb = jnp.transpose(emb, (1, 0, 2))                   # (T, B, E) time-major
    flat = emb_tb.reshape(M, E)

    # packed-sequence mask: valid iff t < length
    mask = (jnp.arange(T)[:, None] < lengths[None, :]).astype(jnp.float32)
    mask_tb1 = mask[:, :, None]                              # (T, B, 1)

    if hidden is None:
        hidden = jnp.zeros((2, B, H), jnp.float32)

    # 2) bidirectional GRU: one fused input-gate matmul (both directions),
    #    then a single pallas_call running forward + reverse recurrences.
    gx6 = linear(flat, w_gates, b_gates)                     # (M, 6H) f32
    gx = jnp.stack([gx6[:, :3 * H].reshape(T, B, 3 * H),
                    gx6[:, 3 * H:].reshape(T, B, 3 * H)], axis=0)     # (2,T,B,3H)
    out_fr, h_last = bigru(gx, mask_tb1, hidden.astype(jnp.float32), whh, bhh)
    gru_out = jnp.concatenate([out_fr[0], out_fr[1]], axis=-1)        # (T,B,2H)
    gru_flat = gru_out.reshape(M, B2)

    # 3) self-attention (no key padding mask, matching the reference)
    qkv = linear(gru_flat, w_inp, params["attn_in_proj_b"],
                 out_dtype=jnp.bfloat16)                     # (M, 3*B2) bf16
    qkv = qkv.reshape(T, B, 3, num_heads, d_head)
    qkv = jnp.transpose(qkv, (2, 1, 3, 0, 4))                # (3, B, nh, T, d)
    attn = mha_core(qkv[0], qkv[1], qkv[2], 1.0 / math.sqrt(d_head))  # (B,nh,T,d)
    attn_flat = jnp.transpose(attn, (2, 0, 1, 3)).reshape(M, B2)      # (M, B2) bf16

    # 4) fused: out-projection + residual + LayerNorm1
    out1 = outproj_residual_ln(attn_flat, gru_flat, w_outp,
                               params["attn_out_proj_b"],
                               params["ln1_g"], params["ln1_b"])      # (M, B2)

    # 5) memory-buffer update (in-place in torch; functional here)
    out1_tb = out1.reshape(T, B, B2)
    mem_new = 0.9 * params["memory_buffer"] + \
        0.1 * jnp.mean(out1_tb[-1], axis=0, keepdims=True)   # (5, 2H)
    mem_mean = jnp.mean(mem_new, axis=0, keepdims=True)      # (1, 2H)

    # 6) fused: memory injection + projection + LayerNorm2
    proj = memadd_proj_ln(out1, mem_mean, w_proj, params["proj_b"],
                          params["ln2_g"], params["ln2_b"])  # (M, H)

    # 7) fused output head (vocab padded to Vpad, sliced back)
    logits = output_head(proj, w_l1, params["out_l1_b"],
                         params["out_ln_g"], params["out_ln_b"],
                         w_l2, b_l2)[:, :V]                  # (M, V)

    prediction = jnp.transpose(logits.reshape(T, B, V), (1, 0, 2))    # (B, T, V)
    output = jnp.transpose(proj.reshape(T, B, H), (1, 0, 2))          # (B, T, H)
    return prediction, output, h_last, mem_new


# ----------------------------------------------------------------------------
# Demo
# ----------------------------------------------------------------------------

if __name__ == "__main__":
    vocab_size = 1000
    embedding_dim = 64
    hidden_size = 32
    num_heads = 2
    B, T = 2, 8

    key = jax.random.PRNGKey(0)
    pkey, xkey = jax.random.split(key)
    params = init_params(pkey, vocab_size, embedding_dim, hidden_size)

    lengths = jnp.array([8, 5], dtype=jnp.int32)
    x = jax.random.randint(xkey, (B, T), 1, vocab_size, dtype=jnp.int32)
    # zero (padding token) past each sequence length, like a padded batch
    x = jnp.where(jnp.arange(T)[None, :] < lengths[:, None], x, 0)

    fwd = jax.jit(functools.partial(resonance_forward, num_heads=num_heads))
    prediction, output, hidden, mem = fwd(params, x, lengths)
    jax.block_until_ready((prediction, output, hidden, mem))

    assert prediction.shape == (B, T, vocab_size)
    assert output.shape == (B, T, hidden_size)
    assert hidden.shape == (2, B, hidden_size)
    assert mem.shape == (5, 2 * hidden_size)
    assert bool(jnp.isfinite(prediction).all())
    print("KERNEL_OK")
</pallas_src>

<mosaic_0001>
module attributes {stable_mosaic.version = 11 : i64} {
  func.func @_linear_kernel(%arg0: i32, %arg1: memref<16x64xf32, #tpu.memory_space<vmem>>, %arg2: memref<64x192xbf16, #tpu.memory_space<vmem>>, %arg3: memref<1x192xf32, #tpu.memory_space<vmem>>, %arg4: memref<16x192xf32, #tpu.memory_space<vmem>>) attributes {dimension_semantics = [#tpu.dimension_semantics<parallel>], iteration_bounds = array<i64: 1>, scalar_prefetch = 0 : i64, scratch_operands = 0 : i64, tpu.core_type = #tpu.core_type<tc>, window_params = [{transform_indices = @transform_0, window_bounds = array<i64: 16, 64>}, {pipeline_mode = #tpu.pipeline_mode<synchronous>, transform_indices = @transform_1, window_bounds = array<i64: 64, 192>}, {pipeline_mode = #tpu.pipeline_mode<synchronous>, transform_indices = @transform_2, window_bounds = array<i64: 1, 192>}, {transform_indices = @transform_3, window_bounds = array<i64: 16, 192>}]} {
    %c0 = arith.constant 0 : index
    %c0_0 = arith.constant 0 : index
    %0 = vector.load %arg1[%c0, %c0_0] : memref<16x64xf32, #tpu.memory_space<vmem>>, vector<16x64xf32>
    %1 = arith.truncf %0 : vector<16x64xf32> to vector<16x64xbf16>
    %c0_1 = arith.constant 0 : index
    %c0_2 = arith.constant 0 : index
    %2 = vector.load %arg2[%c0_1, %c0_2] : memref<64x192xbf16, #tpu.memory_space<vmem>>, vector<64x192xbf16>
    %cst = arith.constant dense<0.000000e+00> : vector<16x192xf32>
    %3 = tpu.matmul %1, %2, %cst {dimension_numbers = #tpu.dot_dimension_numbers<[1], [0], [0], [1], [0, 0, 1, 1], [], []>} : vector<16x64xbf16>, vector<64x192xbf16>, vector<16x192xf32> -> vector<16x192xf32>
    %c0_3 = arith.constant 0 : index
    %c0_4 = arith.constant 0 : index
    %4 = vector.load %arg3[%c0_3, %c0_4] : memref<1x192xf32, #tpu.memory_space<vmem>>, vector<1x192xf32>
    %5 = vector.broadcast %4 : vector<1x192xf32> to vector<16x192xf32>
    %6 = arith.addf %3, %5 : vector<16x192xf32>
    %c0_5 = arith.constant 0 : index
    %c0_6 = arith.constant 0 : index
    %7 = vector.load %arg4[%c0_5, %c0_6] : memref<16x192xf32, #tpu.memory_space<vmem>>, vector<16x192xf32>
    tpu.vector_store %arg4[%c0_5, %c0_6], %6 {strides = array<i32>} : memref<16x192xf32, #tpu.memory_space<vmem>>, vector<16x192xf32>,
    return
  }
  func.func @transform_0(%arg0: i32) -> (i32, i32) {
    %c0_i32 = arith.constant 0 : i32
    %c0_i32_0 = arith.constant 0 : i32
    return %arg0, %c0_i32 : i32, i32
  }
  func.func @transform_1(%arg0: i32) -> (i32, i32) {
    %c0_i32 = arith.constant 0 : i32
    %c0_i32_0 = arith.constant 0 : i32
    %c0_i32_1 = arith.constant 0 : i32
    return %c0_i32, %c0_i32_0 : i32, i32
  }
  func.func @transform_2(%arg0: i32) -> (i32, i32) {
    %c0_i32 = arith.constant 0 : i32
    %c0_i32_0 = arith.constant 0 : i32
    %c0_i32_1 = arith.constant 0 : i32
    return %c0_i32, %c0_i32_0 : i32, i32
  }
  func.func @transform_3(%arg0: i32) -> (i32, i32) {
    %c0_i32 = arith.constant 0 : i32
    %c0_i32_0 = arith.constant 0 : i32
    return %arg0, %c0_i32 : i32, i32
  }
}

module attributes {stable_mosaic.version = 11 : i64} {
  func.func @_linear_kernel(%arg0: i32, %arg1: memref<16x64xf32, #tpu.memory_space<vmem>>, %arg2: memref<64x192xbf16, #tpu.memory_space<vmem>>, %arg3: memref<1x192xf32, #tpu.memory_space<vmem>>, %arg4: memref<16x192xbf16, #tpu.memory_space<vmem>>) attributes {dimension_semantics = [#tpu.dimension_semantics<parallel>], iteration_bounds = array<i64: 1>, scalar_prefetch = 0 : i64, scratch_operands = 0 : i64, tpu.core_type = #tpu.core_type<tc>, window_params = [{transform_indices = @transform_0, window_bounds = array<i64: 16, 64>}, {pipeline_mode = #tpu.pipeline_mode<synchronous>, transform_indices = @transform_1, window_bounds = array<i64: 64, 192>}, {pipeline_mode = #tpu.pipeline_mode<synchronous>, transform_indices = @transform_2, window_bounds = array<i64: 1, 192>}, {transform_indices = @transform_3, window_bounds = array<i64: 16, 192>}]} {
    %c0 = arith.constant 0 : index
    %c0_0 = arith.constant 0 : index
    %0 = vector.load %arg1[%c0, %c0_0] : memref<16x64xf32, #tpu.memory_space<vmem>>, vector<16x64xf32>
    %1 = arith.truncf %0 : vector<16x64xf32> to vector<16x64xbf16>
    %c0_1 = arith.constant 0 : index
    %c0_2 = arith.constant 0 : index
    %2 = vector.load %arg2[%c0_1, %c0_2] : memref<64x192xbf16, #tpu.memory_space<vmem>>, vector<64x192xbf16>
    %cst = arith.constant dense<0.000000e+00> : vector<16x192xf32>
    %3 = tpu.matmul %1, %2, %cst {dimension_numbers = #tpu.dot_dimension_numbers<[1], [0], [0], [1], [0, 0, 1, 1], [], []>} : vector<16x64xbf16>, vector<64x192xbf16>, vector<16x192xf32> -> vector<16x192xf32>
    %c0_3 = arith.constant 0 : index
    %c0_4 = arith.constant 0 : index
    %4 = vector.load %arg3[%c0_3, %c0_4] : memref<1x192xf32, #tpu.memory_space<vmem>>, vector<1x192xf32>
    %5 = vector.broadcast %4 : vector<1x192xf32> to vector<16x192xf32>
    %6 = arith.addf %3, %5 : vector<16x192xf32>
    %7 = arith.truncf %6 : vector<16x192xf32> to vector<16x192xbf16>
    %c0_5 = arith.constant 0 : index
    %c0_6 = arith.constant 0 : index
    %8 = vector.load %arg4[%c0_5, %c0_6] : memref<16x192xbf16, #tpu.memory_space<vmem>>, vector<16x192xbf16>
    tpu.vector_store %arg4[%c0_5, %c0_6], %7 {strides = array<i32>} : memref<16x192xbf16, #tpu.memory_space<vmem>>, vector<16x192xbf16>,
    return
  }
  func.func @transform_0(%arg0: i32) -> (i32, i32) {
    %c0_i32 = arith.constant 0 : i32
    %c0_i32_0 = arith.constant 0 : i32
    return %arg0, %c0_i32 : i32, i32
  }
  func.func @transform_1(%arg0: i32) -> (i32, i32) {
    %c0_i32 = arith.constant 0 : i32
    %c0_i32_0 = arith.constant 0 : i32
    %c0_i32_1 = arith.constant 0 : i32
    return %c0_i32, %c0_i32_0 : i32, i32
  }
  func.func @transform_2(%arg0: i32) -> (i32, i32) {
    %c0_i32 = arith.constant 0 : i32
    %c0_i32_0 = arith.constant 0 : i32
    %c0_i32_1 = arith.constant 0 : i32
    return %c0_i32, %c0_i32_0 : i32, i32
  }
  func.func @transform_3(%arg0: i32) -> (i32, i32) {
    %c0_i32 = arith.constant 0 : i32
    %c0_i32_0 = arith.constant 0 : i32
    return %arg0, %c0_i32 : i32, i32
  }
}

module attributes {stable_mosaic.version = 11 : i64} {
  func.func @_bigru_kernel(%arg0: i32, %arg1: memref<1x8x2x96xf32, #tpu.memory_space<vmem>>, %arg2: memref<8x2x1xf32, #tpu.memory_space<vmem>>, %arg3: memref<1x2x32xf32, #tpu.memory_space<vmem>>, %arg4: memref<1x32x96xbf16, #tpu.memory_space<vmem>>, %arg5: memref<1x1x96xf32, #tpu.memory_space<vmem>>, %arg6: memref<1x8x2x32xf32, #tpu.memory_space<vmem>>, %arg7: memref<1x2x32xf32, #tpu.memory_space<vmem>>) attributes {dimension_semantics = [#tpu.dimension_semantics<parallel>], iteration_bounds = array<i64: 2>, scalar_prefetch = 0 : i64, scratch_operands = 0 : i64, tpu.core_type = #tpu.core_type<tc>, window_params = [{transform_indices = @transform_0, window_bounds = array<i64: 1, 8, 2, 96>}, {pipeline_mode = #tpu.pipeline_mode<synchronous>, transform_indices = @transform_1, window_bounds = array<i64: 8, 2, 1>}, {transform_indices = @transform_2, window_bounds = array<i64: 1, 2, 32>}, {transform_indices = @transform_3, window_bounds = array<i64: 1, 32, 96>}, {transform_indices = @transform_4, window_bounds = array<i64: 1, 1, 96>}, {transform_indices = @transform_5, window_bounds = array<i64: 1, 8, 2, 32>}, {transform_indices = @transform_6, window_bounds = array<i64: 1, 2, 32>}]} {
    %c0 = arith.constant 0 : index
    %c0_0 = arith.constant 0 : index
    %c0_1 = arith.constant 0 : index
    %0 = vector.load %arg4[%c0, %c0_0, %c0_1] : memref<1x32x96xbf16, #tpu.memory_space<vmem>>, vector<1x32x96xbf16>
    %1 = vector.shape_cast %0 : vector<1x32x96xbf16> to vector<32x96xbf16>
    %c0_2 = arith.constant 0 : index
    %c0_3 = arith.constant 0 : index
    %c0_4 = arith.constant 0 : index
    %2 = vector.load %arg5[%c0_2, %c0_3, %c0_4] : memref<1x1x96xf32, #tpu.memory_space<vmem>>, vector<1x1x96xf32>
    %3 = vector.shape_cast %2 : vector<1x1x96xf32> to vector<1x96xf32>
    %c0_5 = arith.constant 0 : index
    %c0_6 = arith.constant 0 : index
    %c0_7 = arith.constant 0 : index
    %4 = vector.load %arg3[%c0_5, %c0_6, %c0_7] : memref<1x2x32xf32, #tpu.memory_space<vmem>>, vector<1x2x32xf32>
    %5 = vector.shape_cast %4 : vector<1x2x32xf32> to vector<2x32xf32>
    %c0_i32 = arith.constant 0 : i32
    %c0_i32_8 = arith.constant 0 : i32
    %6 = arith.cmpi eq, %arg0, %c0_i32_8 : i32
    %c7_i32 = arith.constant 7 : i32
    %7 = arith.subi %c7_i32, %c0_i32 : i32
    %8 = arith.select %6, %c0_i32, %7 : i32
    %c0_9 = arith.constant 0 : index
    %9 = arith.index_cast %8 : i32 to index
    %c0_10 = arith.constant 0 : index
    %c0_11 = arith.constant 0 : index
    %10 = vector.load %arg1[%c0_9, %9, %c0_10, %c0_11] : memref<1x8x2x96xf32, #tpu.memory_space<vmem>>, vector<1x1x2x96xf32>
    %11 = vector.shape_cast %10 : vector<1x1x2x96xf32> to vector<2x96xf32>
    %12 = arith.index_cast %8 : i32 to index
    %c0_12 = arith.constant 0 : index
    %c0_13 = arith.constant 0 : index
    %13 = vector.load %arg2[%12, %c0_12, %c0_13] : memref<8x2x1xf32, #tpu.memory_space<vmem>>, vector<1x2x1xf32>
    %14 = vector.shape_cast %13 : vector<1x2x1xf32> to vector<2x1xf32>
    %15 = arith.truncf %5 : vector<2x32xf32> to vector<2x32xbf16>
    %cst = arith.constant dense<0.000000e+00> : vector<2x96xf32>
    %16 = tpu.matmul %15, %1, %cst {dimension_numbers = #tpu.dot_dimension_numbers<[1], [0], [0], [1], [0, 0, 1, 1], [], []>} : vector<2x32xbf16>, vector<32x96xbf16>, vector<2x96xf32> -> vector<2x96xf32>
    %17 = vector.broadcast %3 : vector<1x96xf32> to vector<2x96xf32>
    %18 = arith.addf %16, %17 : vector<2x96xf32>
    %19 = vector.extract_strided_slice %11 {offsets = [0, 0], sizes = [2, 32], strides = [1, 1]} : vector<2x96xf32> to vector<2x32xf32>
    %20 = vector.extract_strided_slice %18 {offsets = [0, 0], sizes = [2, 32], strides = [1, 1]} : vector<2x96xf32> to vector<2x32xf32>
    %21 = arith.addf %19, %20 : vector<2x32xf32>
    %22 = arith.negf %21 : vector<2x32xf32>
    %23 = math.exp %22 : vector<2x32xf32>
    %cst_14 = arith.constant 1.000000e+00 : f32
    %24 = vector.broadcast %cst_14 : f32 to vector<2x32xf32>
    %25 = arith.addf %24, %23 : vector<2x32xf32>
    %26 = arith.divf %24, %25 : vector<2x32xf32>
    %27 = vector.extract_strided_slice %11 {offsets = [0, 32], sizes = [2, 32], strides = [1, 1]} : vector<2x96xf32> to vector<2x32xf32>
    %28 = vector.extract_strided_slice %18 {offsets = [0, 32], sizes = [2, 32], strides = [1, 1]} : vector<2x96xf32> to vector<2x32xf32>
    %29 = arith.addf %27, %28 : vector<2x32xf32>
    %30 = arith.negf %29 : vector<2x32xf32>
    %31 = math.exp %30 : vector<2x32xf32>
    %cst_15 = arith.constant 1.000000e+00 : f32
    %32 = vector.broadcast %cst_15 : f32 to vector<2x32xf32>
    %33 = arith.addf %32, %31 : vector<2x32xf32>
    %34 = arith.divf %32, %33 : vector<2x32xf32>
    %35 = vector.extract_strided_slice %11 {offsets = [0, 64], sizes = [2, 32], strides = [1, 1]} : vector<2x96xf32> to vector<2x32xf32>
    %36 = vector.extract_strided_slice %18 {offsets = [0, 64], sizes = [2, 32], strides = [1, 1]} : vector<2x96xf32> to vector<2x32xf32>
    %37 = arith.mulf %26, %36 : vector<2x32xf32>
    %38 = arith.addf %35, %37 : vector<2x32xf32>
    %39 = math.tanh %38 : vector<2x32xf32>
    %40 = arith.subf %5, %39 : vector<2x32xf32>
    %41 = arith.mulf %34, %40 : vector<2x32xf32>
    %42 = arith.addf %39, %41 : vector<2x32xf32>
    %43 = arith.subf %42, %5 : vector<2x32xf32>
    %44 = vector.broadcast %14 : vector<2x1xf32> to vector<2x32xf32>
    %45 = arith.mulf %44, %43 : vector<2x32xf32>
    %46 = arith.addf %5, %45 : vector<2x32xf32>
    %47 = vector.broadcast %14 : vector<2x1xf32> to vector<2x32xf32>
    %48 = arith.mulf %47, %46 : vector<2x32xf32>
    %c0_16 = arith.constant 0 : index
    %49 = arith.index_cast %8 : i32 to index
    %c0_17 = arith.constant 0 : index
    %c0_18 = arith.constant 0 : index
    %50 = vector.load %arg6[%c0_16, %49, %c0_17, %c0_18] : memref<1x8x2x32xf32, #tpu.memory_space<vmem>>, vector<1x1x2x32xf32>
    %51 = vector.shape_cast %50 : vector<1x1x2x32xf32> to vector<2x32xf32>
    %52 = vector.shape_cast %48 : vector<2x32xf32> to vector<1x1x2x32xf32>
    tpu.vector_store %arg6[%c0_16, %49, %c0_17, %c0_18], %52 {strides = array<i32>} : memref<1x8x2x32xf32, #tpu.memory_space<vmem>>, vector<1x1x2x32xf32>,
    %c1_i32 = arith.constant 1 : i32
    %c0_i32_19 = arith.constant 0 : i32
    %53 = arith.cmpi eq, %arg0, %c0_i32_19 : i32
    %c7_i32_20 = arith.constant 7 : i32
    %54 = arith.subi %c7_i32_20, %c1_i32 : i32
    %55 = arith.select %53, %c1_i32, %54 : i32
    %c0_21 = arith.constant 0 : index
    %56 = arith.index_cast %55 : i32 to index
    %c0_22 = arith.constant 0 : index
    %c0_23 = arith.constant 0 : index
    %57 = vector.load %arg1[%c0_21, %56, %c0_22, %c0_23] : memref<1x8x2x96xf32, #tpu.memory_space<vmem>>, vector<1x1x2x96xf32>
    %58 = vector.shape_cast %57 : vector<1x1x2x96xf32> to vector<2x96xf32>
    %59 = arith.index_cast %55 : i32 to index
    %c0_24 = arith.constant 0 : index
    %c0_25 = arith.constant 0 : index
    %60 = vector.load %arg2[%59, %c0_24, %c0_25] : memref<8x2x1xf32, #tpu.memory_space<vmem>>, vector<1x2x1xf32>
    %61 = vector.shape_cast %60 : vector<1x2x1xf32> to vector<2x1xf32>
    %62 = arith.truncf %46 : vector<2x32xf32> to vector<2x32xbf16>
    %cst_26 = arith.constant dense<0.000000e+00> : vector<2x96xf32>
    %63 = tpu.matmul %62, %1, %cst_26 {dimension_numbers = #tpu.dot_dimension_numbers<[1], [0], [0], [1], [0, 0, 1, 1], [], []>} : vector<2x32xbf16>, vector<32x96xbf16>, vector<2x96xf32> -> vector<2x96xf32>
    %64 = vector.broadcast %3 : vector<1x96xf32> to vector<2x96xf32>
    %65 = arith.addf %63, %64 : vector<2x96xf32>
    %66 = vector.extract_strided_slice %58 {offsets = [0, 0], sizes = [2, 32], strides = [1, 1]} : vector<2x96xf32> to vector<2x32xf32>
    %67 = vector.extract_strided_slice %65 {offsets = [0, 0], sizes = [2, 32], strides = [1, 1]} : vector<2x96xf32> to vector<2x32xf32>
    %68 = arith.addf %66, %67 : vector<2x32xf32>
    %69 = arith.negf %68 : vector<2x32xf32>
    %70 = math.exp %69 : vector<2x32xf32>
    %cst_27 = arith.constant 1.000000e+00 : f32
    %71 = vector.broadcast %cst_27 : f32 to vector<2x32xf32>
    %72 = arith.addf %71, %70 : vector<2x32xf32>
    %73 = arith.divf %71, %72 : vector<2x32xf32>
    %74 = vector.extract_strided_slice %58 {offsets = [0, 32], sizes = [2, 32], strides = [1, 1]} : vector<2x96xf32> to vector<2x32xf32>
    %75 = vector.extract_strided_slice %65 {offsets = [0, 32], sizes = [2, 32], strides = [1, 1]} : vector<2x96xf32> to vector<2x32xf32>
    %76 = arith.addf %74, %75 : vector<2x32xf32>
    %77 = arith.negf %76 : vector<2x32xf32>
    %78 = math.exp %77 : vector<2x32xf32>
    %cst_28 = arith.constant 1.000000e+00 : f32
    %79 = vector.broadcast %cst_28 : f32 to vector<2x32xf32>
    %80 = arith.addf %79, %78 : vector<2x32xf32>
    %81 = arith.divf %79, %80 : vector<2x32xf32>
    %82 = vector.extract_strided_slice %58 {offsets = [0, 64], sizes = [2, 32], strides = [1, 1]} : vector<2x96xf32> to vector<2x32xf32>
    %83 = vector.extract_strided_slice %65 {offsets = [0, 64], sizes = [2, 32], strides = [1, 1]} : vector<2x96xf32> to vector<2x32xf32>
    %84 = arith.mulf %73, %83 : vector<2x32xf32>
    %85 = arith.addf %82, %84 : vector<2x32xf32>
    %86 = math.tanh %85 : vector<2x32xf32>
    %87 = arith.subf %46, %86 : vector<2x32xf32>
    %88 = arith.mulf %81, %87 : vector<2x32xf32>
    %89 = arith.addf %86, %88 : vector<2x32xf32>
    %90 = arith.subf %89, %46 : vector<2x32xf32>
    %91 = vector.broadcast %61 : vector<2x1xf32> to vector<2x32xf32>
    %92 = arith.mulf %91, %90 : vector<2x32xf32>
    %93 = arith.addf %46, %92 : vector<2x32xf32>
    %94 = vector.broadcast %61 : vector<2x1xf32> to vector<2x32xf32>
    %95 = arith.mulf %94, %93 : vector<2x32xf32>
    %c0_29 = arith.constant 0 : index
    %96 = arith.index_cast %55 : i32 to index
    %c0_30 = arith.constant 0 : index
    %c0_31 = arith.constant 0 : index
    %97 = vector.load %arg6[%c0_29, %96, %c0_30, %c0_31] : memref<1x8x2x32xf32, #tpu.memory_space<vmem>>, vector<1x1x2x32xf32>
    %98 = vector.shape_cast %97 : vector<1x1x2x32xf32> to vector<2x32xf32>
    %99 = vector.shape_cast %95 : vector<2x32xf32> to vector<1x1x2x32xf32>
    tpu.vector_store %arg6[%c0_29, %96, %c0_30, %c0_31], %99 {strides = array<i32>} : memref<1x8x2x32xf32, #tpu.memory_space<vmem>>, vector<1x1x2x32xf32>,
    %c2_i32 = arith.constant 2 : i32
    %c0_i32_32 = arith.constant 0 : i32
    %100 = arith.cmpi eq, %arg0, %c0_i32_32 : i32
    %c7_i32_33 = arith.constant 7 : i32
    %101 = arith.subi %c7_i32_33, %c2_i32 : i32
    %102 = arith.select %100, %c2_i32, %101 : i32
    %c0_34 = arith.constant 0 : index
    %103 = arith.index_cast %102 : i32 to index
    %c0_35 = arith.constant 0 : index
    %c0_36 = arith.constant 0 : index
    %104 = vector.load %arg1[%c0_34, %103, %c0_35, %c0_36] : memref<1x8x2x96xf32, #tpu.memory_space<vmem>>, vector<1x1x2x96xf32>
    %105 = vector.shape_cast %104 : vector<1x1x2x96xf32> to vector<2x96xf32>
    %106 = arith.index_cast %102 : i32 to index
    %c0_37 = arith.constant 0 : index
    %c0_38 = arith.constant 0 : index
    %107 = vector.load %arg2[%106, %c0_37, %c0_38] : memref<8x2x1xf32, #tpu.memory_space<vmem>>, vector<1x2x1xf32>
    %108 = vector.shape_cast %107 : vector<1x2x1xf32> to vector<2x1xf32>
    %109 = arith.truncf %93 : vector<2x32xf32> to vector<2x32xbf16>
    %cst_39 = arith.constant dense<0.000000e+00> : vector<2x96xf32>
    %110 = tpu.matmul %109, %1, %cst_39 {dimension_numbers = #tpu.dot_dimension_numbers<[1], [0], [0], [1], [0, 0, 1, 1], [], []>} : vector<2x32xbf16>, vector<32x96xbf16>, vector<2x96xf32> -> vector<2x96xf32>
    %111 = vector.broadcast %3 : vector<1x96xf32> to vector<2x96xf32>
    %112 = arith.addf %110, %111 : vector<2x96xf32>
    %113 = vector.extract_strided_slice %105 {offsets = [0, 0], sizes = [2, 32], strides = [1, 1]} : vector<2x96xf32> to vector<2x32xf32>
    %114 = vector.extract_strided_slice %112 {offsets = [0, 0], sizes = [2, 32], strides = [1, 1]} : vector<2x96xf32> to vector<2x32xf32>
    %115 = arith.addf %113, %114 : vector<2x32xf32>
    %116 = arith.negf %115 : vector<2x32xf32>
    %117 = math.exp %116 : vector<2x32xf32>
    %cst_40 = arith.constant 1.000000e+00 : f32
    %118 = vector.broadcast %cst_40 : f32 to vector<2x32xf32>
    %119 = arith.addf %118, %117 : vector<2x32xf32>
    %120 = arith.divf %118, %119 : vector<2x32xf32>
    %121 = vector.extract_strided_slice %105 {offsets = [0, 32], sizes = [2, 32], strides = [1, 1]} : vector<2x96xf32> to vector<2x32xf32>
    %122 = vector.extract_strided_slice %112 {offsets = [0, 32], sizes = [2, 32], strides = [1, 1]} : vector<2x96xf32> to vector<2x32xf32>
    %123 = arith.addf %121, %122 : vector<2x32xf32>
    %124 = arith.negf %123 : vector<2x32xf32>
    %125 = math.exp %124 : vector<2x32xf32>
    %cst_41 = arith.constant 1.000000e+00 : f32
    %126 = vector.broadcast %cst_41 : f32 to vector<2x32xf32>
    %127 = arith.addf %126, %125 : vector<2x32xf32>
    %128 = arith.divf %126, %127 : vector<2x32xf32>
    %129 = vector.extract_strided_slice %105 {offsets = [0, 64], sizes = [2, 32], strides = [1, 1]} : vector<2x96xf32> to vector<2x32xf32>
    %130 = vector.extract_strided_slice %112 {offsets = [0, 64], sizes = [2, 32], strides = [1, 1]} : vector<2x96xf32> to vector<2x32xf32>
    %131 = arith.mulf %120, %130 : vector<2x32xf32>
    %132 = arith.addf %129, %131 : vector<2x32xf32>
    %133 = math.tanh %132 : vector<2x32xf32>
    %134 = arith.subf %93, %133 : vector<2x32xf32>
    %135 = arith.mulf %128, %134 : vector<2x32xf32>
    %136 = arith.addf %133, %135 : vector<2x32xf32>
    %137 = arith.subf %136, %93 : vector<2x32xf32>
    %138 = vector.broadcast %108 : vector<2x1xf32> to vector<2x32xf32>
    %139 = arith.mulf %138, %137 : vector<2x32xf32>
    %140 = arith.addf %93, %139 : vector<2x32xf32>
    %141 = vector.broadcast %108 : vector<2x1xf32> to vector<2x32xf32>
    %142 = arith.mulf %141, %140 : vector<2x32xf32>
    %c0_42 = arith.constant 0 : index
    %143 = arith.index_cast %102 : i32 to index
    %c0_43 = arith.constant 0 : index
    %c0_44 = arith.constant 0 : index
    %144 = vector.load %arg6[%c0_42, %143, %c0_43, %c0_44] : memref<1x8x2x32xf32, #tpu.memory_space<vmem>>, vector<1x1x2x32xf32>
    %145 = vector.shape_cast %144 : vector<1x1x2x32xf32> to vector<2x32xf32>
    %146 = vector.shape_cast %142 : vector<2x32xf32> to vector<1x1x2x32xf32>
    tpu.vector_store %arg6[%c0_42, %143, %c0_43, %c0_44], %146 {strides = array<i32>} : memref<1x8x2x32xf32, #tpu.memory_space<vmem>>, vector<1x1x2x32xf32>,
    %c3_i32 = arith.constant 3 : i32
    %c0_i32_45 = arith.constant 0 : i32
    %147 = arith.cmpi eq, %arg0, %c0_i32_45 : i32
    %c7_i32_46 = arith.constant 7 : i32
    %148 = arith.subi %c7_i32_46, %c3_i32 : i32
    %149 = arith.select %147, %c3_i32, %148 : i32
    %c0_47 = arith.constant 0 : index
    %150 = arith.index_cast %149 : i32 to index
    %c0_48 = arith.constant 0 : index
    %c0_49 = arith.constant 0 : index
    %151 = vector.load %arg1[%c0_47, %150, %c0_48, %c0_49] : memref<1x8x2x96xf32, #tpu.memory_space<vmem>>, vector<1x1x2x96xf32>
    %152 = vector.shape_cast %151 : vector<1x1x2x96xf32> to vector<2x96xf32>
    %153 = arith.index_cast %149 : i32 to index
    %c0_50 = arith.constant 0 : index
    %c0_51 = arith.constant 0 : index
    %154 = vector.load %arg2[%153, %c0_50, %c0_51] : memref<8x2x1xf32, #tpu.memory_space<vmem>>, vector<1x2x1xf32>
    %155 = vector.shape_cast %154 : vector<1x2x1xf32> to vector<2x1xf32>
    %156 = arith.truncf %140 : vector<2x32xf32> to vector<2x32xbf16>
    %cst_52 = arith.constant dense<0.000000e+00> : vector<2x96xf32>
    %157 = tpu.matmul %156, %1, %cst_52 {dimension_numbers = #tpu.dot_dimension_numbers<[1], [0], [0], [1], [0, 0, 1, 1], [], []>} : vector<2x32xbf16>, vector<32x96xbf16>, vector<2x96xf32> -> vector<2x96xf32>
    %158 = vector.broadcast %3 : vector<1x96xf32> to vector<2x96xf32>
    %159 = arith.addf %157, %158 : vector<2x96xf32>
    %160 = vector.extract_strided_slice %152 {offsets = [0, 0], sizes = [2, 32], strides = [1, 1]} : vector<2x96xf32> to vector<2x32xf32>
    %161 = vector.extract_strided_slice %159 {offsets = [0, 0], sizes = [2, 32], strides = [1, 1]} : vector<2x96xf32> to vector<2x32xf32>
    %162 = arith.addf %160, %161 : vector<2x32xf32>
    %163 = arith.negf %162 : vector<2x32xf32>
    %164 = math.exp %163 : vector<2x32xf32>
    %cst_53 = arith.constant 1.000000e+00 : f32
    %165 = vector.broadcast %cst_53 : f32 to vector<2x32xf32>
    %166 = arith.addf %165, %164 : vector<2x32xf32>
    %167 = arith.divf %165, %166 : vector<2x32xf32>
    %168 = vector.extract_strided_slice %152 {offsets = [0, 32], sizes = [2, 32], strides = [1, 1]} : vector<2x96xf32> to vector<2x32xf32>
    %169 = vector.extract_strided_slice %159 {offsets = [0, 32], sizes = [2, 32], strides = [1, 1]} : vector<2x96xf32> to vector<2x32xf32>
    %170 = arith.addf %168, %169 : vector<2x32xf32>
    %171 = arith.negf %170 : vector<2x32xf32>
    %172 = math.exp %171 : vector<2x32xf32>
    %cst_54 = arith.constant 1.000000e+00 : f32
    %173 = vector.broadcast %cst_54 : f32 to vector<2x32xf32>
    %174 = arith.addf %173, %172 : vector<2x32xf32>
    %175 = arith.divf %173, %174 : vector<2x32xf32>
    %176 = vector.extract_strided_slice %152 {offsets = [0, 64], sizes = [2, 32], strides = [1, 1]} : vector<2x96xf32> to vector<2x32xf32>
    %177 = vector.extract_strided_slice %159 {offsets = [0, 64], sizes = [2, 32], strides = [1, 1]} : vector<2x96xf32> to vector<2x32xf32>
    %178 = arith.mulf %167, %177 : vector<2x32xf32>
    %179 = arith.addf %176, %178 : vector<2x32xf32>
    %180 = math.tanh %179 : vector<2x32xf32>
    %181 = arith.subf %140, %180 : vector<2x32xf32>
    %182 = arith.mulf %175, %181 : vector<2x32xf32>
    %183 = arith.addf %180, %182 : vector<2x32xf32>
    %184 = arith.subf %183, %140 : vector<2x32xf32>
    %185 = vector.broadcast %155 : vector<2x1xf32> to vector<2x32xf32>
    %186 = arith.mulf %185, %184 : vector<2x32xf32>
    %187 = arith.addf %140, %186 : vector<2x32xf32>
    %188 = vector.broadcast %155 : vector<2x1xf32> to vector<2x32xf32>
    %189 = arith.mulf %188, %187 : vector<2x32xf32>
    %c0_55 = arith.constant 0 : index
    %190 = arith.index_cast %149 : i32 to index
    %c0_56 = arith.constant 0 : index
    %c0_57 = arith.constant 0 : index
    %191 = vector.load %arg6[%c0_55, %190, %c0_56, %c0_57] : memref<1x8x2x32xf32, #tpu.memory_space<vmem>>, vector<1x1x2x32xf32>
    %192 = vector.shape_cast %191 : vector<1x1x2x32xf32> to vector<2x32xf32>
    %193 = vector.shape_cast %189 : vector<2x32xf32> to vector<1x1x2x32xf32>
    tpu.vector_store %arg6[%c0_55, %190, %c0_56, %c0_57], %193 {strides = array<i32>} : memref<1x8x2x32xf32, #tpu.memory_space<vmem>>, vector<1x1x2x32xf32>,
    %c4_i32 = arith.constant 4 : i32
    %c0_i32_58 = arith.constant 0 : i32
    %194 = arith.cmpi eq, %arg0, %c0_i32_58 : i32
    %c7_i32_59 = arith.constant 7 : i32
    %195 = arith.subi %c7_i32_59, %c4_i32 : i32
    %196 = arith.select %194, %c4_i32, %195 : i32
    %c0_60 = arith.constant 0 : index
    %197 = arith.index_cast %196 : i32 to index
    %c0_61 = arith.constant 0 : index
    %c0_62 = arith.constant 0 : index
    %198 = vector.load %arg1[%c0_60, %197, %c0_61, %c0_62] : memref<1x8x2x96xf32, #tpu.memory_space<vmem>>, vector<1x1x2x96xf32>
    %199 = vector.shape_cast %198 : vector<1x1x2x96xf32> to vector<2x96xf32>
    %200 = arith.index_cast %196 : i32 to index
    %c0_63 = arith.constant 0 : index
    %c0_64 = arith.constant 0 : index
    %201 = vector.load %arg2[%200, %c0_63, %c0_64] : memref<8x2x1xf32, #tpu.memory_space<vmem>>, vector<1x2x1xf32>
    %202 = vector.shape_cast %201 : vector<1x2x1xf32> to vector<2x1xf32>
    %203 = arith.truncf %187 : vector<2x32xf32> to vector<2x32xbf16>
    %cst_65 = arith.constant dense<0.000000e+00> : vector<2x96xf32>
    %204 = tpu.matmul %203, %1, %cst_65 {dimension_numbers = #tpu.dot_dimension_numbers<[1], [0], [0], [1], [0, 0, 1, 1], [], []>} : vector<2x32xbf16>, vector<32x96xbf16>, vector<2x96xf32> -> vector<2x96xf32>
    %205 = vector.broadcast %3 : vector<1x96xf32> to vector<2x96xf32>
    %206 = arith.addf %204, %205 : vector<2x96xf32>
    %207 = vector.extract_strided_slice %199 {offsets = [0, 0], sizes = [2, 32], strides = [1, 1]} : vector<2x96xf32> to vector<2x32xf32>
    %208 = vector.extract_strided_slice %206 {offsets = [0, 0], sizes = [2, 32], strides = [1, 1]} : vector<2x96xf32> to vector<2x32xf32>
    %209 = arith.addf %207, %208 : vector<2x32xf32>
    %210 = arith.negf %209 : vector<2x32xf32>
    %211 = math.exp %210 : vector<2x32xf32>
    %cst_66 = arith.constant 1.000000e+00 : f32
    %212 = vector.broadcast %cst_66 : f32 to vector<2x32xf32>
    %213 = arith.addf %212, %211 : vector<2x32xf32>
    %214 = arith.divf %212, %213 : vector<2x32xf32>
    %215 = vector.extract_strided_slice %199 {offsets = [0, 32], sizes = [2, 32], strides = [1, 1]} : vector<2x96xf32> to vector<2x32xf32>
    %216 = vector.extract_strided_slice %206 {offsets = [0, 32], sizes = [2, 32], strides = [1, 1]} : vector<2x96xf32> to vector<2x32xf32>
    %217 = arith.addf %215, %216 : vector<2x32xf32>
    %218 = arith.negf %217 : vector<2x32xf32>
    %219 = math.exp %218 : vector<2x32xf32>
    %cst_67 = arith.constant 1.000000e+00 : f32
    %220 = vector.broadcast %cst_67 : f32 to vector<2x32xf32>
    %221 = arith.addf %220, %219 : vector<2x32xf32>
    %222 = arith.divf %220, %221 : vector<2x32xf32>
    %223 = vector.extract_strided_slice %199 {offsets = [0, 64], sizes = [2, 32], strides = [1, 1]} : vector<2x96xf32> to vector<2x32xf32>
    %224 = vector.extract_strided_slice %206 {offsets = [0, 64], sizes = [2, 32], strides = [1, 1]} : vector<2x96xf32> to vector<2x32xf32>
    %225 = arith.mulf %214, %224 : vector<2x32xf32>
    %226 = arith.addf %223, %225 : vector<2x32xf32>
    %227 = math.tanh %226 : vector<2x32xf32>
    %228 = arith.subf %187, %227 : vector<2x32xf32>
    %229 = arith.mulf %222, %228 : vector<2x32xf32>
    %230 = arith.addf %227, %229 : vector<2x32xf32>
    %231 = arith.subf %230, %187 : vector<2x32xf32>
    %232 = vector.broadcast %202 : vector<2x1xf32> to vector<2x32xf32>
    %233 = arith.mulf %232, %231 : vector<2x32xf32>
    %234 = arith.addf %187, %233 : vector<2x32xf32>
    %235 = vector.broadcast %202 : vector<2x1xf32> to vector<2x32xf32>
    %236 = arith.mulf %235, %234 : vector<2x32xf32>
    %c0_68 = arith.constant 0 : index
    %237 = arith.index_cast %196 : i32 to index
    %c0_69 = arith.constant 0 : index
    %c0_70 = arith.constant 0 : index
    %238 = vector.load %arg6[%c0_68, %237, %c0_69, %c0_70] : memref<1x8x2x32xf32, #tpu.memory_space<vmem>>, vector<1x1x2x32xf32>
    %239 = vector.shape_cast %238 : vector<1x1x2x32xf32> to vector<2x32xf32>
    %240 = vector.shape_cast %236 : vector<2x32xf32> to vector<1x1x2x32xf32>
    tpu.vector_store %arg6[%c0_68, %237, %c0_69, %c0_70], %240 {strides = array<i32>} : memref<1x8x2x32xf32, #tpu.memory_space<vmem>>, vector<1x1x2x32xf32>,
    %c5_i32 = arith.constant 5 : i32
    %c0_i32_71 = arith.constant 0 : i32
    %241 = arith.cmpi eq, %arg0, %c0_i32_71 : i32
    %c7_i32_72 = arith.constant 7 : i32
    %242 = arith.subi %c7_i32_72, %c5_i32 : i32
    %243 = arith.select %241, %c5_i32, %242 : i32
    %c0_73 = arith.constant 0 : index
    %244 = arith.index_cast %243 : i32 to index
    %c0_74 = arith.constant 0 : index
    %c0_75 = arith.constant 0 : index
    %245 = vector.load %arg1[%c0_73, %244, %c0_74, %c0_75] : memref<1x8x2x96xf32, #tpu.memory_space<vmem>>, vector<1x1x2x96xf32>
    %246 = vector.shape_cast %245 : vector<1x1x2x96xf32> to vector<2x96xf32>
    %247 = arith.index_cast %243 : i32 to index
    %c0_76 = arith.constant 0 : index
    %c0_77 = arith.constant 0 : index
    %248 = vector.load %arg2[%247, %c0_76, %c0_77] : memref<8x2x1xf32, #tpu.memory_space<vmem>>, vector<1x2x1xf32>
    %249 = vector.shape_cast %248 : vector<1x2x1xf32> to vector<2x1xf32>
    %250 = arith.truncf %234 : vector<2x32xf32> to vector<2x32xbf16>
    %cst_78 = arith.constant dense<0.000000e+00> : vector<2x96xf32>
    %251 = tpu.matmul %250, %1, %cst_78 {dimension_numbers = #tpu.dot_dimension_numbers<[1], [0], [0], [1], [0, 0, 1, 1], [], []>} : vector<2x32xbf16>, vector<32x96xbf16>, vector<2x96xf32> -> vector<2x96xf32>
    %252 = vector.broadcast %3 : vector<1x96xf32> to vector<2x96xf32>
    %253 = arith.addf %251, %252 : vector<2x96xf32>
    %254 = vector.extract_strided_slice %246 {offsets = [0, 0], sizes = [2, 32], strides = [1, 1]} : vector<2x96xf32> to vector<2x32xf32>
    %255 = vector.extract_strided_slice %253 {offsets = [0, 0], sizes = [2, 32], strides = [1, 1]} : vector<2x96xf32> to vector<2x32xf32>
    %256 = arith.addf %254, %255 : vector<2x32xf32>
    %257 = arith.negf %256 : vector<2x32xf32>
    %258 = math.exp %257 : vector<2x32xf32>
    %cst_79 = arith.constant 1.000000e+00 : f32
    %259 = vector.broadcast %cst_79 : f32 to vector<2x32xf32>
    %260 = arith.addf %259, %258 : vector<2x32xf32>
    %261 = arith.divf %259, %260 : vector<2x32xf32>
    %262 = vector.extract_strided_slice %246 {offsets = [0, 32], sizes = [2, 32], strides = [1, 1]} : vector<2x96xf32> to vector<2x32xf32>
    %263 = vector.extract_strided_slice %253 {offsets = [0, 32], sizes = [2, 32], strides = [1, 1]} : vector<2x96xf32> to vector<2x32xf32>
    %264 = arith.addf %262, %263 : vector<2x32xf32>
    %265 = arith.negf %264 : vector<2x32xf32>
    %266 = math.exp %265 : vector<2x32xf32>
    %cst_80 = arith.constant 1.000000e+00 : f32
    %267 = vector.broadcast %cst_80 : f32 to vector<2x32xf32>
    %268 = arith.addf %267, %266 : vector<2x32xf32>
    %269 = arith.divf %267, %268 : vector<2x32xf32>
    %270 = vector.extract_strided_slice %246 {offsets = [0, 64], sizes = [2, 32], strides = [1, 1]} : vector<2x96xf32> to vector<2x32xf32>
    %271 = vector.extract_strided_slice %253 {offsets = [0, 64], sizes = [2, 32], strides = [1, 1]} : vector<2x96xf32> to vector<2x32xf32>
    %272 = arith.mulf %261, %271 : vector<2x32xf32>
    %273 = arith.addf %270, %272 : vector<2x32xf32>
    %274 = math.tanh %273 : vector<2x32xf32>
    %275 = arith.subf %234, %274 : vector<2x32xf32>
    %276 = arith.mulf %269, %275 : vector<2x32xf32>
    %277 = arith.addf %274, %276 : vector<2x32xf32>
    %278 = arith.subf %277, %234 : vector<2x32xf32>
    %279 = vector.broadcast %249 : vector<2x1xf32> to vector<2x32xf32>
    %280 = arith.mulf %279, %278 : vector<2x32xf32>
    %281 = arith.addf %234, %280 : vector<2x32xf32>
    %282 = vector.broadcast %249 : vector<2x1xf32> to vector<2x32xf32>
    %283 = arith.mulf %282, %281 : vector<2x32xf32>
    %c0_81 = arith.constant 0 : index
    %284 = arith.index_cast %243 : i32 to index
    %c0_82 = arith.constant 0 : index
    %c0_83 = arith.constant 0 : index
    %285 = vector.load %arg6[%c0_81, %284, %c0_82, %c0_83] : memref<1x8x2x32xf32, #tpu.memory_space<vmem>>, vector<1x1x2x32xf32>
    %286 = vector.shape_cast %285 : vector<1x1x2x32xf32> to vector<2x32xf32>
    %287 = vector.shape_cast %283 : vector<2x32xf32> to vector<1x1x2x32xf32>
    tpu.vector_store %arg6[%c0_81, %284, %c0_82, %c0_83], %287 {strides = array<i32>} : memref<1x8x2x32xf32, #tpu.memory_space<vmem>>, vector<1x1x2x32xf32>,
    %c6_i32 = arith.constant 6 : i32
    %c0_i32_84 = arith.constant 0 : i32
    %288 = arith.cmpi eq, %arg0, %c0_i32_84 : i32
    %c7_i32_85 = arith.constant 7 : i32
    %289 = arith.subi %c7_i32_85, %c6_i32 : i32
    %290 = arith.select %288, %c6_i32, %289 : i32
    %c0_86 = arith.constant 0 : index
    %291 = arith.index_cast %290 : i32 to index
    %c0_87 = arith.constant 0 : index
    %c0_88 = arith.constant 0 : index
    %292 = vector.load %arg1[%c0_86, %291, %c0_87, %c0_88] : memref<1x8x2x96xf32, #tpu.memory_space<vmem>>, vector<1x1x2x96xf32>
    %293 = vector.shape_cast %292 : vector<1x1x2x96xf32> to vector<2x96xf32>
    %294 = arith.index_cast %290 : i32 to index
    %c0_89 = arith.constant 0 : index
    %c0_90 = arith.constant 0 : index
    %295 = vector.load %arg2[%294, %c0_89, %c0_90] : memref<8x2x1xf32, #tpu.memory_space<vmem>>, vector<1x2x1xf32>
    %296 = vector.shape_cast %295 : vector<1x2x1xf32> to vector<2x1xf32>
    %297 = arith.truncf %281 : vector<2x32xf32> to vector<2x32xbf16>
    %cst_91 = arith.constant dense<0.000000e+00> : vector<2x96xf32>
    %298 = tpu.matmul %297, %1, %cst_91 {dimension_numbers = #tpu.dot_dimension_numbers<[1], [0], [0], [1], [0, 0, 1, 1], [], []>} : vector<2x32xbf16>, vector<32x96xbf16>, vector<2x96xf32> -> vector<2x96xf32>
    %299 = vector.broadcast %3 : vector<1x96xf32> to vector<2x96xf32>
    %300 = arith.addf %298, %299 : vector<2x96xf32>
    %301 = vector.extract_strided_slice %293 {offsets = [0, 0], sizes = [2, 32], strides = [1, 1]} : vector<2x96xf32> to vector<2x32xf32>
    %302 = vector.extract_strided_slice %300 {offsets = [0, 0], sizes = [2, 32], strides = [1, 1]} : vector<2x96xf32> to vector<2x32xf32>
    %303 = arith.addf %301, %302 : vector<2x32xf32>
    %304 = arith.negf %303 : vector<2x32xf32>
    %305 = math.exp %304 : vector<2x32xf32>
    %cst_92 = arith.constant 1.000000e+00 : f32
    %306 = vector.broadcast %cst_92 : f32 to vector<2x32xf32>
    %307 = arith.addf %306, %305 : vector<2x32xf32>
    %308 = arith.divf %306, %307 : vector<2x32xf32>
    %309 = vector.extract_strided_slice %293 {offsets = [0, 32], sizes = [2, 32], strides = [1, 1]} : vector<2x96xf32> to vector<2x32xf32>
    %310 = vector.extract_strided_slice %300 {offsets = [0, 32], sizes = [2, 32], strides = [1, 1]} : vector<2x96xf32> to vector<2x32xf32>
    %311 = arith.addf %309, %310 : vector<2x32xf32>
    %312 = arith.negf %311 : vector<2x32xf32>
    %313 = math.exp %312 : vector<2x32xf32>
    %cst_93 = arith.constant 1.000000e+00 : f32
    %314 = vector.broadcast %cst_93 : f32 to vector<2x32xf32>
    %315 = arith.addf %314, %313 : vector<2x32xf32>
    %316 = arith.divf %314, %315 : vector<2x32xf32>
    %317 = vector.extract_strided_slice %293 {offsets = [0, 64], sizes = [2, 32], strides = [1, 1]} : vector<2x96xf32> to vector<2x32xf32>
    %318 = vector.extract_strided_slice %300 {offsets = [0, 64], sizes = [2, 32], strides = [1, 1]} : vector<2x96xf32> to vector<2x32xf32>
    %319 = arith.mulf %308, %318 : vector<2x32xf32>
    %320 = arith.addf %317, %319 : vector<2x32xf32>
    %321 = math.tanh %320 : vector<2x32xf32>
    %322 = arith.subf %281, %321 : vector<2x32xf32>
    %323 = arith.mulf %316, %322 : vector<2x32xf32>
    %324 = arith.addf %321, %323 : vector<2x32xf32>
    %325 = arith.subf %324, %281 : vector<2x32xf32>
    %326 = vector.broadcast %296 : vector<2x1xf32> to vector<2x32xf32>
    %327 = arith.mulf %326, %325 : vector<2x32xf32>
    %328 = arith.addf %281, %327 : vector<2x32xf32>
    %329 = vector.broadcast %296 : vector<2x1xf32> to vector<2x32xf32>
    %330 = arith.mulf %329, %328 : vector<2x32xf32>
    %c0_94 = arith.constant 0 : index
    %331 = arith.index_cast %290 : i32 to index
    %c0_95 = arith.constant 0 : index
    %c0_96 = arith.constant 0 : index
    %332 = vector.load %arg6[%c0_94, %331, %c0_95, %c0_96] : memref<1x8x2x32xf32, #tpu.memory_space<vmem>>, vector<1x1x2x32xf32>
    %333 = vector.shape_cast %332 : vector<1x1x2x32xf32> to vector<2x32xf32>
    %334 = vector.shape_cast %330 : vector<2x32xf32> to vector<1x1x2x32xf32>
    tpu.vector_store %arg6[%c0_94, %331, %c0_95, %c0_96], %334 {strides = array<i32>} : memref<1x8x2x32xf32, #tpu.memory_space<vmem>>, vector<1x1x2x32xf32>,
    %c7_i32_97 = arith.constant 7 : i32
    %c0_i32_98 = arith.constant 0 : i32
    %335 = arith.cmpi eq, %arg0, %c0_i32_98 : i32
    %c7_i32_99 = arith.constant 7 : i32
    %336 = arith.subi %c7_i32_99, %c7_i32_97 : i32
    %337 = arith.select %335, %c7_i32_97, %336 : i32
    %c0_100 = arith.constant 0 : index
    %338 = arith.index_cast %337 : i32 to index
    %c0_101 = arith.constant 0 : index
    %c0_102 = arith.constant 0 : index
    %339 = vector.load %arg1[%c0_100, %338, %c0_101, %c0_102] : memref<1x8x2x96xf32, #tpu.memory_space<vmem>>, vector<1x1x2x96xf32>
    %340 = vector.shape_cast %339 : vector<1x1x2x96xf32> to vector<2x96xf32>
    %341 = arith.index_cast %337 : i32 to index
    %c0_103 = arith.constant 0 : index
    %c0_104 = arith.constant 0 : index
    %342 = vector.load %arg2[%341, %c0_103, %c0_104] : memref<8x2x1xf32, #tpu.memory_space<vmem>>, vector<1x2x1xf32>
    %343 = vector.shape_cast %342 : vector<1x2x1xf32> to vector<2x1xf32>
    %344 = arith.truncf %328 : vector<2x32xf32> to vector<2x32xbf16>
    %cst_105 = arith.constant dense<0.000000e+00> : vector<2x96xf32>
    %345 = tpu.matmul %344, %1, %cst_105 {dimension_numbers = #tpu.dot_dimension_numbers<[1], [0], [0], [1], [0, 0, 1, 1], [], []>} : vector<2x32xbf16>, vector<32x96xbf16>, vector<2x96xf32> -> vector<2x96xf32>
    %346 = vector.broadcast %3 : vector<1x96xf32> to vector<2x96xf32>
    %347 = arith.addf %345, %346 : vector<2x96xf32>
    %348 = vector.extract_strided_slice %340 {offsets = [0, 0], sizes = [2, 32], strides = [1, 1]} : vector<2x96xf32> to vector<2x32xf32>
    %349 = vector.extract_strided_slice %347 {offsets = [0, 0], sizes = [2, 32], strides = [1, 1]} : vector<2x96xf32> to vector<2x32xf32>
    %350 = arith.addf %348, %349 : vector<2x32xf32>
    %351 = arith.negf %350 : vector<2x32xf32>
    %352 = math.exp %351 : vector<2x32xf32>
    %cst_106 = arith.constant 1.000000e+00 : f32
    %353 = vector.broadcast %cst_106 : f32 to vector<2x32xf32>
    %354 = arith.addf %353, %352 : vector<2x32xf32>
    %355 = arith.divf %353, %354 : vector<2x32xf32>
    %356 = vector.extract_strided_slice %340 {offsets = [0, 32], sizes = [2, 32], strides = [1, 1]} : vector<2x96xf32> to vector<2x32xf32>
    %357 = vector.extract_strided_slice %347 {offsets = [0, 32], sizes = [2, 32], strides = [1, 1]} : vector<2x96xf32> to vector<2x32xf32>
    %358 = arith.addf %356, %357 : vector<2x32xf32>
    %359 = arith.negf %358 : vector<2x32xf32>
    %360 = math.exp %359 : vector<2x32xf32>
    %cst_107 = arith.constant 1.000000e+00 : f32
    %361 = vector.broadcast %cst_107 : f32 to vector<2x32xf32>
    %362 = arith.addf %361, %360 : vector<2x32xf32>
    %363 = arith.divf %361, %362 : vector<2x32xf32>
    %364 = vector.extract_strided_slice %340 {offsets = [0, 64], sizes = [2, 32], strides = [1, 1]} : vector<2x96xf32> to vector<2x32xf32>
    %365 = vector.extract_strided_slice %347 {offsets = [0, 64], sizes = [2, 32], strides = [1, 1]} : vector<2x96xf32> to vector<2x32xf32>
    %366 = arith.mulf %355, %365 : vector<2x32xf32>
    %367 = arith.addf %364, %366 : vector<2x32xf32>
    %368 = math.tanh %367 : vector<2x32xf32>
    %369 = arith.subf %328, %368 : vector<2x32xf32>
    %370 = arith.mulf %363, %369 : vector<2x32xf32>
    %371 = arith.addf %368, %370 : vector<2x32xf32>
    %372 = arith.subf %371, %328 : vector<2x32xf32>
    %373 = vector.broadcast %343 : vector<2x1xf32> to vector<2x32xf32>
    %374 = arith.mulf %373, %372 : vector<2x32xf32>
    %375 = arith.addf %328, %374 : vector<2x32xf32>
    %376 = vector.broadcast %343 : vector<2x1xf32> to vector<2x32xf32>
    %377 = arith.mulf %376, %375 : vector<2x32xf32>
    %c0_108 = arith.constant 0 : index
    %378 = arith.index_cast %337 : i32 to index
    %c0_109 = arith.constant 0 : index
    %c0_110 = arith.constant 0 : index
    %379 = vector.load %arg6[%c0_108, %378, %c0_109, %c0_110] : memref<1x8x2x32xf32, #tpu.memory_space<vmem>>, vector<1x1x2x32xf32>
    %380 = vector.shape_cast %379 : vector<1x1x2x32xf32> to vector<2x32xf32>
    %381 = vector.shape_cast %377 : vector<2x32xf32> to vector<1x1x2x32xf32>
    tpu.vector_store %arg6[%c0_108, %378, %c0_109, %c0_110], %381 {strides = array<i32>} : memref<1x8x2x32xf32, #tpu.memory_space<vmem>>, vector<1x1x2x32xf32>,
    %c8_i32 = arith.constant 8 : i32
    %c0_111 = arith.constant 0 : index
    %c0_112 = arith.constant 0 : index
    %c0_113 = arith.constant 0 : index
    %382 = vector.load %arg7[%c0_111, %c0_112, %c0_113] : memref<1x2x32xf32, #tpu.memory_space<vmem>>, vector<1x2x32xf32>
    %383 = vector.shape_cast %382 : vector<1x2x32xf32> to vector<2x32xf32>
    %384 = vector.shape_cast %375 : vector<2x32xf32> to vector<1x2x32xf32>
    tpu.vector_store %arg7[%c0_111, %c0_112, %c0_113], %384 {strides = array<i32>} : memref<1x2x32xf32, #tpu.memory_space<vmem>>, vector<1x2x32xf32>,
    return
  }
  func.func @transform_0(%arg0: i32) -> (i32, i32, i32, i32) {
    %c0_i32 = arith.constant 0 : i32
    %c0_i32_0 = arith.constant 0 : i32
    %c0_i32_1 = arith.constant 0 : i32
    %c0_i32_2 = arith.constant 0 : i32
    return %arg0, %c0_i32, %c0_i32_0, %c0_i32_1 : i32, i32, i32, i32
  }
  func.func @transform_1(%arg0: i32) -> (i32, i32, i32) {
    %c0_i32 = arith.constant 0 : i32
    %c0_i32_0 = arith.constant 0 : i32
    %c0_i32_1 = arith.constant 0 : i32
    %c0_i32_2 = arith.constant 0 : i32
    return %c0_i32, %c0_i32_0, %c0_i32_1 : i32, i32, i32
  }
  func.func @transform_2(%arg0: i32) -> (i32, i32, i32) {
    %c0_i32 = arith.constant 0 : i32
    %c0_i32_0 = arith.constant 0 : i32
    %c0_i32_1 = arith.constant 0 : i32
    return %arg0, %c0_i32, %c0_i32_0 : i32, i32, i32
  }
  func.func @transform_3(%arg0: i32) -> (i32, i32, i32) {
    %c0_i32 = arith.constant 0 : i32
    %c0_i32_0 = arith.constant 0 : i32
    %c0_i32_1 = arith.constant 0 : i32
    return %arg0, %c0_i32, %c0_i32_0 : i32, i32, i32
  }
  func.func @transform_4(%arg0: i32) -> (i32, i32, i32) {
    %c0_i32 = arith.constant 0 : i32
    %c0_i32_0 = arith.constant 0 : i32
    %c0_i32_1 = arith.constant 0 : i32
    return %arg0, %c0_i32, %c0_i32_0 : i32, i32, i32
  }
  func.func @transform_5(%arg0: i32) -> (i32, i32, i32, i32) {
    %c0_i32 = arith.constant 0 : i32
    %c0_i32_0 = arith.constant 0 : i32
    %c0_i32_1 = arith.constant 0 : i32
    %c0_i32_2 = arith.constant 0 : i32
    return %arg0, %c0_i32, %c0_i32_0, %c0_i32_1 : i32, i32, i32, i32
  }
  func.func @transform_6(%arg0: i32) -> (i32, i32, i32) {
    %c0_i32 = arith.constant 0 : i32
    %c0_i32_0 = arith.constant 0 : i32
    %c0_i32_1 = arith.constant 0 : i32
    return %arg0, %c0_i32, %c0_i32_0 : i32, i32, i32
  }
}

module attributes {stable_mosaic.version = 11 : i64} {
  func.func @_attn_kernel(%arg0: i32, %arg1: memref<1x2x8x32xbf16, #tpu.memory_space<vmem>>, %arg2: memref<1x2x8x32xbf16, #tpu.memory_space<vmem>>, %arg3: memref<1x2x8x32xbf16, #tpu.memory_space<vmem>>, %arg4: memref<1x2x8x32xbf16, #tpu.memory_space<vmem>>) attributes {dimension_semantics = [#tpu.dimension_semantics<parallel>], iteration_bounds = array<i64: 2>, scalar_prefetch = 0 : i64, scratch_operands = 0 : i64, tpu.core_type = #tpu.core_type<tc>, window_params = [{transform_indices = @transform_0, window_bounds = array<i64: 1, 2, 8, 32>}, {transform_indices = @transform_1, window_bounds = array<i64: 1, 2, 8, 32>}, {transform_indices = @transform_2, window_bounds = array<i64: 1, 2, 8, 32>}, {transform_indices = @transform_3, window_bounds = array<i64: 1, 2, 8, 32>}]} {
    %c0 = arith.constant 0 : index
    %c0_0 = arith.constant 0 : index
    %c0_1 = arith.constant 0 : index
    %c0_2 = arith.constant 0 : index
    %0 = vector.load %arg1[%c0, %c0_0, %c0_1, %c0_2] : memref<1x2x8x32xbf16, #tpu.memory_space<vmem>>, vector<1x2x8x32xbf16>
    %1 = vector.shape_cast %0 : vector<1x2x8x32xbf16> to vector<2x8x32xbf16>
    %c0_3 = arith.constant 0 : index
    %c0_4 = arith.constant 0 : index
    %c0_5 = arith.constant 0 : index
    %c0_6 = arith.constant 0 : index
    %2 = vector.load %arg2[%c0_3, %c0_4, %c0_5, %c0_6] : memref<1x2x8x32xbf16, #tpu.memory_space<vmem>>, vector<1x2x8x32xbf16>
    %3 = vector.shape_cast %2 : vector<1x2x8x32xbf16> to vector<2x8x32xbf16>
    %c0_7 = arith.constant 0 : index
    %c0_8 = arith.constant 0 : index
    %c0_9 = arith.constant 0 : index
    %c0_10 = arith.constant 0 : index
    %4 = vector.load %arg3[%c0_7, %c0_8, %c0_9, %c0_10] : memref<1x2x8x32xbf16, #tpu.memory_space<vmem>>, vector<1x2x8x32xbf16>
    %5 = vector.shape_cast %4 : vector<1x2x8x32xbf16> to vector<2x8x32xbf16>
    %cst = arith.constant dense<0.000000e+00> : vector<2x8x8xf32>
    %6 = tpu.matmul %1, %3, %cst {dimension_numbers = #tpu.dot_dimension_numbers<[2], [2], [1], [1], [0, 0, 0, 1, 1, 1], [0], [0]>} : vector<2x8x32xbf16>, vector<2x8x32xbf16>, vector<2x8x8xf32> -> vector<2x8x8xf32>
    %cst_11 = arith.constant 0.176776692 : f32
    %7 = vector.broadcast %cst_11 : f32 to vector<2x8x8xf32>
    %8 = arith.mulf %6, %7 : vector<2x8x8xf32>
    %cst_12 = arith.constant dense<0xFF800000> : vector<2x8xf32>
    %9 = vector.multi_reduction <maximumf>, %8, %cst_12 [2] : vector<2x8x8xf32> to vector<2x8xf32>
    %10 = vector.shape_cast %9 : vector<2x8xf32> to vector<2x8x1xf32>
    %11 = vector.broadcast %10 : vector<2x8x1xf32> to vector<2x8x8xf32>
    %12 = arith.subf %8, %11 : vector<2x8x8xf32>
    %13 = math.exp %12 : vector<2x8x8xf32>
    %cst_13 = arith.constant dense<0.000000e+00> : vector<2x8xf32>
    %14 = vector.multi_reduction <add>, %13, %cst_13 [2] : vector<2x8x8xf32> to vector<2x8xf32>
    %15 = vector.shape_cast %14 : vector<2x8xf32> to vector<2x8x1xf32>
    %16 = tpu.reciprocal %15 {approx = true} : vector<2x8x1xf32> -> vector<2x8x1xf32>
    %17 = vector.broadcast %16 : vector<2x8x1xf32> to vector<2x8x8xf32>
    %18 = arith.mulf %13, %17 : vector<2x8x8xf32>
    %19 = arith.truncf %18 : vector<2x8x8xf32> to vector<2x8x8xbf16>
    %cst_14 = arith.constant dense<0.000000e+00> : vector<2x8x32xf32>
    %20 = tpu.matmul %19, %5, %cst_14 {dimension_numbers = #tpu.dot_dimension_numbers<[2], [1], [1], [2], [0, 0, 0, 1, 1, 2], [0], [0]>} : vector<2x8x8xbf16>, vector<2x8x32xbf16>, vector<2x8x32xf32> -> vector<2x8x32xf32>
    %21 = arith.truncf %20 : vector<2x8x32xf32> to vector<2x8x32xbf16>
    %c0_15 = arith.constant 0 : index
    %c0_16 = arith.constant 0 : index
    %c0_17 = arith.constant 0 : index
    %c0_18 = arith.constant 0 : index
    %22 = vector.load %arg4[%c0_15, %c0_16, %c0_17, %c0_18] : memref<1x2x8x32xbf16, #tpu.memory_space<vmem>>, vector<1x2x8x32xbf16>
    %23 = vector.shape_cast %22 : vector<1x2x8x32xbf16> to vector<2x8x32xbf16>
    %24 = vector.shape_cast %21 : vector<2x8x32xbf16> to vector<1x2x8x32xbf16>
    tpu.vector_store %arg4[%c0_15, %c0_16, %c0_17, %c0_18], %24 {strides = array<i32>} : memref<1x2x8x32xbf16, #tpu.memory_space<vmem>>, vector<1x2x8x32xbf16>,
    return
  }
  func.func @transform_0(%arg0: i32) -> (i32, i32, i32, i32) {
    %c0_i32 = arith.constant 0 : i32
    %c0_i32_0 = arith.constant 0 : i32
    %c0_i32_1 = arith.constant 0 : i32
    %c0_i32_2 = arith.constant 0 : i32
    return %arg0, %c0_i32, %c0_i32_0, %c0_i32_1 : i32, i32, i32, i32
  }
  func.func @transform_1(%arg0: i32) -> (i32, i32, i32, i32) {
    %c0_i32 = arith.constant 0 : i32
    %c0_i32_0 = arith.constant 0 : i32
    %c0_i32_1 = arith.constant 0 : i32
    %c0_i32_2 = arith.constant 0 : i32
    return %arg0, %c0_i32, %c0_i32_0, %c0_i32_1 : i32, i32, i32, i32
  }
  func.func @transform_2(%arg0: i32) -> (i32, i32, i32, i32) {
    %c0_i32 = arith.constant 0 : i32
    %c0_i32_0 = arith.constant 0 : i32
    %c0_i32_1 = arith.constant 0 : i32
    %c0_i32_2 = arith.constant 0 : i32
    return %arg0, %c0_i32, %c0_i32_0, %c0_i32_1 : i32, i32, i32, i32
  }
  func.func @transform_3(%arg0: i32) -> (i32, i32, i32, i32) {
    %c0_i32 = arith.constant 0 : i32
    %c0_i32_0 = arith.constant 0 : i32
    %c0_i32_1 = arith.constant 0 : i32
    %c0_i32_2 = arith.constant 0 : i32
    return %arg0, %c0_i32, %c0_i32_0, %c0_i32_1 : i32, i32, i32, i32
  }
}

module attributes {stable_mosaic.version = 11 : i64} {
  func.func @_outproj_res_ln_kernel(%arg0: i32, %arg1: memref<16x64xbf16, #tpu.memory_space<vmem>>, %arg2: memref<16x64xf32, #tpu.memory_space<vmem>>, %arg3: memref<64x64xbf16, #tpu.memory_space<vmem>>, %arg4: memref<1x64xf32, #tpu.memory_space<vmem>>, %arg5: memref<1x64xf32, #tpu.memory_space<vmem>>, %arg6: memref<1x64xf32, #tpu.memory_space<vmem>>, %arg7: memref<16x64xf32, #tpu.memory_space<vmem>>) attributes {dimension_semantics = [#tpu.dimension_semantics<parallel>], iteration_bounds = array<i64: 1>, scalar_prefetch = 0 : i64, scratch_operands = 0 : i64, tpu.core_type = #tpu.core_type<tc>, window_params = [{transform_indices = @transform_0, window_bounds = array<i64: 16, 64>}, {transform_indices = @transform_1, window_bounds = array<i64: 16, 64>}, {pipeline_mode = #tpu.pipeline_mode<synchronous>, transform_indices = @transform_2, window_bounds = array<i64: 64, 64>}, {pipeline_mode = #tpu.pipeline_mode<synchronous>, transform_indices = @transform_3, window_bounds = array<i64: 1, 64>}, {pipeline_mode = #tpu.pipeline_mode<synchronous>, transform_indices = @transform_4, window_bounds = array<i64: 1, 64>}, {pipeline_mode = #tpu.pipeline_mode<synchronous>, transform_indices = @transform_5, window_bounds = array<i64: 1, 64>}, {transform_indices = @transform_6, window_bounds = array<i64: 16, 64>}]} {
    %c0 = arith.constant 0 : index
    %c0_0 = arith.constant 0 : index
    %0 = vector.load %arg1[%c0, %c0_0] : memref<16x64xbf16, #tpu.memory_space<vmem>>, vector<16x64xbf16>
    %c0_1 = arith.constant 0 : index
    %c0_2 = arith.constant 0 : index
    %1 = vector.load %arg3[%c0_1, %c0_2] : memref<64x64xbf16, #tpu.memory_space<vmem>>, vector<64x64xbf16>
    %cst = arith.constant dense<0.000000e+00> : vector<16x64xf32>
    %2 = tpu.matmul %0, %1, %cst {dimension_numbers = #tpu.dot_dimension_numbers<[1], [0], [0], [1], [0, 0, 1, 1], [], []>} : vector<16x64xbf16>, vector<64x64xbf16>, vector<16x64xf32> -> vector<16x64xf32>
    %c0_3 = arith.constant 0 : index
    %c0_4 = arith.constant 0 : index
    %3 = vector.load %arg4[%c0_3, %c0_4] : memref<1x64xf32, #tpu.memory_space<vmem>>, vector<1x64xf32>
    %4 = vector.broadcast %3 : vector<1x64xf32> to vector<16x64xf32>
    %5 = arith.addf %2, %4 : vector<16x64xf32>
    %c0_5 = arith.constant 0 : index
    %c0_6 = arith.constant 0 : index
    %6 = vector.load %arg2[%c0_5, %c0_6] : memref<16x64xf32, #tpu.memory_space<vmem>>, vector<16x64xf32>
    %7 = arith.addf %5, %6 : vector<16x64xf32>
    %c0_7 = arith.constant 0 : index
    %c0_8 = arith.constant 0 : index
    %8 = vector.load %arg5[%c0_7, %c0_8] : memref<1x64xf32, #tpu.memory_space<vmem>>, vector<1x64xf32>
    %c0_9 = arith.constant 0 : index
    %c0_10 = arith.constant 0 : index
    %9 = vector.load %arg6[%c0_9, %c0_10] : memref<1x64xf32, #tpu.memory_space<vmem>>, vector<1x64xf32>
    %cst_11 = arith.constant dense<0.000000e+00> : vector<16xf32>
    %10 = vector.multi_reduction <add>, %7, %cst_11 [1] : vector<16x64xf32> to vector<16xf32>
    %11 = vector.shape_cast %10 : vector<16xf32> to vector<16x1xf32>
    %cst_12 = arith.constant 6.400000e+01 : f32
    %12 = vector.broadcast %cst_12 : f32 to vector<16x1xf32>
    %13 = arith.divf %11, %12 : vector<16x1xf32>
    %14 = vector.broadcast %13 : vector<16x1xf32> to vector<16x64xf32>
    %15 = arith.subf %7, %14 : vector<16x64xf32>
    %16 = arith.mulf %15, %15 : vector<16x64xf32>
    %cst_13 = arith.constant dense<0.000000e+00> : vector<16xf32>
    %17 = vector.multi_reduction <add>, %16, %cst_13 [1] : vector<16x64xf32> to vector<16xf32>
    %18 = vector.shape_cast %17 : vector<16xf32> to vector<16x1xf32>
    %cst_14 = arith.constant 6.400000e+01 : f32
    %19 = vector.broadcast %cst_14 : f32 to vector<16x1xf32>
    %20 = arith.divf %18, %19 : vector<16x1xf32>
    %21 = vector.broadcast %13 : vector<16x1xf32> to vector<16x64xf32>
    %22 = arith.subf %7, %21 : vector<16x64xf32>
    %cst_15 = arith.constant 9.99999974E-6 : f32
    %23 = vector.broadcast %cst_15 : f32 to vector<16x1xf32>
    %24 = arith.addf %20, %23 : vector<16x1xf32>
    %25 = math.rsqrt %24 : vector<16x1xf32>
    %26 = vector.broadcast %25 : vector<16x1xf32> to vector<16x64xf32>
    %27 = arith.mulf %22, %26 : vector<16x64xf32>
    %28 = vector.broadcast %8 : vector<1x64xf32> to vector<16x64xf32>
    %29 = arith.mulf %27, %28 : vector<16x64xf32>
    %30 = vector.broadcast %9 : vector<1x64xf32> to vector<16x64xf32>
    %31 = arith.addf %29, %30 : vector<16x64xf32>
    %c0_16 = arith.constant 0 : index
    %c0_17 = arith.constant 0 : index
    %32 = vector.load %arg7[%c0_16, %c0_17] : memref<16x64xf32, #tpu.memory_space<vmem>>, vector<16x64xf32>
    tpu.vector_store %arg7[%c0_16, %c0_17], %31 {strides = array<i32>} : memref<16x64xf32, #tpu.memory_space<vmem>>, vector<16x64xf32>,
    return
  }
  func.func @transform_0(%arg0: i32) -> (i32, i32) {
    %c0_i32 = arith.constant 0 : i32
    %c0_i32_0 = arith.constant 0 : i32
    return %arg0, %c0_i32 : i32, i32
  }
  func.func @transform_1(%arg0: i32) -> (i32, i32) {
    %c0_i32 = arith.constant 0 : i32
    %c0_i32_0 = arith.constant 0 : i32
    return %arg0, %c0_i32 : i32, i32
  }
  func.func @transform_2(%arg0: i32) -> (i32, i32) {
    %c0_i32 = arith.constant 0 : i32
    %c0_i32_0 = arith.constant 0 : i32
    %c0_i32_1 = arith.constant 0 : i32
    return %c0_i32, %c0_i32_0 : i32, i32
  }
  func.func @transform_3(%arg0: i32) -> (i32, i32) {
    %c0_i32 = arith.constant 0 : i32
    %c0_i32_0 = arith.constant 0 : i32
    %c0_i32_1 = arith.constant 0 : i32
    return %c0_i32, %c0_i32_0 : i32, i32
  }
  func.func @transform_4(%arg0: i32) -> (i32, i32) {
    %c0_i32 = arith.constant 0 : i32
    %c0_i32_0 = arith.constant 0 : i32
    %c0_i32_1 = arith.constant 0 : i32
    return %c0_i32, %c0_i32_0 : i32, i32
  }
  func.func @transform_5(%arg0: i32) -> (i32, i32) {
    %c0_i32 = arith.constant 0 : i32
    %c0_i32_0 = arith.constant 0 : i32
    %c0_i32_1 = arith.constant 0 : i32
    return %c0_i32, %c0_i32_0 : i32, i32
  }
  func.func @transform_6(%arg0: i32) -> (i32, i32) {
    %c0_i32 = arith.constant 0 : i32
    %c0_i32_0 = arith.constant 0 : i32
    return %arg0, %c0_i32 : i32, i32
  }
}

module attributes {stable_mosaic.version = 11 : i64} {
  func.func @_memadd_proj_ln_kernel(%arg0: i32, %arg1: memref<16x64xf32, #tpu.memory_space<vmem>>, %arg2: memref<1x64xf32, #tpu.memory_space<vmem>>, %arg3: memref<64x32xbf16, #tpu.memory_space<vmem>>, %arg4: memref<1x32xf32, #tpu.memory_space<vmem>>, %arg5: memref<1x32xf32, #tpu.memory_space<vmem>>, %arg6: memref<1x32xf32, #tpu.memory_space<vmem>>, %arg7: memref<16x32xf32, #tpu.memory_space<vmem>>) attributes {dimension_semantics = [#tpu.dimension_semantics<parallel>], iteration_bounds = array<i64: 1>, scalar_prefetch = 0 : i64, scratch_operands = 0 : i64, tpu.core_type = #tpu.core_type<tc>, window_params = [{transform_indices = @transform_0, window_bounds = array<i64: 16, 64>}, {pipeline_mode = #tpu.pipeline_mode<synchronous>, transform_indices = @transform_1, window_bounds = array<i64: 1, 64>}, {pipeline_mode = #tpu.pipeline_mode<synchronous>, transform_indices = @transform_2, window_bounds = array<i64: 64, 32>}, {pipeline_mode = #tpu.pipeline_mode<synchronous>, transform_indices = @transform_3, window_bounds = array<i64: 1, 32>}, {pipeline_mode = #tpu.pipeline_mode<synchronous>, transform_indices = @transform_4, window_bounds = array<i64: 1, 32>}, {pipeline_mode = #tpu.pipeline_mode<synchronous>, transform_indices = @transform_5, window_bounds = array<i64: 1, 32>}, {transform_indices = @transform_6, window_bounds = array<i64: 16, 32>}]} {
    %c0 = arith.constant 0 : index
    %c0_0 = arith.constant 0 : index
    %0 = vector.load %arg1[%c0, %c0_0] : memref<16x64xf32, #tpu.memory_space<vmem>>, vector<16x64xf32>
    %c0_1 = arith.constant 0 : index
    %c0_2 = arith.constant 0 : index
    %1 = vector.load %arg2[%c0_1, %c0_2] : memref<1x64xf32, #tpu.memory_space<vmem>>, vector<1x64xf32>
    %2 = vector.broadcast %1 : vector<1x64xf32> to vector<16x64xf32>
    %3 = arith.addf %0, %2 : vector<16x64xf32>
    %4 = arith.truncf %3 : vector<16x64xf32> to vector<16x64xbf16>
    %c0_3 = arith.constant 0 : index
    %c0_4 = arith.constant 0 : index
    %5 = vector.load %arg3[%c0_3, %c0_4] : memref<64x32xbf16, #tpu.memory_space<vmem>>, vector<64x32xbf16>
    %cst = arith.constant dense<0.000000e+00> : vector<16x32xf32>
    %6 = tpu.matmul %4, %5, %cst {dimension_numbers = #tpu.dot_dimension_numbers<[1], [0], [0], [1], [0, 0, 1, 1], [], []>} : vector<16x64xbf16>, vector<64x32xbf16>, vector<16x32xf32> -> vector<16x32xf32>
    %c0_5 = arith.constant 0 : index
    %c0_6 = arith.constant 0 : index
    %7 = vector.load %arg4[%c0_5, %c0_6] : memref<1x32xf32, #tpu.memory_space<vmem>>, vector<1x32xf32>
    %8 = vector.broadcast %7 : vector<1x32xf32> to vector<16x32xf32>
    %9 = arith.addf %6, %8 : vector<16x32xf32>
    %c0_7 = arith.constant 0 : index
    %c0_8 = arith.constant 0 : index
    %10 = vector.load %arg5[%c0_7, %c0_8] : memref<1x32xf32, #tpu.memory_space<vmem>>, vector<1x32xf32>
    %c0_9 = arith.constant 0 : index
    %c0_10 = arith.constant 0 : index
    %11 = vector.load %arg6[%c0_9, %c0_10] : memref<1x32xf32, #tpu.memory_space<vmem>>, vector<1x32xf32>
    %cst_11 = arith.constant dense<0.000000e+00> : vector<16xf32>
    %12 = vector.multi_reduction <add>, %9, %cst_11 [1] : vector<16x32xf32> to vector<16xf32>
    %13 = vector.shape_cast %12 : vector<16xf32> to vector<16x1xf32>
    %cst_12 = arith.constant 3.200000e+01 : f32
    %14 = vector.broadcast %cst_12 : f32 to vector<16x1xf32>
    %15 = arith.divf %13, %14 : vector<16x1xf32>
    %16 = vector.broadcast %15 : vector<16x1xf32> to vector<16x32xf32>
    %17 = arith.subf %9, %16 : vector<16x32xf32>
    %18 = arith.mulf %17, %17 : vector<16x32xf32>
    %cst_13 = arith.constant dense<0.000000e+00> : vector<16xf32>
    %19 = vector.multi_reduction <add>, %18, %cst_13 [1] : vector<16x32xf32> to vector<16xf32>
    %20 = vector.shape_cast %19 : vector<16xf32> to vector<16x1xf32>
    %cst_14 = arith.constant 3.200000e+01 : f32
    %21 = vector.broadcast %cst_14 : f32 to vector<16x1xf32>
    %22 = arith.divf %20, %21 : vector<16x1xf32>
    %23 = vector.broadcast %15 : vector<16x1xf32> to vector<16x32xf32>
    %24 = arith.subf %9, %23 : vector<16x32xf32>
    %cst_15 = arith.constant 9.99999974E-6 : f32
    %25 = vector.broadcast %cst_15 : f32 to vector<16x1xf32>
    %26 = arith.addf %22, %25 : vector<16x1xf32>
    %27 = math.rsqrt %26 : vector<16x1xf32>
    %28 = vector.broadcast %27 : vector<16x1xf32> to vector<16x32xf32>
    %29 = arith.mulf %24, %28 : vector<16x32xf32>
    %30 = vector.broadcast %10 : vector<1x32xf32> to vector<16x32xf32>
    %31 = arith.mulf %29, %30 : vector<16x32xf32>
    %32 = vector.broadcast %11 : vector<1x32xf32> to vector<16x32xf32>
    %33 = arith.addf %31, %32 : vector<16x32xf32>
    %c0_16 = arith.constant 0 : index
    %c0_17 = arith.constant 0 : index
    %34 = vector.load %arg7[%c0_16, %c0_17] : memref<16x32xf32, #tpu.memory_space<vmem>>, vector<16x32xf32>
    tpu.vector_store %arg7[%c0_16, %c0_17], %33 {strides = array<i32>} : memref<16x32xf32, #tpu.memory_space<vmem>>, vector<16x32xf32>,
    return
  }
  func.func @transform_0(%arg0: i32) -> (i32, i32) {
    %c0_i32 = arith.constant 0 : i32
    %c0_i32_0 = arith.constant 0 : i32
    return %arg0, %c0_i32 : i32, i32
  }
  func.func @transform_1(%arg0: i32) -> (i32, i32) {
    %c0_i32 = arith.constant 0 : i32
    %c0_i32_0 = arith.constant 0 : i32
    %c0_i32_1 = arith.constant 0 : i32
    return %c0_i32, %c0_i32_0 : i32, i32
  }
  func.func @transform_2(%arg0: i32) -> (i32, i32) {
    %c0_i32 = arith.constant 0 : i32
    %c0_i32_0 = arith.constant 0 : i32
    %c0_i32_1 = arith.constant 0 : i32
    return %c0_i32, %c0_i32_0 : i32, i32
  }
  func.func @transform_3(%arg0: i32) -> (i32, i32) {
    %c0_i32 = arith.constant 0 : i32
    %c0_i32_0 = arith.constant 0 : i32
    %c0_i32_1 = arith.constant 0 : i32
    return %c0_i32, %c0_i32_0 : i32, i32
  }
  func.func @transform_4(%arg0: i32) -> (i32, i32) {
    %c0_i32 = arith.constant 0 : i32
    %c0_i32_0 = arith.constant 0 : i32
    %c0_i32_1 = arith.constant 0 : i32
    return %c0_i32, %c0_i32_0 : i32, i32
  }
  func.func @transform_5(%arg0: i32) -> (i32, i32) {
    %c0_i32 = arith.constant 0 : i32
    %c0_i32_0 = arith.constant 0 : i32
    %c0_i32_1 = arith.constant 0 : i32
    return %c0_i32, %c0_i32_0 : i32, i32
  }
  func.func @transform_6(%arg0: i32) -> (i32, i32) {
    %c0_i32 = arith.constant 0 : i32
    %c0_i32_0 = arith.constant 0 : i32
    return %arg0, %c0_i32 : i32, i32
  }
}

module attributes {stable_mosaic.version = 11 : i64} {
  func.func @_head_kernel(%arg0: i32, %arg1: i32, %arg2: memref<16x32xf32, #tpu.memory_space<vmem>>, %arg3: memref<32x32xbf16, #tpu.memory_space<vmem>>, %arg4: memref<1x32xf32, #tpu.memory_space<vmem>>, %arg5: memref<1x32xf32, #tpu.memory_space<vmem>>, %arg6: memref<1x32xf32, #tpu.memory_space<vmem>>, %arg7: memref<32x256xbf16, #tpu.memory_space<vmem>>, %arg8: memref<1x256xf32, #tpu.memory_space<vmem>>, %arg9: memref<16x256xf32, #tpu.memory_space<vmem>>, %arg10: memref<16x32xbf16, #tpu.memory_space<vmem>>) attributes {dimension_semantics = [#tpu.dimension_semantics<parallel>, #tpu.dimension_semantics<arbitrary>], iteration_bounds = array<i64: 1, 4>, scalar_prefetch = 0 : i64, scratch_operands = 1 : i64, tpu.core_type = #tpu.core_type<tc>, window_params = [{transform_indices = @transform_0, window_bounds = array<i64: 16, 32>}, {pipeline_mode = #tpu.pipeline_mode<synchronous>, transform_indices = @transform_1, window_bounds = array<i64: 32, 32>}, {pipeline_mode = #tpu.pipeline_mode<synchronous>, transform_indices = @transform_2, window_bounds = array<i64: 1, 32>}, {pipeline_mode = #tpu.pipeline_mode<synchronous>, transform_indices = @transform_3, window_bounds = array<i64: 1, 32>}, {pipeline_mode = #tpu.pipeline_mode<synchronous>, transform_indices = @transform_4, window_bounds = array<i64: 1, 32>}, {transform_indices = @transform_5, window_bounds = array<i64: 32, 256>}, {transform_indices = @transform_6, window_bounds = array<i64: 1, 256>}, {transform_indices = @transform_7, window_bounds = array<i64: 16, 256>}]} {
    %c0_i32 = arith.constant 0 : i32
    %0 = arith.cmpi eq, %arg1, %c0_i32 : i32
    %1 = arith.extui %0 : i1 to i32
    %c0_i32_0 = arith.constant 0 : i32
    %2 = arith.cmpi ne, %1, %c0_i32_0 : i32
    scf.if %2 {
      %c0_8 = arith.constant 0 : index
      %c0_9 = arith.constant 0 : index
      %10 = vector.load %arg2[%c0_8, %c0_9] : memref<16x32xf32, #tpu.memory_space<vmem>>, vector<16x32xf32>
      %11 = arith.truncf %10 : vector<16x32xf32> to vector<16x32xbf16>
      %c0_10 = arith.constant 0 : index
      %c0_11 = arith.constant 0 : index
      %12 = vector.load %arg3[%c0_10, %c0_11] : memref<32x32xbf16, #tpu.memory_space<vmem>>, vector<32x32xbf16>
      %cst_12 = arith.constant dense<0.000000e+00> : vector<16x32xf32>
      %13 = tpu.matmul %11, %12, %cst_12 {dimension_numbers = #tpu.dot_dimension_numbers<[1], [0], [0], [1], [0, 0, 1, 1], [], []>} : vector<16x32xbf16>, vector<32x32xbf16>, vector<16x32xf32> -> vector<16x32xf32>
      %c0_13 = arith.constant 0 : index
      %c0_14 = arith.constant 0 : index
      %14 = vector.load %arg4[%c0_13, %c0_14] : memref<1x32xf32, #tpu.memory_space<vmem>>, vector<1x32xf32>
      %15 = vector.broadcast %14 : vector<1x32xf32> to vector<16x32xf32>
      %16 = arith.addf %13, %15 : vector<16x32xf32>
      %c0_15 = arith.constant 0 : index
      %c0_16 = arith.constant 0 : index
      %17 = vector.load %arg5[%c0_15, %c0_16] : memref<1x32xf32, #tpu.memory_space<vmem>>, vector<1x32xf32>
      %c0_17 = arith.constant 0 : index
      %c0_18 = arith.constant 0 : index
      %18 = vector.load %arg6[%c0_17, %c0_18] : memref<1x32xf32, #tpu.memory_space<vmem>>, vector<1x32xf32>
      %cst_19 = arith.constant dense<0.000000e+00> : vector<16xf32>
      %19 = vector.multi_reduction <add>, %16, %cst_19 [1] : vector<16x32xf32> to vector<16xf32>
      %20 = vector.shape_cast %19 : vector<16xf32> to vector<16x1xf32>
      %cst_20 = arith.constant 3.200000e+01 : f32
      %21 = vector.broadcast %cst_20 : f32 to vector<16x1xf32>
      %22 = arith.divf %20, %21 : vector<16x1xf32>
      %23 = vector.broadcast %22 : vector<16x1xf32> to vector<16x32xf32>
      %24 = arith.subf %16, %23 : vector<16x32xf32>
      %25 = arith.mulf %24, %24 : vector<16x32xf32>
      %cst_21 = arith.constant dense<0.000000e+00> : vector<16xf32>
      %26 = vector.multi_reduction <add>, %25, %cst_21 [1] : vector<16x32xf32> to vector<16xf32>
      %27 = vector.shape_cast %26 : vector<16xf32> to vector<16x1xf32>
      %cst_22 = arith.constant 3.200000e+01 : f32
      %28 = vector.broadcast %cst_22 : f32 to vector<16x1xf32>
      %29 = arith.divf %27, %28 : vector<16x1xf32>
      %30 = vector.broadcast %22 : vector<16x1xf32> to vector<16x32xf32>
      %31 = arith.subf %16, %30 : vector<16x32xf32>
      %cst_23 = arith.constant 9.99999974E-6 : f32
      %32 = vector.broadcast %cst_23 : f32 to vector<16x1xf32>
      %33 = arith.addf %29, %32 : vector<16x1xf32>
      %34 = math.rsqrt %33 : vector<16x1xf32>
      %35 = vector.broadcast %34 : vector<16x1xf32> to vector<16x32xf32>
      %36 = arith.mulf %31, %35 : vector<16x32xf32>
      %37 = vector.broadcast %17 : vector<1x32xf32> to vector<16x32xf32>
      %38 = arith.mulf %36, %37 : vector<16x32xf32>
      %39 = vector.broadcast %18 : vector<1x32xf32> to vector<16x32xf32>
      %40 = arith.addf %38, %39 : vector<16x32xf32>
      %cst_24 = arith.constant 0.000000e+00 : f32
      %41 = vector.broadcast %cst_24 : f32 to vector<16x32xf32>
      %42 = arith.maximumf %40, %41 : vector<16x32xf32>
      %43 = arith.truncf %42 : vector<16x32xf32> to vector<16x32xbf16>
      %c0_25 = arith.constant 0 : index
      %c0_26 = arith.constant 0 : index
      %44 = vector.load %arg10[%c0_25, %c0_26] : memref<16x32xbf16, #tpu.memory_space<vmem>>, vector<16x32xbf16>
      tpu.vector_store %arg10[%c0_25, %c0_26], %43 {strides = array<i32>} : memref<16x32xbf16, #tpu.memory_space<vmem>>, vector<16x32xbf16>,
    } else {
    }
    %c0 = arith.constant 0 : index
    %c0_1 = arith.constant 0 : index
    %3 = vector.load %arg10[%c0, %c0_1] : memref<16x32xbf16, #tpu.memory_space<vmem>>, vector<16x32xbf16>
    %c0_2 = arith.constant 0 : index
    %c0_3 = arith.constant 0 : index
    %4 = vector.load %arg7[%c0_2, %c0_3] : memref<32x256xbf16, #tpu.memory_space<vmem>>, vector<32x256xbf16>
    %cst = arith.constant dense<0.000000e+00> : vector<16x256xf32>
    %5 = tpu.matmul %3, %4, %cst {dimension_numbers = #tpu.dot_dimension_numbers<[1], [0], [0], [1], [0, 0, 1, 1], [], []>} : vector<16x32xbf16>, vector<32x256xbf16>, vector<16x256xf32> -> vector<16x256xf32>
    %c0_4 = arith.constant 0 : index
    %c0_5 = arith.constant 0 : index
    %6 = vector.load %arg8[%c0_4, %c0_5] : memref<1x256xf32, #tpu.memory_space<vmem>>, vector<1x256xf32>
    %7 = vector.broadcast %6 : vector<1x256xf32> to vector<16x256xf32>
    %8 = arith.addf %5, %7 : vector<16x256xf32>
    %c0_6 = arith.constant 0 : index
    %c0_7 = arith.constant 0 : index
    %9 = vector.load %arg9[%c0_6, %c0_7] : memref<16x256xf32, #tpu.memory_space<vmem>>, vector<16x256xf32>
    tpu.vector_store %arg9[%c0_6, %c0_7], %8 {strides = array<i32>} : memref<16x256xf32, #tpu.memory_space<vmem>>, vector<16x256xf32>,
    return
  }
  func.func @transform_0(%arg0: i32, %arg1: i32) -> (i32, i32) {
    %c0_i32 = arith.constant 0 : i32
    %c0_i32_0 = arith.constant 0 : i32
    return %arg0, %c0_i32 : i32, i32
  }
  func.func @transform_1(%arg0: i32, %arg1: i32) -> (i32, i32) {
    %c0_i32 = arith.constant 0 : i32
    %c0_i32_0 = arith.constant 0 : i32
    %c0_i32_1 = arith.constant 0 : i32
    return %c0_i32, %c0_i32_0 : i32, i32
  }
  func.func @transform_2(%arg0: i32, %arg1: i32) -> (i32, i32) {
    %c0_i32 = arith.constant 0 : i32
    %c0_i32_0 = arith.constant 0 : i32
    %c0_i32_1 = arith.constant 0 : i32
    return %c0_i32, %c0_i32_0 : i32, i32
  }
  func.func @transform_3(%arg0: i32, %arg1: i32) -> (i32, i32) {
    %c0_i32 = arith.constant 0 : i32
    %c0_i32_0 = arith.constant 0 : i32
    %c0_i32_1 = arith.constant 0 : i32
    return %c0_i32, %c0_i32_0 : i32, i32
  }
  func.func @transform_4(%arg0: i32, %arg1: i32) -> (i32, i32) {
    %c0_i32 = arith.constant 0 : i32
    %c0_i32_0 = arith.constant 0 : i32
    %c0_i32_1 = arith.constant 0 : i32
    return %c0_i32, %c0_i32_0 : i32, i32
  }
  func.func @transform_5(%arg0: i32, %arg1: i32) -> (i32, i32) {
    %c0_i32 = arith.constant 0 : i32
    %c0_i32_0 = arith.constant 0 : i32
    return %c0_i32, %arg1 : i32, i32
  }
  func.func @transform_6(%arg0: i32, %arg1: i32) -> (i32, i32) {
    %c0_i32 = arith.constant 0 : i32
    %c0_i32_0 = arith.constant 0 : i32
    return %c0_i32, %arg1 : i32, i32
  }
  func.func @transform_7(%arg0: i32, %arg1: i32) -> (i32, i32) {
    %c0_i32 = arith.constant 0 : i32
    return %arg0, %arg1 : i32, i32
  }
}

</mosaic_0001>

<bundles_post_ra>
// kernel: resonance_forward.7
= control target key start
LH: loop header
LB: loop body
LE: loop exit
PB: predicated region body
PF: predicated region fallthrough
CT: control target
= control target key end

     0   :  { %v155_v1 = vmov 0   ;;  %vm78_vm0 = vcmask 523264   ;;  %v28_v12 = vlaneseq  ;;  %s224_s1 = inlined_call_operand.vmem [shape: bf16[64,192], index: 1, kind: input, shape index: {}]   ;;  %s225_s0 = inlined_call_operand.vmem [shape: f32[16,64], index: 0, kind: input, shape index: {}]   ;;  %s226_s2 = inlined_call_operand.vmem [shape: f32[1,192], index: 2, kind: input, shape index: {}]   ;;  %s227_s3 = inlined_call_operand.vmem [shape: f32[16,192], index: 3, kind: output, shape index: {}]  }
   0x1   :  { %v143_v0 = vld [vmem:[%s224_s1 + $0x4] ss:$8 sps:$4 sm:$0xff]   ;;  %114 = vmatprep.mubr.bf16.mxu0 %v155_v1  ;;  %v145_v2 = vld [vmem:[%s224_s1] ss:$8 sps:$4 sm:$0xff]   ;;  %v146_v3 = vld [vmem:[%s224_s1 + $0x14] ss:$8 sps:$4 sm:$0xff]  }
   0x2   :  { %82 = vmatprep.subr.bf16.mxu0 %v143_v0  ;;  %v148_v4 = vld [vmem:[%s224_s1 + $0x10] ss:$8 sps:$4 sm:$0xff]   ;;  %v149_v5 = vld [vmem:[%s224_s1 + $0x24] ss:$8 sps:$4 sm:$0xff]   ;;  %v151_v6 = vld [vmem:[%s224_s1 + $0x20] ss:$8 sps:$4 sm:$0xff]  }
   0x3   :  { %83 = vmatpush1.bf16.msra.mxu0 %v145_v2  ;;  %v152_v7 = vld [vmem:[%s224_s1 + $0x34] ss:$8 sps:$4 sm:$0xff]   ;;  %v154_v8 = vld [vmem:[%s224_s1 + $0x30] ss:$8 sps:$4 sm:$0xff]   ;;  %v15_v9 = vld [vmem:[%s225_s0] sm:$0xff]  ;;  %v29_v13 = vshrl.u32 %v28_v12, 7 }
   0x4   :  { %84 = vmatprep.subr.bf16.mxu0 %v146_v3  ;;  %v16_v10 = vld [vmem:[%s225_s0 + $0x8] sm:$0xff]  ;;  %v26_v15 = vld [vmem:[%s226_s2] sm:$0x3] }
   0x5   :  { %v17_v11 = vpack.c.bf16 %v16_v10, %v15_v9  ;;  %v30_v14 = vsub.s32 0, %v29_v13  ;;  %v34_v16 = vsub.s32 1, %v29_v13 }
   0x7   :  { %85 = vmatpush1.bf16.msra.mxu0 %v148_v4  ;;  %v31_v17 = vrot.slane %v26_v15, %v30_v14  ;;  %v35_v18 = vrot.slane %v26_v15, %v34_v16 }
   0x8   :  { %86 = vmatprep.subr.bf16.mxu0 %v149_v5 }
   0xb   :  { %87 = vmatpush1.bf16.msra.mxu0 %v151_v6 }
   0xc   :  { %88 = vmatprep.subr.bf16.mxu0 %v152_v7 }
   0xf   :  { %89 = vmatpush1.bf16.msra.mxu0 %v154_v8 }
  0x12   :  { %141 = vmatmul.mubr.msk.bf16.vlgmr.msra.gmra.mrb[0].mxu0 %vm78_vm0, %v17_v11 }
  0xe5   :  { %v116_v19 = vpop.f32.mrb[0].mxu0 }
  0xe6   :  { %v117_v20 = vadd.f32 %v116_v19, %v31_v17  ;;  %v118_v21 = vpop.f32.mrb[1].mxu0 }
  0xe7   :  { %v119_v22 = vadd.f32 %v118_v21, %v35_v18  ;;  %v120_v23 = vpop.f32.mrb[2].mxu0 }
  0xe8   :  { %125 = vst [vmem:[%s227_s3] sm:$0xff] %v117_v20  ;;  %v121_v24 = vadd.f32 %v120_v23, %v31_v17  ;;  %v122_v25 = vpop.f32.mrb[3].mxu0 }
  0xe9   :  { %126 = vst.msk [vmem:[%s227_s3 + $0x8] sm:$0xff] %vm78_vm0, %v119_v22  ;;  %v123_v26 = vadd.f32 %v122_v25, %v35_v18 }
  0xea   :  { %127 = vst [vmem:[%s227_s3 + $0x10] sm:$0xff] %v121_v24 }
  0xeb   :  { %128 = vst.msk [vmem:[%s227_s3 + $0x18] sm:$0xff] %vm78_vm0, %v123_v26 }

// kernel: resonance_forward.9
= control target key start
LH: loop header
LB: loop body
LE: loop exit
PB: predicated region body
PF: predicated region fallthrough
CT: control target
= control target key end

     0   :  { %v172_v1 = vmov 0   ;;  %vm78_vm0 = vcmask 523264   ;;  %v28_v12 = vlaneseq  ;;  %vm137_vm1 = vcmask 1043456   ;;  %s232_s1 = inlined_call_operand.vmem [shape: bf16[64,192], index: 1, kind: input, shape index: {}]   ;;  %s233_s0 = inlined_call_operand.vmem [shape: f32[16,64], index: 0, kind: input, shape index: {}]   ;;  %s234_s2 = inlined_call_operand.vmem [shape: f32[1,192], index: 2, kind: input, shape index: {}]   ;;  %s235_s3 = inlined_call_operand.vmem [shape: bf16[16,192], index: 3, kind: output, shape index: {}]  }
   0x1   :  { %v160_v0 = vld [vmem:[%s232_s1 + $0x4] ss:$8 sps:$4 sm:$0xff]   ;;  %114 = vmatprep.mubr.bf16.mxu0 %v172_v1  ;;  %v162_v2 = vld [vmem:[%s232_s1] ss:$8 sps:$4 sm:$0xff]   ;;  %v163_v3 = vld [vmem:[%s232_s1 + $0x14] ss:$8 sps:$4 sm:$0xff]  }
   0x2   :  { %82 = vmatprep.subr.bf16.mxu0 %v160_v0  ;;  %v165_v4 = vld [vmem:[%s232_s1 + $0x10] ss:$8 sps:$4 sm:$0xff]   ;;  %v166_v5 = vld [vmem:[%s232_s1 + $0x24] ss:$8 sps:$4 sm:$0xff]   ;;  %v168_v6 = vld [vmem:[%s232_s1 + $0x20] ss:$8 sps:$4 sm:$0xff]  }
   0x3   :  { %83 = vmatpush1.bf16.msra.mxu0 %v162_v2  ;;  %v169_v7 = vld [vmem:[%s232_s1 + $0x34] ss:$8 sps:$4 sm:$0xff]   ;;  %v171_v8 = vld [vmem:[%s232_s1 + $0x30] ss:$8 sps:$4 sm:$0xff]   ;;  %v15_v9 = vld [vmem:[%s233_s0] sm:$0xff]  ;;  %v29_v13 = vshrl.u32 %v28_v12, 7 }
   0x4   :  { %84 = vmatprep.subr.bf16.mxu0 %v163_v3  ;;  %v16_v10 = vld [vmem:[%s233_s0 + $0x8] sm:$0xff]  ;;  %v26_v15 = vld [vmem:[%s234_s2] sm:$0x3]  ;;  %vm138_vm2 = vcmask 523268  }
   0x5   :  { %v17_v11 = vpack.c.bf16 %v16_v10, %v15_v9  ;;  %v30_v14 = vsub.s32 0, %v29_v13  ;;  %v34_v16 = vsub.s32 1, %v29_v13  ;;  %vm139_vm3 = vmor %vm138_vm2, %vm137_vm1 }
   0x7   :  { %85 = vmatpush1.bf16.msra.mxu0 %v165_v4  ;;  %v31_v17 = vrot.slane %v26_v15, %v30_v14  ;;  %v35_v18 = vrot.slane %v26_v15, %v34_v16 }
   0x8   :  { %86 = vmatprep.subr.bf16.mxu0 %v166_v5 }
   0xb   :  { %87 = vmatpush1.bf16.msra.mxu0 %v168_v6 }
   0xc   :  { %88 = vmatprep.subr.bf16.mxu0 %v169_v7 }
   0xf   :  { %89 = vmatpush1.bf16.msra.mxu0 %v171_v8 }
  0x12   :  { %154 = vmatmul.mubr.msk.bf16.vlgmr.msra.gmra.mrb[0].mxu0 %vm78_vm0, %v17_v11 }
  0xe5   :  { %v116_v19 = vpop.f32.mrb[0].mxu0 }
  0xe6   :  { %v117_v20 = vadd.f32 %v116_v19, %v31_v17  ;;  %v118_v21 = vpop.f32.mrb[1].mxu0 }
  0xe7   :  { %v119_v22 = vadd.f32 %v118_v21, %v35_v18  ;;  %v120_v23 = vpop.f32.mrb[2].mxu0 }
  0xe8   :  { %v121_v24 = vadd.f32 %v120_v23, %v31_v17  ;;  %v122_v25 = vpop.f32.mrb[3].mxu0 }
  0xe9   :  { %v157_v26 = vpack.c.bf16 %v119_v22, %v117_v20  ;;  %v123_v27 = vadd.f32 %v122_v25, %v35_v18 }
  0xeb   :  { %140 = vst.msk [vmem:[%s235_s3] sm:$0xff] %vm139_vm3, %v157_v26  ;;  %v158_v28 = vpack.c.bf16 %v123_v27, %v121_v24 }
  0xed   :  { %141 = vst.msk [vmem:[%s235_s3 + $0x8] sm:$0xff] %vm139_vm3, %v158_v28 }

// kernel: resonance_forward.10
= control target key start
LH: loop header
LB: loop body
LE: loop exit
PB: predicated region body
PF: predicated region fallthrough
CT: control target
= control target key end

     0   :  { %s618_s12 = smov 0   ;;  %s657_s0 = inlined_call_operand.vmem [shape: bf16[2,2,8,32], index: 0, kind: input, shape index: {}]   ;;  %s658_s1 = inlined_call_operand.vmem [shape: bf16[2,2,8,32], index: 1, kind: input, shape index: {}]   ;;  %s659_s2 = inlined_call_operand.vmem [shape: bf16[2,2,8,32], index: 2, kind: input, shape index: {}]   ;;  %s660_s3 = inlined_call_operand.vmem [shape: bf16[2,2,8,32], index: 3, kind: output, shape index: {}]  }
   0x1 LB: > { %s515_s13 = sadd.s32 4294967295, %s594_s12   ;;  %p519_p0 = scmp.ge.s32.totalorder %s594_s12, 1  ;;  %s594_s12 = sphi %s618_s12, %s13_s12  }
   0x2   : > { %p157_p1 = scmp.lt.s32.totalorder %s594_s12, 3 }
   0x4   : > { %p158_p2 = pnand %p519_p0, %p157_p1 }
   0x5   : > { %p191_p3 = scmp.lt.s32.totalorder (!%p158_p2), %s515_s13, 1  ;;  %v596_v0 = vmov (!%p158_p2), 0.0   ;;  %vm597_vm0 = vmmov (!%p158_p2), 0   ;;  %vm218_vm1 = vcmask (!%p158_p2), 261120   ;;  %vm313_vm2 = vcmask (!%p158_p2), 64512  }
   0x6   : > { %161 = sbr.rel (%p158_p2) target bundleno = 774 (0x306), region = 32  ;;  %546 = vmatprep.subr.bf16.mxu0 (!%p158_p2), %v596_v0  ;;  %552 = vmatprep.subr.bf16.mxu1 (!%p158_p2), %v596_v0  ;;  %vm341_vm3 = vcmask (!%p158_p2), 1043456   ;;  %vm433_vm4 = vcmask (!%p158_p2), 257024  }
   0x7   : > { %548 = vmatprep.mubr.msk.bf16.mxu0 (!%p158_p2), %vm597_vm0, %v596_v0  ;;  %554 = vmatprep.mubr.msk.bf16.mxu1 (!%p158_p2), %vm597_vm0, %v596_v0 }
   0xd   : > { %s662_s13 = smov (!%p191_p3, %s515_s13), 1 }
   0xe   : > { %s628_s14 = sshll.u32 %s662_s13, 3 }
   0xf   : > { %s200_s17 = scalar_lea.vmem %s658_s1, %s628_s14  ;;  %s195_s20 = scalar_lea.vmem %s657_s0, %s628_s14 }
  0x10   : > { %v214_v1 = vld [vmem:[%s200_s17] sm:$0xf]  ;;  %v215_v2 = vld [vmem:[%s200_s17 + $0x4] sm:$0xf]  ;;  %s205_s23 = scalar_lea.vmem %s659_s2, %s628_s14  ;;  %s210_s26 = scalar_lea.vmem %s660_s3, %s628_s14 }
  0x11   : > { %v223_v3 = vsel %vm218_vm1, %v214_v1, 0  ;;  %v269_v4 = vsel %vm218_vm1, %v215_v2, 0  ;;  %v212_v5 = vld [vmem:[%s195_s20] sm:$0xf]  ;;  %v213_v6 = vld [vmem:[%s195_s20 + $0x4] sm:$0xf] }
  0x12   : > { %547 = vmatpush3.bf16.xpose.msra.mxu0 %v223_v3  ;;  %553 = vmatpush3.bf16.xpose.msra.mxu1 %v269_v4  ;;  %v216_v29 = vld [vmem:[%s205_s23] sm:$0xf]  ;;  %v217_v31 = vld [vmem:[%s205_s23 + $0x4] sm:$0xf] }
  0x13   : > { %558 = vmatprep.subr.bf16.mxu0 %v596_v0  ;;  %564 = vmatprep.subr.bf16.mxu1 %v596_v0  ;;  %v343_v30 = vsel %vm341_vm3, %v216_v29, 0  ;;  %v389_v32 = vsel %vm341_vm3, %v217_v31, 0 }
  0x19   : > { %549 = vmatmul.mubr.msk.bf16.vlgmr.msra.gmra.mrb[0].mxu0 %vm218_vm1, %v212_v5  ;;  %555 = vmatmul.mubr.msk.bf16.vlgmr.msra.gmra.mrb[0].mxu1 %vm218_vm1, %v213_v6 }
  0x1a   : > { %560 = vmatprep.mubr.msk.bf16.mxu0 %vm597_vm0, %v596_v0  ;;  %566 = vmatprep.mubr.msk.bf16.mxu1 %vm597_vm0, %v596_v0 }
  0x1b   : > { %559 = vmatpush3.bf16.msra.mxu0 %v343_v30  ;;  %565 = vmatpush3.bf16.msra.mxu1 %v389_v32 }
  0xec   : > { %v259_v7 = vpop.f32.mrb[0].mxu0  ;;  %v305_v8 = vpop.f32.mrb[0].mxu1 }
  0xed   : > { %v311_v9 = vmul.f32 0.17677669, %v259_v7  ;;  %v550_v10 = vpop.f32.mrb[1].mxu0  ;;  %v312_v11 = vmul.f32 0.17677669, %v305_v8  ;;  %v556_v12 = vpop.f32.mrb[1].mxu1 }
  0xee   : > { %v262_v13 = vpop.f32.mrb[2].mxu0  ;;  %v308_v14 = vpop.f32.mrb[2].mxu1 }
  0xef   : > { %v551_v15 = vpop.f32.mrb[3].mxu0  ;;  %v557_v16 = vpop.f32.mrb[3].mxu1  ;;  %v314_v17 = vsel %vm313_vm2, %v311_v9, -inf  ;;  %v317_v18 = vsel %vm313_vm2, %v312_v11, -inf }
  0xf0   : > { %315 = vmax.xlane.f32.xlu0 %v314_v17 }
  0xf4   : > { %318 = vmax.xlane.f32.xlu0 %v317_v18 }
 0x17d   : > { %v316_v19 = vpop.xlane.xlu0 %315 }
 0x17e   : > { %v320_v20 = vsub.f32 %v311_v9, %v316_v19 }
 0x180   : > { %v322_v21 = vmul.f32 1.442695, %v320_v20 }
 0x181   : > { %v319_v22 = vpop.xlane.xlu0 %318 }
 0x182   : > { %580 = vpow2.f32 %v322_v21  ;;  %v321_v23 = vsub.f32 %v312_v11, %v319_v22 }
 0x184   : > { %v324_v24 = vmul.f32 1.442695, %v321_v23 }
 0x186   : > { %582 = vpow2.f32 %v324_v24 }
 0x18c   : > { %v581_v25 = vpop.eup %580 }
 0x18d   : > { %v326_v26 = vsel %vm313_vm2, %v581_v25, 0.0 }
 0x18e   : > { %327 = vadd.xlane.f32.xlu1 %v326_v26 }
 0x190   : > { %v583_v27 = vpop.eup %582 }
 0x191   : > { %v329_v28 = vsel %vm313_vm2, %v583_v27, 0.0 }
 0x192   : > { %330 = vadd.xlane.f32.xlu1 %v329_v28 }
 0x21b   : > { %v328_v33 = vpop.xlane.xlu1 %327 }
 0x21c   : > { %584 = vrcp.f32 %v328_v33 }
 0x21f   : > { %v331_v34 = vpop.xlane.xlu1 %330 }
 0x220   : > { %586 = vrcp.f32 %v331_v34 }
 0x226   : > { %v585_v35 = vpop.eup %584 }
 0x227   : > { %v334_v36 = vmul.f32 %v585_v35, %v581_v25 }
 0x229   : > { %v336_v37 = vpack.c.bf16 %v334_v36, %v334_v36 }
 0x22a   : > { %v587_v38 = vpop.eup %586 }
 0x22b   : > { %v335_v39 = vmul.f32 %v587_v38, %v583_v27  ;;  %561 = vmatmul.mubr.msk.bf16.vlgmr.msra.gmra.mrb[4].mxu0 %vm313_vm2, %v336_v37 }
 0x22d   : > { %v337_v40 = vpack.c.bf16 %v335_v39, %v335_v39 }
 0x22f   : > { %567 = vmatmul.mubr.msk.bf16.vlgmr.msra.gmra.mrb[4].mxu1 %vm313_vm2, %v337_v40 }
 0x2fe   : > { %v379_v41 = vpop.f32.mrb[4].mxu0 }
 0x2ff   : > { %v431_v42 = vpack.c.bf16 %v379_v41, %v379_v41  ;;  %v562_v43 = vpop.f32.mrb[5].mxu0 }
 0x300   : > { %v382_v44 = vpop.f32.mrb[6].mxu0 }
 0x301   : > { %434 = vst.msk [vmem:[%s210_s26] sm:$0xf] %vm433_vm4, %v431_v42  ;;  %v563_v45 = vpop.f32.mrb[7].mxu0 }
 0x302   : > { %v425_v46 = vpop.f32.mrb[4].mxu1 }
 0x303   : > { %v432_v47 = vpack.c.bf16 %v425_v46, %v425_v46  ;;  %v568_v48 = vpop.f32.mrb[5].mxu1 }
 0x304   : > { %v428_v49 = vpop.f32.mrb[6].mxu1 }
 0x305   : > { %435 = vst.msk [vmem:[%s210_s26 + $0x4] sm:$0xf] %vm433_vm4, %v432_v47  ;;  %v569_v50 = vpop.f32.mrb[7].mxu1 }
 0x306 PF: > { %s13_s12 = sadd.s32 1, %s594_s12  }
 0x307   : > { %p10_p4 = scmp.ge.s32.totalorder %s13_s12, 4  }
 0x309   :  { %12 = sbr.rel (!%p10_p4) target bundleno = 1 (0x1), region = 68 }

// kernel: resonance_forward.8
= control target key start
LH: loop header
LB: loop body
LE: loop exit
PB: predicated region body
PF: predicated region fallthrough
CT: control target
= control target key end

     0   :  { %12 = vsyncpa [#allocation3], 0  ;;  %s2044_s0 = inlined_call_operand.vmem [shape: f32[2,8,2,96], index: 0, kind: input, shape index: {}]   ;;  %s2045_s1 = inlined_call_operand.vmem [shape: f32[8,2,1], index: 1, kind: input, shape index: {}]   ;;  %s2046_s2 = inlined_call_operand.vmem [shape: f32[2,2,32], index: 2, kind: input, shape index: {}]   ;;  %s2047_s3 = inlined_call_operand.vmem [shape: bf16[2,32,96], index: 3, kind: input, shape index: {}]   ;;  %s2048_s4 = inlined_call_operand.vmem [shape: f32[2,1,96], index: 4, kind: input, shape index: {}]   ;;  %s2049_s5 = inlined_call_operand.vmem [shape: f32[2,8,2,32], index: 5, kind: output, shape index: {0}]   ;;  %s2050_s6 = inlined_call_operand.hbm [shape: f32[2,2,32], index: 6, kind: output, shape index: {1}]  }
   0x1   :  { %14 = vsyncpa [#allocation3 + $0x1], 0  ;;  %s1681_s21 = smov 0   ;;  %s1683_s22 = smov 0  }
   0x2   :  { %s1685_s23 = smov 0   ;;  %s1687_s24 = smov 0  }
   0x3 LB: > { %s1702_s25 = sadd.s32 4294967295, %s1638_s24   ;;  %s1346_s26 = sadd.s32 4294967294, %s1638_s24   ;;  %s1638_s24 = sphi %s1687_s24, %s2056_s24   ;;  %s1634_s23 = sphi %s1685_s23, %s2055_s23   ;;  %s1630_s22 = sphi %s1683_s22, %s2054_s22   ;;  %s1626_s21 = sphi %s1681_s21, %s2053_s21  }
   0x4   : > { %s1706_s27 = sadd.s32 1, %s1638_s24   ;;  %s178_s28 = sadd.s32 1, %s1634_s23 }
   0x5   : > { %s175_s29 = ssub.s32 %s1638_s24, %s1706_s27  ;;  %p188_p0 = scmp.ne.s32.totalorder %s1634_s23, %s1630_s22 }
   0x6   : > { %p176_p1 = scmp.eq.s32.totalorder %s175_s29, 0  ;;  %p189_p2 = scmp.eq.s32.totalorder %s1702_s25, 1 }
   0x7   : > { %p194_p3 = scmp.ne.s32.totalorder %s1630_s22, %s1626_s21  ;;  %p195_p4 = scmp.eq.s32.totalorder %s1346_s26, 1 }
   0x8   : > { %s1717_s30 = scalar_select %p176_p1, %s1634_s23, %s178_s28  }
   0x9   : > { %p1719_p5 = por %p189_p2, %p188_p0  ;;  %p1723_p6 = por %p195_p4, %p194_p3 }
   0xa   : > { %p1349_p7 = scmp.ge.s32.totalorder %s1638_s24, 1  ;;  %p245_p8 = scmp.lt.s32.totalorder %s1638_s24, 3 }
   0xc   : > { %p246_p9 = pnand %p1349_p7, %p245_p8 }
   0xd   : > { %p292_p10 = scmp.lt.s32.totalorder (!%p246_p9), %s1702_s25, 1  ;;  %v1640_v0 = vmov (!%p246_p9), 0.0   ;;  %vm1641_vm0 = vmmov (!%p246_p9), 0   ;;  %vm347_vm1 = vcmask (!%p246_p9), 261120   ;;  %s1642_s26 = smov (!%p246_p9), 64   ;;  %v1643_v21 = vmov (!%p246_p9), 0  }
   0xe   : > { %249 = sbr.rel (%p246_p9) target bundleno = 7511 (0x1d57), region = 40  ;;  %1416 = vmatprep.subr.bf16.mxu0 (!%p246_p9), %v1640_v0  ;;  %1420 = vmatprep.mubr.msk.bf16.mxu0 (!%p246_p9), %vm1641_vm0, %v1640_v0  ;;  %p321_p11 = scmp.eq.s32.totalorder (!%p246_p9), %s1702_s25, 0  ;;  %vm442_vm2 = vcmask (!%p246_p9), 254976  }
   0xf   : > { %1424 = vmatprep.subr.bf16.mxu1 (!%p246_p9), %v1640_v0  ;;  %1428 = vmatprep.mubr.msk.bf16.mxu1 (!%p246_p9), %vm1641_vm0, %v1640_v0 }
  0x10   : > { %1524 = vset.pattern.permute.xlu0 (!%p246_p9), %v1643_v21  ;;  %1525 = vset.pattern.permute.xlu1 (!%p246_p9), %v1643_v21 }
  0x15   : > { %s293_s9 = scalar_select %p292_p10, %s1702_s25, 1 }
  0x16   : > { %s322_s28 = scalar_select %p321_p11, 0, 7 }
  0x17   : > { %s1737_s10 = sshll.u32 %s293_s9, 4  ;;  %s1353_s11 = sshll.u32 %s293_s9, 1 }
  0x18   : > { %s305_s14 = scalar_lea.vmem %s2047_s3, %s1737_s10  ;;  %s300_s17 = scalar_lea.vmem %s2046_s2, %s1353_s11 }
  0x19   : > { %v1746_v1 = vld [vmem:[%s305_s14] sm:$0xff]   ;;  %v1749_v2 = vld [vmem:[%s305_s14 + $0x8] sm:$0xff]   ;;  %s308_s20 = scalar_lea.vmem %s2048_s4, %s293_s9  ;;  %s1783_s12 = scalar_lea.vmem %s2044_s0, %s1737_s10 }
  0x1a   : > { %1417 = vmatpush3.bf16.msra.mxu0 %v1746_v1  ;;  %v1751_v3 = vld [vmem:[%s300_s17] sm:$0x3]  ;;  %1425 = vmatpush3.bf16.msra.mxu1 %v1746_v1  ;;  %s1785_s9 = sshll.u32 %s322_s28, 1  ;;  %s1644_s17 = smov 32  }
  0x1b   : > { %1418 = vmatprep.subr.bf16.mxu0 %v1640_v0  ;;  %1426 = vmatprep.subr.bf16.mxu1 %v1640_v0  ;;  %v328_v4 = vpack.c.bf16 %v1751_v3, %v1751_v3  ;;  %v1772_v5 = vld [vmem:[%s308_s20] ss:$0 sm:$0xff]  ;;  %s324_s13 = scalar_lea.vmem %s1783_s12, %s1785_s9  ;;  %s326_s16 = scalar_lea.vmem %s2045_s1, %s1785_s9 }
  0x1c   : > { %v325_v11 = vld [vmem:[%s324_s13] sm:$0x3]  ;;  %s1805_s20 = scalar_lea.vmem %s2049_s5, %s1737_s10 }
  0x1d   : > { %v327_v22 = vld [vmem:[%s326_s16] sm:$0x3]  ;;  %s441_s28 = scalar_lea.vmem %s1805_s20, %s1785_s9 }
  0x1e   : > { %1419 = vmatpush3.bf16.msra.mxu0 %v1749_v2  ;;  %1427 = vmatpush3.bf16.msra.mxu1 %v1749_v2  ;;  %s444_s10 = scalar_select %p321_p11, 1, 6 }
  0x1f   : > { %1432 = vmatprep.subr.bf16.mxu0 %v1640_v0  ;;  %1440 = vmatprep.subr.bf16.mxu1 %v1640_v0  ;;  %s546_s16 = scalar_select %p321_p11, 2, 5 }
  0x20   : > { %s1822_s29 = sshll.u32 %s444_s10, 1 }
  0x21   : > { %1421 = vmatmul.mubr.msk.bf16.vlgmr.msra.gmra.mrb[0].mxu0 %vm347_vm1, %v328_v4  ;;  %s446_s11 = scalar_lea.vmem %s1783_s12, %s1822_s29  ;;  %s448_s14 = scalar_lea.vmem %s2045_s1, %s1822_s29 }
  0x22   : > { %1433 = vmatpush3.bf16.msra.mxu0 %v1746_v1  ;;  %1436 = vmatprep.mubr.msk.bf16.mxu0 %vm1641_vm0, %v1640_v0  ;;  %v447_v43 = vld [vmem:[%s446_s11] sm:$0x3]  ;;  %s544_s15 = scalar_lea.vmem %s1805_s20, %s1822_s29  ;;  %s1850_s18 = sshll.u32 %s546_s16, 1 }
  0x23   : > { %1434 = vmatprep.subr.bf16.mxu0 %v1640_v0  ;;  %v449_v54 = vld [vmem:[%s448_s14] sm:$0x3]  ;;  %s548_s19 = scalar_lea.vmem %s1783_s12, %s1850_s18  ;;  %s550_s29 = scalar_lea.vmem %s2045_s1, %s1850_s18 }
  0x24   : > { %s646_s11 = scalar_lea.vmem %s1805_s20, %s1850_s18 }
  0x25   : > { %s648_s9 = scalar_select %p321_p11, 3, 4 }
  0x26   : > { %1435 = vmatpush3.bf16.msra.mxu0 %v1749_v2 }
  0x27   : > { %1448 = vmatprep.subr.bf16.mxu0 %v1640_v0  ;;  %s1878_s13 = sshll.u32 %s648_s9, 1 }
  0x28   : > { %s650_s14 = scalar_lea.vmem %s1783_s12, %s1878_s13  ;;  %s652_s18 = scalar_lea.vmem %s2045_s1, %s1878_s13 }
  0xf4   : > { %v385_v6 = vpop.f32.mrb[0].mxu0 }
  0xf5   : > { %v386_v7 = vadd.f32 %v1772_v5, %v385_v6  ;;  %v1422_v8 = vpop.f32.mrb[1].mxu0 }
  0xf6   : > { %v388_v9 = vpop.f32.mrb[2].mxu0 }
  0xf7   : > { %399 = vrot.lane.b32.xlu0 %v386_v7, %s1642_s26  ;;  %v1423_v10 = vpop.f32.mrb[3].mxu0  ;;  %v391_v12 = vadd.f32 %v386_v7, %v325_v11 }
  0xf9   : > { %v1363_v13 = vmul.f32 -1.442695, %v391_v12 }
  0xfb   : > { %1528 = vpow2.f32 %v1363_v13 }
 0x105   : > { %v1529_v14 = vpop.eup %1528 }
 0x106   : > { %v395_v15 = vadd.f32 1.0, %v1529_v14  ;;  %v549_v14 = vld [vmem:[%s548_s19] sm:$0x3]  ;;  %s748_s19 = scalar_lea.vmem %s1805_s20, %s1878_s13 }
 0x108   : > { %1530 = vrcp.f32 %v395_v15 }
 0x112   : > { %v1531_v16 = vpop.eup %1530 }
 0x169   : > { %v400_v17 = vpop.permute.xlu0 %399 }
 0x16a   : > { %v402_v18 = vmul.f32 %v1531_v16, %v400_v17 }
 0x16c   : > { %404 = vrot.lane.b32.xlu0 %v402_v18, %s1642_s26 }
 0x170   : > { %431 = vperm.xlu0 %1524, %v327_v22  }
 0x1de   : > { %v405_v19 = vpop.permute.xlu0 %404 }
 0x1df   : > { %v407_v20 = vadd.f32 %v405_v19, %v325_v11 }
 0x1e1   : > { %1532 = vtanh.f32 %v407_v20 }
 0x1eb   : > { %v1533_v23 = vpop.eup %1532 }
 0x1ec   : > { %410 = vrot.lane.b32.xlu1 %v1533_v23, %s1642_s26 }
 0x1ef   : > { %v432_v31 = vpop.permute.xlu0 %431 }
 0x25e   : > { %v411_v24 = vpop.permute.xlu1 %410 }
 0x25f   : > { %v413_v25 = vsub.f32 %v1751_v3, %v411_v24 }
 0x261   : > { %415 = vrot.lane.b32.xlu1 %v413_v25, %s1644_s17  ;;  %v551_v25 = vld [vmem:[%s550_s29] sm:$0x3] }
 0x2d3   : > { %v416_v26 = vpop.permute.xlu1 %415 }
 0x2d4   : > { %v418_v27 = vmul.f32 %v1531_v16, %v416_v26 }
 0x2d6   : > { %420 = vrot.lane.b32.xlu1 %v418_v27, %s1644_s17 }
 0x2da   : > { %425 = vrot.lane.b32.xlu1 %v1751_v3, %s1642_s26 }
 0x348   : > { %v421_v28 = vpop.permute.xlu1 %420 }
 0x349   : > { %v423_v29 = vadd.f32 %v1533_v23, %v421_v28 }
 0x34c   : > { %v426_v30 = vpop.permute.xlu1 %425 }
 0x34d   : > { %v428_v32 = vsub.f32 %v423_v29, %v426_v30 }
 0x34f   : > { %v434_v33 = vmul.f32 %v432_v31, %v428_v32 }
 0x351   : > { %436 = vrot.lane.b32.xlu0 %v434_v33, %s1642_s26 }
 0x3c3   : > { %v437_v34 = vpop.permute.xlu0 %436 }
 0x3c4   : > { %v439_v35 = vadd.f32 %v437_v34, %v1751_v3 }
 0x3c6   : > { %v440_v36 = vmul.f32 %v439_v35, %v432_v31  ;;  %v450_v37 = vpack.c.bf16 %v439_v35, %v439_v35 }
 0x3c8   : > { %443 = vst.msk [vmem:[%s441_s28] sm:$0x3] %vm442_vm2, %v440_v36  ;;  %1429 = vmatmul.mubr.msk.bf16.vlgmr.msra.gmra.mrb[0].mxu1 %vm347_vm1, %v450_v37  ;;  %s750_s28 = scalar_select %p321_p11, 4, 3 }
 0x3c9   : > { %1441 = vmatpush3.bf16.msra.mxu1 %v1746_v1  ;;  %1444 = vmatprep.mubr.msk.bf16.mxu1 %vm1641_vm0, %v1640_v0 }
 0x3ca   : > { %1442 = vmatprep.subr.bf16.mxu1 %v1640_v0  ;;  %s1905_s10 = sshll.u32 %s750_s28, 1 }
 0x3cb   : > { %s752_s29 = scalar_lea.vmem %s1783_s12, %s1905_s10  ;;  %s754_s13 = scalar_lea.vmem %s2045_s1, %s1905_s10 }
 0x3cd   : > { %1443 = vmatpush3.bf16.msra.mxu1 %v1749_v2 }
 0x3ce   : > { %1456 = vmatprep.subr.bf16.mxu1 %v1640_v0 }
 0x49b   : > { %v488_v38 = vpop.f32.mrb[0].mxu1 }
 0x49c   : > { %v489_v39 = vadd.f32 %v1772_v5, %v488_v38  ;;  %v1430_v40 = vpop.f32.mrb[1].mxu1 }
 0x49d   : > { %v491_v41 = vpop.f32.mrb[2].mxu1 }
 0x49e   : > { %502 = vrot.lane.b32.xlu1 %v489_v39, %s1642_s26  ;;  %v1431_v42 = vpop.f32.mrb[3].mxu1  ;;  %v494_v44 = vadd.f32 %v489_v39, %v447_v43 }
 0x4a0   : > { %v1366_v45 = vmul.f32 -1.442695, %v494_v44 }
 0x4a2   : > { %1534 = vpow2.f32 %v1366_v45  ;;  %v651_v45 = vld [vmem:[%s650_s14] sm:$0x3]  ;;  %s850_s14 = scalar_lea.vmem %s1805_s20, %s1905_s10 }
 0x4ac   : > { %v1535_v46 = vpop.eup %1534 }
 0x4ad   : > { %v498_v47 = vadd.f32 1.0, %v1535_v46 }
 0x4af   : > { %1536 = vrcp.f32 %v498_v47 }
 0x4b9   : > { %v1537_v48 = vpop.eup %1536 }
 0x510   : > { %v503_v49 = vpop.permute.xlu1 %502 }
 0x511   : > { %v505_v50 = vmul.f32 %v1537_v48, %v503_v49 }
 0x513   : > { %507 = vrot.lane.b32.xlu0 %v505_v50, %s1642_s26 }
 0x585   : > { %v508_v51 = vpop.permute.xlu0 %507 }
 0x586   : > { %v510_v52 = vadd.f32 %v508_v51, %v447_v43 }
 0x588   : > { %1538 = vtanh.f32 %v510_v52 }
 0x592   : > { %v1539_v53 = vpop.eup %1538 }
 0x593   : > { %513 = vrot.lane.b32.xlu1 %v1539_v53, %s1642_s26 }
 0x597   : > { %534 = vperm.xlu1 %1525, %v449_v54  }
 0x59b   : > { %528 = vrot.lane.b32.xlu1 %v439_v35, %s1642_s26 }
 0x605   : > { %v514_v55 = vpop.permute.xlu1 %513 }
 0x606   : > { %v516_v56 = vsub.f32 %v439_v35, %v514_v55 }
 0x608   : > { %518 = vrot.lane.b32.xlu0 %v516_v56, %s1644_s17  ;;  %v653_v56 = vld [vmem:[%s652_s18] sm:$0x3] }
 0x616   : > { %v535_v59 = vpop.permute.xlu1 %534 }
 0x61a   : > { %v529_v62 = vpop.permute.xlu1 %528 }
 0x67a   : > { %v519_v57 = vpop.permute.xlu0 %518 }
 0x67b   : > { %v521_v58 = vmul.f32 %v1537_v48, %v519_v57 }
 0x67d   : > { %523 = vrot.lane.b32.xlu0 %v521_v58, %s1644_s17 }
 0x6ef   : > { %v524_v60 = vpop.permute.xlu0 %523 }
 0x6f0   : > { %v526_v61 = vadd.f32 %v1539_v53, %v524_v60 }
 0x6f2   : > { %v531_v63 = vsub.f32 %v526_v61, %v529_v62 }
 0x6f4   : > { %v537_v3 = vmul.f32 %v535_v59, %v531_v63 }
 0x6f6   : > { %539 = vrot.lane.b32.xlu0 %v537_v3, %s1642_s26 }
 0x768   : > { %v540_v4 = vpop.permute.xlu0 %539 }
 0x769   : > { %v542_v6 = vadd.f32 %v540_v4, %v439_v35 }
 0x76b   : > { %v543_v7 = vmul.f32 %v542_v6, %v535_v59  ;;  %v552_v8 = vpack.c.bf16 %v542_v6, %v542_v6 }
 0x76d   : > { %545 = vst.msk [vmem:[%s544_s15] sm:$0x3] %vm442_vm2, %v543_v7  ;;  %1437 = vmatmul.mubr.msk.bf16.vlgmr.msra.gmra.mrb[4].mxu0 %vm347_vm1, %v552_v8  ;;  %s852_s15 = scalar_select %p321_p11, 5, 2 }
 0x76e   : > { %1449 = vmatpush3.bf16.msra.mxu0 %v1746_v1  ;;  %1452 = vmatprep.mubr.msk.bf16.mxu0 %vm1641_vm0, %v1640_v0 }
 0x76f   : > { %1450 = vmatprep.subr.bf16.mxu0 %v1640_v0  ;;  %s1932_s16 = sshll.u32 %s852_s15, 1 }
 0x770   : > { %s854_s18 = scalar_lea.vmem %s1783_s12, %s1932_s16  ;;  %s856_s10 = scalar_lea.vmem %s2045_s1, %s1932_s16 }
 0x772   : > { %1451 = vmatpush3.bf16.msra.mxu0 %v1749_v2 }
 0x773   : > { %1464 = vmatprep.subr.bf16.mxu0 %v1640_v0 }
 0x840   : > { %v590_v9 = vpop.f32.mrb[4].mxu0 }
 0x841   : > { %v591_v10 = vadd.f32 %v1772_v5, %v590_v9  ;;  %v1438_v11 = vpop.f32.mrb[5].mxu0 }
 0x842   : > { %v593_v12 = vpop.f32.mrb[6].mxu0 }
 0x843   : > { %604 = vrot.lane.b32.xlu1 %v591_v10, %s1642_s26  ;;  %v1439_v13 = vpop.f32.mrb[7].mxu0  ;;  %v596_v15 = vadd.f32 %v591_v10, %v549_v14 }
 0x845   : > { %v1369_v16 = vmul.f32 -1.442695, %v596_v15 }
 0x847   : > { %1540 = vpow2.f32 %v1369_v16  ;;  %v753_v16 = vld [vmem:[%s752_s29] sm:$0x3]  ;;  %s952_s29 = scalar_lea.vmem %s1805_s20, %s1932_s16 }
 0x851   : > { %v1541_v17 = vpop.eup %1540 }
 0x852   : > { %v600_v18 = vadd.f32 1.0, %v1541_v17 }
 0x854   : > { %1542 = vrcp.f32 %v600_v18 }
 0x85e   : > { %v1543_v19 = vpop.eup %1542 }
 0x8b5   : > { %v605_v20 = vpop.permute.xlu1 %604 }
 0x8b6   : > { %v607_v21 = vmul.f32 %v1543_v19, %v605_v20 }
 0x8b8   : > { %609 = vrot.lane.b32.xlu0 %v607_v21, %s1642_s26 }
 0x92a   : > { %v610_v22 = vpop.permute.xlu0 %609 }
 0x92b   : > { %v612_v23 = vadd.f32 %v610_v22, %v549_v14 }
 0x92d   : > { %1544 = vtanh.f32 %v612_v23 }
 0x937   : > { %v1545_v24 = vpop.eup %1544 }
 0x938   : > { %615 = vrot.lane.b32.xlu1 %v1545_v24, %s1642_s26 }
 0x93c   : > { %636 = vperm.xlu1 %1525, %v551_v25  }
 0x940   : > { %630 = vrot.lane.b32.xlu1 %v542_v6, %s1642_s26 }
 0x9aa   : > { %v616_v26 = vpop.permute.xlu1 %615 }
 0x9ab   : > { %v618_v27 = vsub.f32 %v542_v6, %v616_v26 }
 0x9ad   : > { %620 = vrot.lane.b32.xlu0 %v618_v27, %s1644_s17  ;;  %v755_v27 = vld [vmem:[%s754_s13] sm:$0x3] }
 0x9bb   : > { %v637_v30 = vpop.permute.xlu1 %636 }
 0x9bf   : > { %v631_v33 = vpop.permute.xlu1 %630 }
 0xa1f   : > { %v621_v28 = vpop.permute.xlu0 %620 }
 0xa20   : > { %v623_v29 = vmul.f32 %v1543_v19, %v621_v28 }
 0xa22   : > { %625 = vrot.lane.b32.xlu0 %v623_v29, %s1644_s17 }
 0xa94   : > { %v626_v31 = vpop.permute.xlu0 %625 }
 0xa95   : > { %v628_v32 = vadd.f32 %v1545_v24, %v626_v31 }
 0xa97   : > { %v633_v34 = vsub.f32 %v628_v32, %v631_v33 }
 0xa99   : > { %v639_v35 = vmul.f32 %v637_v30, %v633_v34 }
 0xa9b   : > { %641 = vrot.lane.b32.xlu0 %v639_v35, %s1642_s26 }
 0xb0d   : > { %v642_v36 = vpop.permute.xlu0 %641 }
 0xb0e   : > { %v644_v37 = vadd.f32 %v642_v36, %v542_v6 }
 0xb10   : > { %v645_v38 = vmul.f32 %v644_v37, %v637_v30  ;;  %v654_v39 = vpack.c.bf16 %v644_v37, %v644_v37 }
 0xb12   : > { %647 = vst.msk [vmem:[%s646_s11] sm:$0x3] %vm442_vm2, %v645_v38  ;;  %1445 = vmatmul.mubr.msk.bf16.vlgmr.msra.gmra.mrb[4].mxu1 %vm347_vm1, %v654_v39  ;;  %s954_s11 = scalar_select %p321_p11, 6, 1 }
 0xb13   : > { %1457 = vmatpush3.bf16.msra.mxu1 %v1746_v1  ;;  %1460 = vmatprep.mubr.msk.bf16.mxu1 %vm1641_vm0, %v1640_v0 }
 0xb14   : > { %1458 = vmatprep.subr.bf16.mxu1 %v1640_v0  ;;  %s1954_s9 = sshll.u32 %s954_s11, 1 }
 0xb15   : > { %s956_s13 = scalar_lea.vmem %s1783_s12, %s1954_s9  ;;  %s958_s16 = scalar_lea.vmem %s2045_s1, %s1954_s9 }
 0xb17   : > { %1459 = vmatpush3.bf16.msra.mxu1 %v1749_v2 }
 0xb18   : > { %1472 = vmatprep.subr.bf16.mxu1 %v1640_v0 }
 0xbe5   : > { %v692_v40 = vpop.f32.mrb[4].mxu1 }
 0xbe6   : > { %v693_v41 = vadd.f32 %v1772_v5, %v692_v40  ;;  %v1446_v42 = vpop.f32.mrb[5].mxu1 }
 0xbe7   : > { %v695_v43 = vpop.f32.mrb[6].mxu1 }
 0xbe8   : > { %706 = vrot.lane.b32.xlu1 %v693_v41, %s1642_s26  ;;  %v1447_v44 = vpop.f32.mrb[7].mxu1  ;;  %v698_v46 = vadd.f32 %v693_v41, %v651_v45 }
 0xbea   : > { %v1372_v47 = vmul.f32 -1.442695, %v698_v46 }
 0xbec   : > { %1546 = vpow2.f32 %v1372_v47 }
 0xbf6   : > { %v1547_v48 = vpop.eup %1546 }
 0xbf7   : > { %v702_v49 = vadd.f32 1.0, %v1547_v48 }
 0xbf9   : > { %1548 = vrcp.f32 %v702_v49 }
 0xc03   : > { %v1549_v50 = vpop.eup %1548 }
 0xc5a   : > { %v707_v51 = vpop.permute.xlu1 %706 }
 0xc5b   : > { %v709_v52 = vmul.f32 %v1549_v50, %v707_v51 }
 0xc5d   : > { %711 = vrot.lane.b32.xlu0 %v709_v52, %s1642_s26 }
 0xccf   : > { %v712_v53 = vpop.permute.xlu0 %711 }
 0xcd0   : > { %v714_v54 = vadd.f32 %v712_v53, %v651_v45 }
 0xcd2   : > { %1550 = vtanh.f32 %v714_v54 }
 0xcdc   : > { %v1551_v55 = vpop.eup %1550 }
 0xcdd   : > { %717 = vrot.lane.b32.xlu1 %v1551_v55, %s1642_s26 }
 0xce1   : > { %738 = vperm.xlu1 %1525, %v653_v56  }
 0xce5   : > { %732 = vrot.lane.b32.xlu1 %v644_v37, %s1642_s26 }
 0xd4f   : > { %v718_v57 = vpop.permute.xlu1 %717 }
 0xd50   : > { %v720_v58 = vsub.f32 %v644_v37, %v718_v57 }
 0xd52   : > { %722 = vrot.lane.b32.xlu0 %v720_v58, %s1644_s17 }
 0xd60   : > { %v739_v61 = vpop.permute.xlu1 %738 }
 0xd64   : > { %v733_v3 = vpop.permute.xlu1 %732 }
 0xdc4   : > { %v723_v59 = vpop.permute.xlu0 %722 }
 0xdc5   : > { %v725_v60 = vmul.f32 %v1549_v50, %v723_v59 }
 0xdc7   : > { %727 = vrot.lane.b32.xlu0 %v725_v60, %s1644_s17 }
 0xe39   : > { %v728_v62 = vpop.permute.xlu0 %727 }
 0xe3a   : > { %v730_v63 = vadd.f32 %v1551_v55, %v728_v62  ;;  %v857_v55 = vld [vmem:[%s856_s10] sm:$0x3] }
 0xe3c   : > { %v735_v4 = vsub.f32 %v730_v63, %v733_v3 }
 0xe3e   : > { %v741_v6 = vmul.f32 %v739_v61, %v735_v4 }
 0xe40   : > { %743 = vrot.lane.b32.xlu0 %v741_v6, %s1642_s26 }
 0xeb2   : > { %v744_v7 = vpop.permute.xlu0 %743 }
 0xeb3   : > { %v746_v8 = vadd.f32 %v744_v7, %v644_v37 }
 0xeb5   : > { %v747_v9 = vmul.f32 %v746_v8, %v739_v61  ;;  %v756_v10 = vpack.c.bf16 %v746_v8, %v746_v8 }
 0xeb7   : > { %749 = vst.msk [vmem:[%s748_s19] sm:$0x3] %vm442_vm2, %v747_v9  ;;  %1453 = vmatmul.mubr.msk.bf16.vlgmr.msra.gmra.mrb[8].mxu0 %vm347_vm1, %v756_v10  ;;  %s1056_s19 = scalar_select %p321_p11, 7, 0 }
 0xeb8   : > { %1465 = vmatpush3.bf16.msra.mxu0 %v1746_v1  ;;  %1468 = vmatprep.mubr.msk.bf16.mxu0 %vm1641_vm0, %v1640_v0 }
 0xeb9   : > { %1466 = vmatprep.subr.bf16.mxu0 %v1640_v0  ;;  %s1976_s28 = sshll.u32 %s1056_s19, 1 }
 0xeba   : > { %s1058_s10 = scalar_lea.vmem %s1783_s12, %s1976_s28  ;;  %s289_s12 = sand.u32 1, %s1630_s22  }
 0xebc   : > { %1467 = vmatpush3.bf16.msra.mxu0 %v1749_v2 }
 0xf8a   : > { %v794_v11 = vpop.f32.mrb[8].mxu0 }
 0xf8b   : > { %v795_v12 = vadd.f32 %v1772_v5, %v794_v11  ;;  %v1454_v13 = vpop.f32.mrb[9].mxu0 }
 0xf8c   : > { %v797_v14 = vpop.f32.mrb[10].mxu0 }
 0xf8d   : > { %808 = vrot.lane.b32.xlu1 %v795_v12, %s1642_s26  ;;  %v1455_v15 = vpop.f32.mrb[11].mxu0  ;;  %v800_v17 = vadd.f32 %v795_v12, %v753_v16 }
 0xf8e   : > { %v957_v15 = vld [vmem:[%s956_s13] sm:$0x3]  ;;  %s1350_s13 = sshll.u32 %s289_s12, 1 }
 0xf8f   : > { %v1375_v18 = vmul.f32 -1.442695, %v800_v17  ;;  %s291_s15 = scalar_lea.vmem [#allocation2], %s1350_s13 }
 0xf91   : > { %1552 = vpow2.f32 %v1375_v18 }
 0xf9b   : > { %v1553_v19 = vpop.eup %1552 }
 0xf9c   : > { %v804_v20 = vadd.f32 1.0, %v1553_v19 }
 0xf9e   : > { %1554 = vrcp.f32 %v804_v20 }
 0xfa8   : > { %v1555_v21 = vpop.eup %1554 }
 0xfff   : > { %v809_v22 = vpop.permute.xlu1 %808 }
0x1000   : > { %v811_v23 = vmul.f32 %v1555_v21, %v809_v22 }
0x1002   : > { %813 = vrot.lane.b32.xlu0 %v811_v23, %s1642_s26 }
0x1074   : > { %v814_v24 = vpop.permute.xlu0 %813 }
0x1075   : > { %v816_v25 = vadd.f32 %v814_v24, %v753_v16 }
0x1077   : > { %1556 = vtanh.f32 %v816_v25 }
0x1081   : > { %v1557_v26 = vpop.eup %1556 }
0x1082   : > { %819 = vrot.lane.b32.xlu1 %v1557_v26, %s1642_s26 }
0x1086   : > { %840 = vperm.xlu1 %1525, %v755_v27  }
0x108a   : > { %834 = vrot.lane.b32.xlu1 %v746_v8, %s1642_s26 }
0x10f4   : > { %v820_v28 = vpop.permute.xlu1 %819 }
0x10f5   : > { %v822_v29 = vsub.f32 %v746_v8, %v820_v28 }
0x10f7   : > { %824 = vrot.lane.b32.xlu0 %v822_v29, %s1644_s17 }
0x1105   : > { %v841_v32 = vpop.permute.xlu1 %840 }
0x1109   : > { %v835_v35 = vpop.permute.xlu1 %834 }
0x1169   : > { %v825_v30 = vpop.permute.xlu0 %824 }
0x116a   : > { %v827_v31 = vmul.f32 %v1555_v21, %v825_v30 }
0x116c   : > { %829 = vrot.lane.b32.xlu0 %v827_v31, %s1644_s17 }
0x11de   : > { %v830_v33 = vpop.permute.xlu0 %829 }
0x11df   : > { %v832_v34 = vadd.f32 %v1557_v26, %v830_v33  ;;  %v959_v26 = vld [vmem:[%s958_s16] sm:$0x3]  ;;  %s1181_s16 = sshll.u32 %s291_s15, 4  ;;  %s1997_s16 = int_to_ptr.vmem [resolvable:$true] %s1181_s16 }
0x11e1   : > { %v837_v36 = vsub.f32 %v832_v34, %v835_v35 }
0x11e3   : > { %v843_v37 = vmul.f32 %v841_v32, %v837_v36 }
0x11e5   : > { %845 = vrot.lane.b32.xlu0 %v843_v37, %s1642_s26 }
0x1257   : > { %v846_v38 = vpop.permute.xlu0 %845 }
0x1258   : > { %v848_v39 = vadd.f32 %v846_v38, %v746_v8 }
0x125a   : > { %v849_v40 = vmul.f32 %v848_v39, %v841_v32  ;;  %v858_v41 = vpack.c.bf16 %v848_v39, %v848_v39 }
0x125c   : > { %851 = vst.msk [vmem:[%s850_s14] sm:$0x3] %vm442_vm2, %v849_v40  ;;  %1461 = vmatmul.mubr.msk.bf16.vlgmr.msra.gmra.mrb[8].mxu1 %vm347_vm1, %v858_v41  ;;  %s1386_s14 = sshll.u32 %s1702_s25, 5  ;;  %s1576_s25 = scalar_lea.vmem %s1997_s16, 32 }
0x125d   : > { %1473 = vmatpush3.bf16.msra.mxu1 %v1746_v1  ;;  %1476 = vmatprep.mubr.msk.bf16.mxu1 %vm1641_vm0, %v1640_v0  ;;  %v855_v1 = vld [vmem:[%s854_s18] sm:$0x3]  ;;  %s1054_s18 = scalar_lea.vmem %s1805_s20, %s1954_s9  ;;  %s1060_s9 = scalar_lea.vmem %s2045_s1, %s1976_s28 }
0x125e   : > { %1474 = vmatprep.subr.bf16.mxu1 %v1640_v0  ;;  %s1995_s19 = scalar_lea.hbm %s2050_s6, %s1386_s14  ;;  %p1577_p12 = scmp.ne.s32.totalorder %s1997_s16, %s1576_s25 }
0x1260   : > { %p1578_p13 = pnand %p1577_p12, %p1719_p5 }
0x1261   : > { %1475 = vmatpush3.bf16.msra.mxu1 %v1749_v2 }
0x1262   : > { %p1579_p0 = pneg %p1578_p13 }
0x132f   : > { %v896_v42 = vpop.f32.mrb[8].mxu1 }
0x1330   : > { %v897_v43 = vadd.f32 %v1772_v5, %v896_v42  ;;  %v1462_v44 = vpop.f32.mrb[9].mxu1 }
0x1331   : > { %v899_v45 = vpop.f32.mrb[10].mxu1 }
0x1332   : > { %910 = vrot.lane.b32.xlu1 %v897_v43, %s1642_s26  ;;  %v1463_v46 = vpop.f32.mrb[11].mxu1  ;;  %v902_v47 = vadd.f32 %v897_v43, %v855_v1 }
0x1333   : > { %v1059_v46 = vld [vmem:[%s1058_s10] sm:$0x3]  ;;  %s1156_s10 = scalar_lea.vmem %s1805_s20, %s1976_s28 }
0x1334   : > { %v1378_v0 = vmul.f32 -1.442695, %v902_v47 }
0x1336   : > { %1558 = vpow2.f32 %v1378_v0 }
0x1340   : > { %v1559_v2 = vpop.eup %1558 }
0x1341   : > { %v906_v48 = vadd.f32 1.0, %v1559_v2 }
0x1343   : > { %1560 = vrcp.f32 %v906_v48 }
0x134d   : > { %v1561_v49 = vpop.eup %1560 }
0x13a4   : > { %v911_v50 = vpop.permute.xlu1 %910 }
0x13a5   : > { %v913_v51 = vmul.f32 %v1561_v49, %v911_v50 }
0x13a7   : > { %915 = vrot.lane.b32.xlu0 %v913_v51, %s1642_s26 }
0x1419   : > { %v916_v52 = vpop.permute.xlu0 %915 }
0x141a   : > { %v918_v53 = vadd.f32 %v916_v52, %v855_v1 }
0x141c   : > { %1562 = vtanh.f32 %v918_v53  ;;  %v1061_v53 = vld [vmem:[%s1060_s9] sm:$0x3] }
0x1426   : > { %v1563_v54 = vpop.eup %1562 }
0x1427   : > { %921 = vrot.lane.b32.xlu1 %v1563_v54, %s1642_s26 }
0x142b   : > { %942 = vperm.xlu1 %1525, %v857_v55  }
0x142f   : > { %936 = vrot.lane.b32.xlu1 %v848_v39, %s1642_s26 }
0x1499   : > { %v922_v56 = vpop.permute.xlu1 %921 }
0x149a   : > { %v924_v57 = vsub.f32 %v848_v39, %v922_v56 }
0x149c   : > { %926 = vrot.lane.b32.xlu0 %v924_v57, %s1644_s17 }
0x14aa   : > { %v943_v60 = vpop.permute.xlu1 %942 }
0x14ae   : > { %v937_v63 = vpop.permute.xlu1 %936 }
0x150e   : > { %v927_v58 = vpop.permute.xlu0 %926 }
0x150f   : > { %v929_v59 = vmul.f32 %v1561_v49, %v927_v58 }
0x1511   : > { %931 = vrot.lane.b32.xlu0 %v929_v59, %s1644_s17 }
0x1583   : > { %v932_v61 = vpop.permute.xlu0 %931 }
0x1584   : > { %v934_v62 = vadd.f32 %v1563_v54, %v932_v61 }
0x1586   : > { %v939_v3 = vsub.f32 %v934_v62, %v937_v63 }
0x1588   : > { %v945_v4 = vmul.f32 %v943_v60, %v939_v3 }
0x158a   : > { %947 = vrot.lane.b32.xlu0 %v945_v4, %s1642_s26 }
0x15fc   : > { %v948_v6 = vpop.permute.xlu0 %947 }
0x15fd   : > { %v950_v7 = vadd.f32 %v948_v6, %v848_v39 }
0x15ff   : > { %v951_v8 = vmul.f32 %v950_v7, %v943_v60  ;;  %v960_v9 = vpack.c.bf16 %v950_v7, %v950_v7 }
0x1601   : > { %953 = vst.msk [vmem:[%s952_s29] sm:$0x3] %vm442_vm2, %v951_v8  ;;  %1469 = vmatmul.mubr.msk.bf16.vlgmr.msra.gmra.mrb[12].mxu0 %vm347_vm1, %v960_v9  ;;  %s1645_s29 = smov [#allocation2]  }
0x1602   : > { %s1580_s11 = sshll.u32 %s1645_s29, 4  ;;  %s1581_s11 = int_to_ptr.vmem [resolvable:$false] %s1580_s11 }
0x1603   : > { %s1582_s9 = scalar_lea.vmem %s1581_s11, 64  ;;  %p1583_p1 = scmp.lt.s32.totalorder %s1997_s16, %s1581_s11 }
0x1604   : > { %p1584_p2 = scmp.lt.s32.totalorder %s1582_s9, %s1576_s25 }
0x1606   : > { %p1585_p3 = por %p1584_p2, %p1583_p1 }
0x1608   : > { %p1586_p4 = pnand %p1585_p3, %p1579_p0 }
0x16d4   : > { %v998_v10 = vpop.f32.mrb[12].mxu0 }
0x16d5   : > { %v999_v11 = vadd.f32 %v1772_v5, %v998_v10  ;;  %v1470_v12 = vpop.f32.mrb[13].mxu0 }
0x16d6   : > { %v1001_v13 = vpop.f32.mrb[14].mxu0 }
0x16d7   : > { %1012 = vrot.lane.b32.xlu1 %v999_v11, %s1642_s26  ;;  %v1471_v14 = vpop.f32.mrb[15].mxu0  ;;  %v1004_v16 = vadd.f32 %v999_v11, %v957_v15 }
0x16d9   : > { %v1381_v17 = vmul.f32 -1.442695, %v1004_v16 }
0x16db   : > { %1564 = vpow2.f32 %v1381_v17 }
0x16e5   : > { %v1565_v18 = vpop.eup %1564 }
0x16e6   : > { %v1008_v19 = vadd.f32 1.0, %v1565_v18 }
0x16e8   : > { %1566 = vrcp.f32 %v1008_v19 }
0x16f2   : > { %v1567_v20 = vpop.eup %1566 }
0x1749   : > { %v1013_v21 = vpop.permute.xlu1 %1012 }
0x174a   : > { %v1015_v22 = vmul.f32 %v1567_v20, %v1013_v21 }
0x174c   : > { %1017 = vrot.lane.b32.xlu0 %v1015_v22, %s1642_s26 }
0x17be   : > { %v1018_v23 = vpop.permute.xlu0 %1017 }
0x17bf   : > { %v1020_v24 = vadd.f32 %v1018_v23, %v957_v15 }
0x17c1   : > { %1568 = vtanh.f32 %v1020_v24 }
0x17cb   : > { %v1569_v25 = vpop.eup %1568 }
0x17cc   : > { %1023 = vrot.lane.b32.xlu1 %v1569_v25, %s1642_s26 }
0x17d0   : > { %1044 = vperm.xlu1 %1525, %v959_v26  }
0x17d4   : > { %1038 = vrot.lane.b32.xlu1 %v950_v7, %s1642_s26 }
0x183e   : > { %v1024_v27 = vpop.permute.xlu1 %1023 }
0x183f   : > { %v1026_v28 = vsub.f32 %v950_v7, %v1024_v27 }
0x1841   : > { %1028 = vrot.lane.b32.xlu0 %v1026_v28, %s1644_s17 }
0x184f   : > { %v1045_v31 = vpop.permute.xlu1 %1044 }
0x1853   : > { %v1039_v34 = vpop.permute.xlu1 %1038 }
0x18b3   : > { %v1029_v29 = vpop.permute.xlu0 %1028 }
0x18b4   : > { %v1031_v30 = vmul.f32 %v1567_v20, %v1029_v29 }
0x18b6   : > { %1033 = vrot.lane.b32.xlu0 %v1031_v30, %s1644_s17 }
0x1928   : > { %v1034_v32 = vpop.permute.xlu0 %1033 }
0x1929   : > { %v1036_v33 = vadd.f32 %v1569_v25, %v1034_v32 }
0x192b   : > { %v1041_v35 = vsub.f32 %v1036_v33, %v1039_v34 }
0x192d   : > { %v1047_v36 = vmul.f32 %v1045_v31, %v1041_v35 }
0x192f   : > { %1049 = vrot.lane.b32.xlu0 %v1047_v36, %s1642_s26 }
0x19a1   : > { %v1050_v37 = vpop.permute.xlu0 %1049 }
0x19a2   : > { %v1052_v38 = vadd.f32 %v1050_v37, %v950_v7 }
0x19a4   : > { %v1053_v39 = vmul.f32 %v1052_v38, %v1045_v31  ;;  %v1062_v40 = vpack.c.bf16 %v1052_v38, %v1052_v38 }
0x19a6   : > { %1055 = vst.msk [vmem:[%s1054_s18] sm:$0x3] %vm442_vm2, %v1053_v39  ;;  %1477 = vmatmul.mubr.msk.bf16.vlgmr.msra.gmra.mrb[12].mxu1 %vm347_vm1, %v1062_v40 }
0x1a79   : > { %v1100_v41 = vpop.f32.mrb[12].mxu1 }
0x1a7a   : > { %v1101_v42 = vadd.f32 %v1772_v5, %v1100_v41  ;;  %v1478_v43 = vpop.f32.mrb[13].mxu1 }
0x1a7b   : > { %v1103_v44 = vpop.f32.mrb[14].mxu1 }
0x1a7c   : > { %1114 = vrot.lane.b32.xlu1 %v1101_v42, %s1642_s26  ;;  %v1479_v45 = vpop.f32.mrb[15].mxu1  ;;  %v1106_v1 = vadd.f32 %v1101_v42, %v1059_v46 }
0x1a7e   : > { %v1384_v47 = vmul.f32 -1.442695, %v1106_v1 }
0x1a80   : > { %1570 = vpow2.f32 %v1384_v47 }
0x1a8a   : > { %v1571_v0 = vpop.eup %1570 }
0x1a8b   : > { %v1110_v2 = vadd.f32 1.0, %v1571_v0 }
0x1a8d   : > { %1572 = vrcp.f32 %v1110_v2 }
0x1a97   : > { %v1573_v5 = vpop.eup %1572 }
0x1aee   : > { %v1115_v48 = vpop.permute.xlu1 %1114 }
0x1aef   : > { %v1117_v49 = vmul.f32 %v1573_v5, %v1115_v48 }
0x1af1   : > { %1119 = vrot.lane.b32.xlu0 %v1117_v49, %s1642_s26 }
0x1b63   : > { %v1120_v50 = vpop.permute.xlu0 %1119 }
0x1b64   : > { %v1122_v51 = vadd.f32 %v1120_v50, %v1059_v46 }
0x1b66   : > { %1574 = vtanh.f32 %v1122_v51 }
0x1b70   : > { %v1575_v52 = vpop.eup %1574 }
0x1b71   : > { %1125 = vrot.lane.b32.xlu1 %v1575_v52, %s1642_s26 }
0x1b75   : > { %1146 = vperm.xlu1 %1525, %v1061_v53  }
0x1b79   : > { %1140 = vrot.lane.b32.xlu1 %v1052_v38, %s1642_s26 }
0x1be3   : > { %v1126_v54 = vpop.permute.xlu1 %1125 }
0x1be4   : > { %v1128_v55 = vsub.f32 %v1052_v38, %v1126_v54 }
0x1be6   : > { %1130 = vrot.lane.b32.xlu0 %v1128_v55, %s1644_s17 }
0x1bf4   : > { %v1147_v58 = vpop.permute.xlu1 %1146 }
0x1bf8   : > { %v1141_v61 = vpop.permute.xlu1 %1140 }
0x1c58   : > { %v1131_v56 = vpop.permute.xlu0 %1130 }
0x1c59   : > { %v1133_v57 = vmul.f32 %v1573_v5, %v1131_v56 }
0x1c5b   : > { %1135 = vrot.lane.b32.xlu0 %v1133_v57, %s1644_s17 }
0x1ccd   : > { %v1136_v59 = vpop.permute.xlu0 %1135 }
0x1cce   : > { %v1138_v60 = vadd.f32 %v1575_v52, %v1136_v59 }
0x1cd0   : > { %v1143_v62 = vsub.f32 %v1138_v60, %v1141_v61 }
0x1cd2   : > { %v1149_v63 = vmul.f32 %v1147_v58, %v1143_v62 }
0x1cd4   : > { %1151 = vrot.lane.b32.xlu0 %v1149_v63, %s1642_s26  ;;  %s1165_s26 = scalar_lea.sflag [#allocation3], %s289_s12 }
0x1d46   : > { %v1152_v3 = vpop.permute.xlu0 %1151 }
0x1d47   : > { %v1154_v4 = vadd.f32 %v1152_v3, %v1052_v38 }
0x1d49   : > { %v1155_v6 = vmul.f32 %v1154_v4, %v1147_v58  ;;  %1158 = vst.msk [vmem:[%s291_s15] sm:$0x3] %vm442_vm2, %v1154_v4 }
0x1d4a   : > { %1589 = shalt.err (!%p1586_p4)
}
0x1d4b   : > { %s1590_s12 = scalar_lea.hbm %s1995_s19, 32  ;;  %s1594_s15 = scalar_lea.hbm %s2050_s6, 64 }
0x1d4c   : > { %p1591_p7 = scmp.ne.s32.totalorder %s1995_s19, %s1590_s12  ;;  %p1595_p10 = scmp.lt.u32.totalorder %s1995_s19, %s2050_s6 }
0x1d4d   : > { %p1596_p11 = scmp.lt.u32.totalorder %s1594_s15, %s1590_s12  ;;  %p1598_p13 = scmp.lt.u32.totalorder %s1590_s12, %s1995_s19 }
0x1d4e   : > { %p1592_p8 = pnand %p1591_p7, %p1719_p5 }
0x1d4f   : > { %p1597_p12 = por %p1596_p11, %p1595_p10 }
0x1d50   : > { %p1593_p9 = pneg %p1592_p8 }
0x1d51   : > { %p1599_p0 = por %p1598_p13, %p1597_p12 }
0x1d53   : > { %p1600_p1 = pnand %p1599_p0, %p1593_p9 }
0x1d55   : > { %1603 = shalt.err (!%p1600_p1)
}
0x1d56   : > { %1480 = dma.vmem_to_hbm [thread:$0]  (%p1719_p5), %s1997_s16, 32, %s1995_s19, %s1165_s26   ;;  %1157 = vst.msk [vmem:[%s1156_s10] sm:$0x3] %vm442_vm2, %v1155_v6 }
0x1d57 PF: > { %p1486_p2 = scmp.ge.s32.totalorder %s1638_s24, 2  ;;  %s1201_s25 = sand.u32 1, %s1626_s21  }
0x1d58   : > { %s1202_s29 = scalar_lea.sflag [#allocation3], %s1201_s25 }
0x1d59   : > { %p1483_p3 = pnand %p1486_p2, %p1723_p6 }
0x1d5b   : > { %1621 = dma.done.wait (!%p1483_p3), %s1202_s29, 32  }
0x1d5c   : > { %1623 = vsyncadd (!%p1483_p3), %s1202_s29, 4294967264  ;;  %p17_p5 = scmp.ge.s32.totalorder %s1706_s27, 4   ;;  %s2053_s21 = smov %s1630_s22 }
0x1d5d   : > { %s2054_s22 = smov %s1634_s23  ;;  %s2055_s23 = smov %s1717_s30 }
0x1d5e   : > { %s2056_s24 = smov %s1706_s27  ;;  %19 = sbr.rel (!%p17_p5) target bundleno = 3 (0x3), region = 120 }
0x1d65   :  { %1207 = vsyncpa [#allocation3], 1 }
0x1d66   :  { %1209 = vsyncpa [#allocation3 + $0x1], 1 }

// kernel: resonance_forward.11
= control target key start
LH: loop header
LB: loop body
LE: loop exit
PB: predicated region body
PF: predicated region fallthrough
CT: control target
= control target key end

     0   :  { %v207_v0 = vmov 0.0   ;;  %vm208_vm0 = vmmov 0   ;;  %vm70_vm1 = vcmask 523264   ;;  %s287_s2 = inlined_call_operand.vmem [shape: bf16[64,64], index: 2, kind: input, shape index: {}]   ;;  %s288_s0 = inlined_call_operand.vmem [shape: bf16[16,64], index: 0, kind: input, shape index: {}]   ;;  %s289_s3 = inlined_call_operand.vmem [shape: f32[1,64], index: 3, kind: input, shape index: {}]   ;;  %s290_s1 = inlined_call_operand.vmem [shape: f32[16,64], index: 1, kind: input, shape index: {}]   ;;  %s291_s4 = inlined_call_operand.vmem [shape: f32[1,64], index: 4, kind: input, shape index: {}]   ;;  %s292_s5 = inlined_call_operand.vmem [shape: f32[1,64], index: 5, kind: input, shape index: {}]   ;;  %s293_s6 = inlined_call_operand.vmem [shape: f32[16,64], index: 6, kind: output, shape index: {}]  }
   0x1   :  { %184 = vmatprep.subr.bf16.mxu0 %v207_v0  ;;  %v198_v1 = vld [vmem:[%s287_s2] sm:$0xff]   ;;  %192 = vmatprep.mubr.msk.bf16.mxu0 %vm208_vm0, %v207_v0  ;;  %v199_v2 = vld [vmem:[%s287_s2 + $0x8] sm:$0xff]   ;;  %v200_v3 = vld [vmem:[%s287_s2 + $0x10] sm:$0xff]  }
   0x2   :  { %185 = vmatpush3.bf16.msra.mxu0 %v198_v1  ;;  %v201_v4 = vld [vmem:[%s287_s2 + $0x18] sm:$0xff]   ;;  %v202_v5 = vld [vmem:[%s288_s0] sm:$0xff]   ;;  %v116_v12 = vld [vmem:[%s290_s1 + $0x8] sm:$0xff] }
   0x3   :  { %186 = vmatprep.subr.bf16.mxu0 %v207_v0  ;;  %v170_v6 = vld [vmem:[%s289_s3] ss:$0 sm:$0xff] }
   0x4   :  { %v115_v8 = vld [vmem:[%s290_s1] sm:$0xff] }
   0x5   :  { %v177_v36 = vld [vmem:[%s291_s4] ss:$0 sm:$0xff] }
   0x6   :  { %187 = vmatpush3.bf16.msra.mxu0 %v199_v2  ;;  %v178_v38 = vld [vmem:[%s292_s5] ss:$0 sm:$0xff] }
   0x7   :  { %188 = vmatprep.subr.bf16.mxu0 %v207_v0 }
   0xa   :  { %189 = vmatpush3.bf16.msra.mxu0 %v200_v3 }
   0xb   :  { %190 = vmatprep.subr.bf16.mxu0 %v207_v0 }
   0xe   :  { %191 = vmatpush3.bf16.msra.mxu0 %v201_v4 }
  0x11   :  { %193 = vmatmul.mubr.msk.bf16.vlgmr.msra.gmra.mrb[0].mxu0 %vm70_vm1, %v202_v5 }
  0xe4   :  { %v108_v7 = vpop.f32.mrb[0].mxu0 }
  0xe5   :  { %v109_v9 = vadd.f32 %v170_v6, %v108_v7  ;;  %v194_v10 = vpop.f32.mrb[1].mxu0 }
  0xe6   :  { %v111_v11 = vpop.f32.mrb[2].mxu0 }
  0xe7   :  { %v112_v13 = vadd.f32 %v170_v6, %v111_v11  ;;  %v195_v14 = vpop.f32.mrb[3].mxu0  ;;  %v117_v15 = vadd.f32 %v115_v8, %v109_v9 }
  0xe9   :  { %v121_v16 = vsel %vm70_vm1, %v117_v15, 0.0  ;;  %v118_v17 = vadd.f32 %v116_v12, %v112_v13 }
  0xea   :  { %122 = vadd.xlane.f32.xlu0 %v121_v16 }
  0xeb   :  { %v124_v18 = vsel %vm70_vm1, %v118_v17, 0.0 }
  0xee   :  { %125 = vadd.xlane.f32.xlu0 %v124_v18 }
 0x177   :  { %v123_v19 = vpop.xlane.xlu0 %122 }
 0x178   :  { %v128_v20 = vmul.f32 0.015625, %v123_v19 }
 0x17a   :  { %v130_v21 = vsub.f32 %v117_v15, %v128_v20 }
 0x17b   :  { %v126_v22 = vpop.xlane.xlu0 %125 }
 0x17c   :  { %v129_v23 = vmul.f32 0.015625, %v126_v22  ;;  %v132_v24 = vmul.f32 %v130_v21, %v130_v21 }
 0x17e   :  { %v131_v25 = vsub.f32 %v118_v17, %v129_v23  ;;  %v134_v26 = vsel %vm70_vm1, %v132_v24, 0.0 }
 0x17f   :  { %135 = vadd.xlane.f32.xlu1 %v134_v26 }
 0x180   :  { %v133_v27 = vmul.f32 %v131_v25, %v131_v25 }
 0x182   :  { %v137_v28 = vsel %vm70_vm1, %v133_v27, 0.0 }
 0x183   :  { %138 = vadd.xlane.f32.xlu1 %v137_v28 }
 0x20c   :  { %v136_v29 = vpop.xlane.xlu1 %135 }
 0x20d   :  { %v140_v30 = vmul.f32 0.015625, %v136_v29 }
 0x20f   :  { %v142_v31 = vadd.f32 1e-05, %v140_v30 }
 0x210   :  { %v139_v32 = vpop.xlane.xlu1 %138 }
 0x211   :  { %203 = vrsqrt.f32 %v142_v31  ;;  %v141_v33 = vmul.f32 0.015625, %v139_v32 }
 0x213   :  { %v143_v34 = vadd.f32 1e-05, %v141_v33 }
 0x215   :  { %205 = vrsqrt.f32 %v143_v34 }
 0x21b   :  { %v204_v35 = vpop.eup %203 }
 0x21c   :  { %v146_v37 = vmul.f32 %v204_v35, %v130_v21 }
 0x21e   :  { %v154_v39 = vmul.f32 %v177_v36, %v146_v37 }
 0x21f   :  { %v206_v40 = vpop.eup %205 }
 0x220   :  { %v162_v41 = vadd.f32 %v178_v38, %v154_v39  ;;  %v147_v42 = vmul.f32 %v206_v40, %v131_v25 }
 0x222   :  { %164 = vst.msk [vmem:[%s293_s6] sm:$0xff] %vm70_vm1, %v162_v41  ;;  %v155_v43 = vmul.f32 %v177_v36, %v147_v42 }
 0x224   :  { %v163_v44 = vadd.f32 %v178_v38, %v155_v43 }
 0x226   :  { %165 = vst.msk [vmem:[%s293_s6 + $0x8] sm:$0xff] %vm70_vm1, %v163_v44 }

// kernel: resonance_forward.12
= control target key start
LH: loop header
LB: loop body
LE: loop exit
PB: predicated region body
PF: predicated region fallthrough
CT: control target
= control target key end

     0   :  { %v208_v0 = vmov 0.0   ;;  %vm209_vm0 = vmmov 0   ;;  %vm75_vm1 = vcmask 523264   ;;  %vm122_vm2 = vcmask 261120   ;;  %s287_s2 = inlined_call_operand.vmem [shape: bf16[64,32], index: 2, kind: input, shape index: {}]   ;;  %s288_s0 = inlined_call_operand.vmem [shape: f32[16,64], index: 0, kind: input, shape index: {}]   ;;  %s289_s1 = inlined_call_operand.vmem [shape: f32[1,64], index: 1, kind: input, shape index: {}]   ;;  %s290_s3 = inlined_call_operand.vmem [shape: f32[1,32], index: 3, kind: input, shape index: {}]   ;;  %s291_s4 = inlined_call_operand.vmem [shape: f32[1,32], index: 4, kind: input, shape index: {}]   ;;  %s292_s5 = inlined_call_operand.vmem [shape: f32[1,32], index: 5, kind: input, shape index: {}]   ;;  %s293_s6 = inlined_call_operand.vmem [shape: f32[16,32], index: 6, kind: output, shape index: {}]  }
   0x1   :  { %186 = vmatprep.subr.bf16.mxu0 %v208_v0  ;;  %v200_v1 = vld [vmem:[%s287_s2] sm:$0xff]   ;;  %194 = vmatprep.mubr.msk.bf16.mxu0 %vm209_vm0, %v208_v0  ;;  %v201_v2 = vld [vmem:[%s287_s2 + $0x8] sm:$0xff]   ;;  %v202_v3 = vld [vmem:[%s287_s2 + $0x10] sm:$0xff]  }
   0x2   :  { %187 = vmatpush3.bf16.msra.mxu0 %v200_v1  ;;  %v24_v4 = vld [vmem:[%s288_s0] sm:$0xff]  ;;  %v25_v5 = vld [vmem:[%s288_s0 + $0x8] sm:$0xff]  ;;  %v203_v9 = vld [vmem:[%s287_s2 + $0x18] sm:$0xff]  }
   0x3   :  { %188 = vmatprep.subr.bf16.mxu0 %v208_v0  ;;  %v172_v6 = vld [vmem:[%s289_s1] ss:$0 sm:$0xff] }
   0x4   :  { %v33_v7 = vadd.f32 %v172_v6, %v24_v4  ;;  %v34_v8 = vadd.f32 %v172_v6, %v25_v5  ;;  %v173_v11 = vld [vmem:[%s290_s3] ss:$0 sm:$0xff] }
   0x5   :  { %v179_v37 = vld [vmem:[%s291_s4] ss:$0 sm:$0xff] }
   0x6   :  { %189 = vmatpush3.bf16.msra.mxu0 %v201_v2  ;;  %v35_v10 = vpack.c.bf16 %v34_v8, %v33_v7  ;;  %v180_v39 = vld [vmem:[%s292_s5] ss:$0 sm:$0xff] }
   0x7   :  { %190 = vmatprep.subr.bf16.mxu0 %v208_v0 }
   0xa   :  { %191 = vmatpush3.bf16.msra.mxu0 %v202_v3 }
   0xb   :  { %192 = vmatprep.subr.bf16.mxu0 %v208_v0 }
   0xe   :  { %193 = vmatpush3.bf16.msra.mxu0 %v203_v9 }
  0x11   :  { %195 = vmatmul.mubr.msk.bf16.vlgmr.msra.gmra.mrb[0].mxu0 %vm75_vm1, %v35_v10 }
  0xe4   :  { %v113_v12 = vpop.f32.mrb[0].mxu0 }
  0xe5   :  { %v114_v13 = vadd.f32 %v173_v11, %v113_v12  ;;  %v196_v14 = vpop.f32.mrb[1].mxu0 }
  0xe6   :  { %v116_v15 = vpop.f32.mrb[2].mxu0 }
  0xe7   :  { %v117_v16 = vadd.f32 %v173_v11, %v116_v15  ;;  %v197_v17 = vpop.f32.mrb[3].mxu0  ;;  %v123_v18 = vsel %vm122_vm2, %v114_v13, 0.0 }
  0xe8   :  { %124 = vadd.xlane.f32.xlu0 %v123_v18 }
  0xe9   :  { %v126_v19 = vsel %vm122_vm2, %v117_v16, 0.0 }
  0xec   :  { %127 = vadd.xlane.f32.xlu0 %v126_v19 }
 0x175   :  { %v125_v20 = vpop.xlane.xlu0 %124 }
 0x176   :  { %v130_v21 = vmul.f32 0.03125, %v125_v20 }
 0x178   :  { %v132_v22 = vsub.f32 %v114_v13, %v130_v21 }
 0x179   :  { %v128_v23 = vpop.xlane.xlu0 %127 }
 0x17a   :  { %v131_v24 = vmul.f32 0.03125, %v128_v23  ;;  %v134_v25 = vmul.f32 %v132_v22, %v132_v22 }
 0x17c   :  { %v133_v26 = vsub.f32 %v117_v16, %v131_v24  ;;  %v136_v27 = vsel %vm122_vm2, %v134_v25, 0.0 }
 0x17d   :  { %137 = vadd.xlane.f32.xlu1 %v136_v27 }
 0x17e   :  { %v135_v28 = vmul.f32 %v133_v26, %v133_v26 }
 0x180   :  { %v139_v29 = vsel %vm122_vm2, %v135_v28, 0.0 }
 0x181   :  { %140 = vadd.xlane.f32.xlu1 %v139_v29 }
 0x20a   :  { %v138_v30 = vpop.xlane.xlu1 %137 }
 0x20b   :  { %v142_v31 = vmul.f32 0.03125, %v138_v30 }
 0x20d   :  { %v144_v32 = vadd.f32 1e-05, %v142_v31 }
 0x20e   :  { %v141_v33 = vpop.xlane.xlu1 %140 }
 0x20f   :  { %204 = vrsqrt.f32 %v144_v32  ;;  %v143_v34 = vmul.f32 0.03125, %v141_v33 }
 0x211   :  { %v145_v35 = vadd.f32 1e-05, %v143_v34 }
 0x213   :  { %206 = vrsqrt.f32 %v145_v35 }
 0x219   :  { %v205_v36 = vpop.eup %204 }
 0x21a   :  { %v148_v38 = vmul.f32 %v205_v36, %v132_v22 }
 0x21c   :  { %v156_v40 = vmul.f32 %v179_v37, %v148_v38 }
 0x21d   :  { %v207_v41 = vpop.eup %206 }
 0x21e   :  { %v164_v42 = vadd.f32 %v180_v39, %v156_v40  ;;  %v149_v43 = vmul.f32 %v207_v41, %v133_v26 }
 0x220   :  { %166 = vst.msk [vmem:[%s293_s6] sm:$0xff] %vm122_vm2, %v164_v42  ;;  %v157_v44 = vmul.f32 %v179_v37, %v149_v43 }
 0x222   :  { %v165_v45 = vadd.f32 %v180_v39, %v157_v44 }
 0x224   :  { %167 = vst.msk [vmem:[%s293_s6 + $0x8] sm:$0xff] %vm122_vm2, %v165_v45 }

// kernel: resonance_forward.13
= control target key start
LH: loop header
LB: loop body
LE: loop exit
PB: predicated region body
PF: predicated region fallthrough
CT: control target
= control target key end

     0   :  { %s899_s24 = smov 0   ;;  %s901_s25 = smov 0   ;;  %s1027_s0 = inlined_call_operand.vmem [shape: f32[16,32], index: 0, kind: input, shape index: {}]   ;;  %s1028_s1 = inlined_call_operand.vmem [shape: bf16[32,32], index: 1, kind: input, shape index: {}]   ;;  %s1029_s2 = inlined_call_operand.vmem [shape: f32[1,32], index: 2, kind: input, shape index: {}]   ;;  %s1030_s3 = inlined_call_operand.vmem [shape: f32[1,32], index: 3, kind: input, shape index: {}]   ;;  %s1031_s4 = inlined_call_operand.vmem [shape: f32[1,32], index: 4, kind: input, shape index: {}]   ;;  %s1032_s5 = inlined_call_operand.vmem [shape: bf16[32,1024], index: 5, kind: input, shape index: {}]   ;;  %s1033_s6 = inlined_call_operand.vmem [shape: f32[1,1024], index: 6, kind: input, shape index: {}]   ;;  %s1034_s7 = inlined_call_operand.vmem [shape: f32[16,1024], index: 7, kind: output, shape index: {}]  }
   0x1   :  { %s903_s26 = smov 0   ;;  %s905_s27 = smov 0  }
   0x2   :  { %s907_s28 = smov 0  }
   0x3 LB: > { %s26_s29 = sadd.s32 1, %s850_s27  ;;  %s719_s30 = sadd.s32 4294967295, %s854_s28   ;;  %s854_s28 = sphi %s907_s28, %s17_s28   ;;  %s850_s27 = sphi %s905_s27, %s1039_s27   ;;  %s846_s26 = sphi %s903_s26, %s1038_s26   ;;  %s842_s25 = sphi %s901_s25, %s1037_s25   ;;  %s838_s24 = sphi %s899_s24, %s1036_s24  }
   0x4   : > { %p27_p0 = scmp.ge.s32.totalorder %s26_s29, 4  ;;  %p153_p1 = scmp.ne.s32.totalorder %s842_s25, %s838_s24 }
   0x5   : > { %p154_p2 = scmp.eq.s32.totalorder %s854_s28, 0  ;;  %p211_p4 = scmp.eq.s32.totalorder %s719_s30, 3 }
   0x6   : > { %s1041_s29 = smov (%p27_p0, %s26_s29), 0  ;;  %s146_s9 = sadd.s32 1, %s842_s25 }
   0x7   : > { %p155_p3 = por %p154_p2, %p153_p1  ;;  %s143_s8 = ssub.s32 %s850_s27, %s1041_s29 }
   0x8   : > { %p144_p5 = scmp.eq.s32.totalorder %s143_s8, 0  ;;  %p934_p6 = por %p211_p4, %p153_p1 }
   0x9   : > { %p723_p7 = scmp.ge.s32.totalorder %s854_s28, 4 }
   0xa   : > { %s939_s11 = scalar_select %p144_p5, %s842_s25, %s146_s9  }
   0xb   : > { %254 = sbr.rel (%p723_p7) target bundleno = 26 (0x1a), region = 36 }
  0x12   : > { %257 = sbr.rel (!%p155_p3) target bundleno = 26 (0x1a), region = 40  ;;  %s259_s12 = sand.u32 (%p155_p3), 1, %s842_s25  }
  0x13   : > { %s748_s13 = sshll.u32 (%p155_p3), %s850_s27, 3  ;;  %s724_s14 = sshll.u32 (%p155_p3), %s259_s12, 5 }
  0x14   : > { %s264_s17 = scalar_lea.vmem (%p155_p3), %s1032_s5, %s748_s13  ;;  %s261_s18 = scalar_lea.vmem (%p155_p3), [#allocation3], %s724_s14 }
  0x15   : > { %v298_v0 = vld [vmem:[%s264_s17] sm:$0xff] (%p155_p3) }
  0x16   : > { %v300_v1 = vld [vmem:[%s264_s17 + $0x20] sm:$0xff] (%p155_p3)  ;;  %299 = vst [vmem:[%s261_s18] sm:$0xff] (%p155_p3), %v298_v0 }
  0x17   : > { %v302_v2 = vld [vmem:[%s264_s17 + $0x40] sm:$0xff] (%p155_p3)  ;;  %301 = vst [vmem:[%s261_s18 + $0x8] sm:$0xff] (%p155_p3), %v300_v1 }
  0x18   : > { %303 = vst [vmem:[%s261_s18 + $0x10] sm:$0xff] (%p155_p3), %v302_v2  ;;  %v304_v3 = vld [vmem:[%s264_s17 + $0x60] sm:$0xff] (%p155_p3) }
  0x19   : > { %305 = vst [vmem:[%s261_s18 + $0x18] sm:$0xff] %v304_v3 }
  0x1a PF: > { %p727_p8 = scmp.ge.s32.totalorder %s854_s28, 1  ;;  %p318_p9 = scmp.lt.s32.totalorder %s854_s28, 5 }
  0x1c   : > { %p319_p10 = pnand %p727_p8, %p318_p9 }
  0x1d   : > { %s325_s19 = sand.u32 (!%p319_p10), 1, %s838_s24   ;;  %s730_s20 = sshll.u32 (!%p319_p10), %s846_s26, 1 }
  0x1e   : > { %322 = sbr.rel (%p319_p10) target bundleno = 818 (0x332), region = 82  ;;  %s728_s21 = sshll.u32 (!%p319_p10), %s325_s19, 5 }
  0x1f   : > { %p372_p11 = scmp.lt.s32.totalorder (!%p319_p10), %s730_s20, 7  ;;  %s957_s8 = scalar_lea.vmem (!%p319_p10), [#allocation3], %s728_s21 }
  0x20   : > { %s959_s9 = scalar_lea.vmem (!%p319_p10), [#allocation4], %s728_s21  ;;  %p731_p12 = scmp.ne.s32.totalorder (!%p319_p10), %s846_s26, 0 }
  0x25   : > { %s1043_s20 = smov (!%p372_p11, %s730_s20), 7  ;;  %382 = sbr.rel (%p731_p12) target bundleno = 583 (0x247), region = 90 }
  0x26   : > { %s374_s30 = scalar_lea.vmem %s1033_s6, %s1043_s20  ;;  %v804_v4 = vld [vmem:[%s1028_s1] sm:$0xff] (!%p731_p12)   ;;  %v856_v5 = vmov (!%p731_p12), 0.0   ;;  %v805_v6 = vld [vmem:[%s1028_s1 + $0x8] sm:$0xff] (!%p731_p12)   ;;  %vm857_vm0 = vmmov (!%p731_p12), 0   ;;  %vm409_vm1 = vcmask (!%p731_p12), 261120  }
  0x27   : > { %753 = vmatprep.subr.bf16.mxu0 (!%p731_p12), %v856_v5  ;;  %757 = vmatprep.mubr.msk.bf16.mxu0 (!%p731_p12), %vm857_vm0, %v856_v5  ;;  %v383_v7 = vld [vmem:[%s1027_s0] sm:$0xff] (!%p731_p12)  ;;  %v384_v8 = vld [vmem:[%s1027_s0 + $0x8] sm:$0xff] (!%p731_p12) }
  0x28   : > { %754 = vmatpush3.bf16.msra.mxu0 (!%p731_p12), %v804_v4  ;;  %v385_v9 = vpack.c.bf16 (!%p731_p12), %v384_v8, %v383_v7  ;;  %v732_v10 = vld [vmem:[%s1029_s2] ss:$0 sm:$0xff] (!%p731_p12) }
  0x29   : > { %755 = vmatprep.subr.bf16.mxu0 (!%p731_p12), %v856_v5  ;;  %v736_v36 = vld [vmem:[%s1030_s3] ss:$0 sm:$0xff] (!%p731_p12) }
  0x2a   : > { %v737_v40 = vld [vmem:[%s1031_s4] ss:$0 sm:$0xff] (!%p731_p12) }
  0x2c   : > { %756 = vmatpush3.bf16.msra.mxu0 %v805_v6 }
  0x2f   : > { %758 = vmatmul.mubr.msk.bf16.vlgmr.msra.gmra.mrb[0].mxu0 %vm409_vm1, %v385_v9 }
 0x102   : > { %v447_v11 = vpop.f32.mrb[0].mxu0 }
 0x103   : > { %v448_v12 = vadd.f32 %v732_v10, %v447_v11  ;;  %v759_v13 = vpop.f32.mrb[1].mxu0 }
 0x104   : > { %v450_v14 = vpop.f32.mrb[2].mxu0 }
 0x105   : > { %v451_v15 = vadd.f32 %v732_v10, %v450_v14  ;;  %v760_v16 = vpop.f32.mrb[3].mxu0  ;;  %v456_v17 = vsel %vm409_vm1, %v448_v12, 0.0 }
 0x106   : > { %457 = vadd.xlane.f32.xlu0 %v456_v17 }
 0x107   : > { %v459_v18 = vsel %vm409_vm1, %v451_v15, 0.0 }
 0x10a   : > { %460 = vadd.xlane.f32.xlu0 %v459_v18 }
 0x193   : > { %v458_v19 = vpop.xlane.xlu0 %457 }
 0x194   : > { %v463_v20 = vmul.f32 0.03125, %v458_v19 }
 0x196   : > { %v465_v21 = vsub.f32 %v448_v12, %v463_v20 }
 0x197   : > { %v461_v22 = vpop.xlane.xlu0 %460 }
 0x198   : > { %v464_v23 = vmul.f32 0.03125, %v461_v22  ;;  %v467_v24 = vmul.f32 %v465_v21, %v465_v21 }
 0x19a   : > { %v466_v25 = vsub.f32 %v451_v15, %v464_v23  ;;  %v469_v26 = vsel %vm409_vm1, %v467_v24, 0.0 }
 0x19b   : > { %470 = vadd.xlane.f32.xlu1 %v469_v26 }
 0x19c   : > { %v468_v27 = vmul.f32 %v466_v25, %v466_v25 }
 0x19e   : > { %v472_v28 = vsel %vm409_vm1, %v468_v27, 0.0 }
 0x19f   : > { %473 = vadd.xlane.f32.xlu1 %v472_v28 }
 0x228   : > { %v471_v29 = vpop.xlane.xlu1 %470 }
 0x229   : > { %v475_v30 = vmul.f32 0.03125, %v471_v29 }
 0x22b   : > { %v477_v31 = vadd.f32 1e-05, %v475_v30 }
 0x22c   : > { %v474_v32 = vpop.xlane.xlu1 %473 }
 0x22d   : > { %806 = vrsqrt.f32 %v477_v31  ;;  %v476_v33 = vmul.f32 0.03125, %v474_v32 }
 0x22f   : > { %v478_v34 = vadd.f32 1e-05, %v476_v33 }
 0x231   : > { %808 = vrsqrt.f32 %v478_v34 }
 0x237   : > { %v807_v35 = vpop.eup %806 }
 0x238   : > { %v481_v37 = vmul.f32 %v807_v35, %v465_v21 }
 0x23a   : > { %v489_v38 = vmul.f32 %v736_v36, %v481_v37 }
 0x23b   : > { %v809_v39 = vpop.eup %808 }
 0x23c   : > { %v482_v41 = vmul.f32 %v809_v39, %v466_v25  ;;  %v497_v42 = vadd.f32 %v737_v40, %v489_v38 }
 0x23e   : > { %v490_v43 = vmul.f32 %v736_v36, %v482_v41  ;;  %v499_v45 = vmax.f32 %v497_v42, 0.0 }
 0x240   : > { %v498_v44 = vadd.f32 %v737_v40, %v490_v43 }
 0x242   : > { %v500_v46 = vmax.f32 %v498_v44, 0.0 }
 0x244   : > { %v501_v47 = vpack.c.bf16 %v500_v46, %v499_v45 }
 0x246   : > { %502 = vst.msk [vmem:[#allocation2] sm:$0xff] %vm409_vm1, %v501_v47 }
 0x247 PF: > { %v810_v48 = vld [vmem:[%s957_s8 + $0x4] ss:$8 sps:$4 sm:$0xff]   ;;  %v812_v49 = vld [vmem:[%s957_s8] ss:$8 sps:$4 sm:$0xff]   ;;  %v858_v50 = vmov 0   ;;  %vm540_vm2 = vcmask 261120   ;;  %v510_v54 = vlaneseq }
 0x248   : > { %576 = vmatprep.mubr.bf16.mxu0 %v858_v50  ;;  %544 = vmatprep.subr.bf16.mxu0 %v810_v48  ;;  %v813_v51 = vld [vmem:[%s957_s8 + $0x14] ss:$8 sps:$4 sm:$0xff]   ;;  %v815_v52 = vld [vmem:[%s957_s8 + $0x10] ss:$8 sps:$4 sm:$0xff]   ;;  %s749_s20 = sshll.u32 (%p934_p6), %s846_s26, 4 }
 0x249   : > { %545 = vmatpush1.bf16.msra.mxu0 %v812_v49  ;;  %v511_v55 = vshrl.u32 %v510_v54, 7  ;;  %v508_v57 = vld [vmem:[%s374_s30] sm:$0x3]  ;;  %s603_s15 = scalar_lea.vmem (%p934_p6), %s1034_s7, %s749_s20 }
 0x24a   : > { %546 = vmatprep.subr.bf16.mxu0 %v813_v51 }
 0x24b   : > { %v512_v56 = vsub.s32 0, %v511_v55  ;;  %v516_v58 = vsub.s32 1, %v511_v55 }
 0x24d   : > { %547 = vmatpush1.bf16.msra.mxu0 %v815_v52  ;;  %v503_v53 = vld [vmem:[#allocation2] sm:$0xff]  ;;  %v513_v59 = vrot.slane %v508_v57, %v512_v56  ;;  %v517_v60 = vrot.slane %v508_v57, %v516_v58 }
 0x250   : > { %742 = vmatmul.mubr.msk.bf16.vlgmr.msra.gmra.mrb[0].mxu0 %vm540_vm2, %v503_v53 }
 0x323   : > { %v578_v61 = vpop.f32.mrb[0].mxu0  ;;  %597 = sbr.rel (!%p934_p6) target bundleno = 818 (0x332), region = 94 }
 0x324   : > { %v579_v62 = vadd.f32 %v578_v61, %v513_v59  ;;  %v580_v63 = vpop.f32.mrb[1].mxu0 }
 0x325   : > { %v581_v0 = vadd.f32 %v580_v63, %v517_v60  ;;  %v582_v1 = vpop.f32.mrb[2].mxu0 }
 0x326   : > { %587 = vst [vmem:[%s959_s9] sm:$0xff] %v579_v62  ;;  %v583_v2 = vadd.f32 %v582_v1, %v513_v59  ;;  %v584_v3 = vpop.f32.mrb[3].mxu0 }
 0x327   : > { %588 = vst [vmem:[%s959_s9 + $0x8] sm:$0xff] %v581_v0  ;;  %v585_v4 = vadd.f32 %v584_v3, %v517_v60 }
 0x328   : > { %589 = vst [vmem:[%s959_s9 + $0x10] sm:$0xff] %v583_v2 }
 0x329   : > { %590 = vst [vmem:[%s959_s9 + $0x18] sm:$0xff] %v585_v4 }
 0x32d   : > { %v616_v5 = vld [vmem:[%s959_s9] sm:$0xff] }
 0x32e   : > { %v618_v6 = vld [vmem:[%s959_s9 + $0x8] sm:$0xff]  ;;  %617 = vst [vmem:[%s603_s15] sm:$0xff] %v616_v5 }
 0x32f   : > { %v620_v7 = vld [vmem:[%s959_s9 + $0x10] sm:$0xff]  ;;  %619 = vst [vmem:[%s603_s15 + $0x8] sm:$0xff] %v618_v6 }
 0x330   : > { %v622_v8 = vld [vmem:[%s959_s9 + $0x18] sm:$0xff]  ;;  %621 = vst [vmem:[%s603_s15 + $0x40] sm:$0xff] %v620_v7 }
 0x331   : > { %623 = vst [vmem:[%s603_s15 + $0x48] sm:$0xff] %v622_v8 }
 0x332 PF: > { %s17_s28 = sadd.s32 1, %s854_s28   ;;  %s1036_s24 = smov %s842_s25 }
 0x333   : > { %p14_p13 = scmp.ge.s32.totalorder %s17_s28, 6   ;;  %s1037_s25 = smov %s939_s11 }
 0x334   : > { %s1038_s26 = smov %s850_s27  ;;  %s1039_s27 = smov %s1041_s29 }
 0x335   :  { %16 = sbr.rel (!%p14_p13) target bundleno = 3 (0x3), region = 154 }

</bundles_post_ra>
